<compile_context>
chip_gen: v6e
topology: v6e:2x2x1
jax: 0.10.0
libtpu: 0.0.40
codegen_flags: <defaults>
</compile_context>

<pallas_src>
import functools

import jax
import jax.numpy as jnp
from jax import lax
from jax.experimental import pallas as pl
from jax.experimental.pallas import tpu as pltpu

PRELU_ALPHA = 0.25  # nn.PReLU() default single shared parameter


# ----------------------------------------------------------------------------
# Fused kernel: runs the full VQPromptBlock forward for one batch element.
# ----------------------------------------------------------------------------
def _vqprompt_kernel(
    x_ref, mask_ref,
    w_enc_in_ref, enc_wb1_ref, enc_wb2_ref, enc_wca1_ref, enc_wca2_ref,
    w_enc_out_ref, embed_t_ref, wd_embed_ref,
    dec_wb1_ref, dec_wb2_ref, dec_wca1_ref, dec_wca2_ref, w_dec_out_ref,
    out_ref, diff_ref,
    pad_ref, col_ref,
    *, h, w, alpha):
  f32 = jnp.float32
  bf16 = jnp.bfloat16
  hw = h * w
  hidden = pad_ref.shape[0]
  lpad = (pad_ref.shape[1] - hw) // 2          # lane-aligned halo width
  gw = 128 if hw >= 128 else hw                # width of the (pixel-invariant) CA branch

  # Zero ONLY the halo slices each grid step; the interior is overwritten by
  # every conv's store.  Per-step (not program_id==0 gated) => megacore-safe.
  zero_halo = jnp.zeros((hidden, lpad), f32)
  pad_ref[:, :lpad] = zero_halo
  pad_ref[:, lpad + hw:lpad + hw + lpad] = zero_halo

  # 0/1 keep-masks for the left/right column wrap of the flattened taps.
  lkeep = mask_ref[0:1, :]                     # (1, hw)
  rkeep = mask_ref[1:2, :]                     # (1, hw)

  def conv3x3(feat, w_flat):
    """3x3 conv, padding=1, no bias. feat: (hidden, hw) f32; w_flat: (hidden, 9*hidden) bf16."""
    pad_ref[:, lpad:lpad + hw] = feat          # aligned interior store
    for k in range(9):
      dy, dx = k // 3, k % 3
      beg = lpad + (dy - 1) * w + (dx - 1)
      tap = pad_ref[:, beg:beg + hw]           # lane-shifted read of tap (dy, dx)
      if dx == 0:
        tap = tap * lkeep                      # zero wrapped left-neighbour column
      elif dx == 2:
        tap = tap * rkeep                      # zero wrapped right-neighbour column
      col_ref[k * hidden:(k + 1) * hidden, :] = tap.astype(bf16)
    # single im2col matmul, K = 9*hidden, bf16 operands, f32 accumulation
    return jnp.dot(w_flat, col_ref[...], preferred_element_type=f32)

  def cab(feat, wb1, wb2, wca1, wca2):
    r = conv3x3(feat, wb1)
    r = jnp.where(r >= 0.0, r, alpha * r)      # PReLU (default alpha)
    r = conv3x3(r, wb2)
    # channel attention: GAP -> 1x1 -> ReLU -> 1x1 -> sigmoid -> scale (+ residual)
    # The gate is constant across pixels: compute it at width gw (one lane group),
    # then lane-broadcast the (hidden, 1) gate onto r.
    pooled = jnp.sum(r, axis=1, keepdims=True) * (1.0 / hw)          # (hidden, 1)
    pooled_b = jnp.broadcast_to(pooled, (hidden, gw)).astype(bf16)   # (hidden, gw)
    hid = jnp.maximum(jnp.dot(wca1, pooled_b, preferred_element_type=f32), 0.0)
    glin = jnp.dot(wca2, hid.astype(bf16), preferred_element_type=f32)  # (hidden, gw)
    gate = pl.reciprocal(1.0 + jnp.exp(-glin), approx=True)          # sigmoid on EUP
    return r * gate[:, 0:1] + feat             # lane-broadcast of the per-channel gate

  x = x_ref[0]                                                       # (in_ch, hw) bf16

  # ---------------- encoder: 1x1 -> CAB chain -> 1x1 ----------------
  feat = jnp.dot(w_enc_in_ref[...], x, preferred_element_type=f32)   # (hidden, hw) f32
  for i in range(enc_wb1_ref.shape[0]):
    feat = cab(feat, enc_wb1_ref[i], enc_wb2_ref[i],
               enc_wca1_ref[i], enc_wca2_ref[i])
  z = jnp.dot(w_enc_out_ref[...], feat.astype(bf16),
              preferred_element_type=f32)                            # (D, hw) f32

  # ---------------- vector quantization (per pixel over channel dim) ----------
  et = embed_t_ref[...]                                              # (K, D) bf16
  n_embed = et.shape[0]
  etf = et.astype(f32)
  cross = jnp.dot(et, z.astype(bf16), preferred_element_type=f32)    # (K, hw)
  e2 = jnp.sum(etf * etf, axis=1, keepdims=True)                     # (K, 1)
  dist = e2 - 2.0 * cross                      # reduced distance: same argmin as full ||z - e||^2
  minval = jnp.min(dist, axis=0, keepdims=True)                      # (1, hw)
  iota_k = lax.broadcasted_iota(jnp.int32, (n_embed, hw), 0).astype(f32)
  idx = jnp.min(jnp.where(dist <= minval, iota_k, float(n_embed)),
                axis=0, keepdims=True)         # first index attaining the min, (1, hw)
  onehot = (iota_k == idx).astype(bf16)                              # (K, hw)

  # commitment diff partial: sum_p ||e_idx - z_p||^2 = sum_p (min_dist_p + ||z_p||^2)
  z2 = jnp.sum(z * z, axis=0, keepdims=True)                         # (1, hw)
  dsum = jnp.sum(minval + z2, axis=1, keepdims=True)                 # (1, 1)
  diff_ref[0] = jnp.broadcast_to(dsum, (1, diff_ref.shape[-1]))

  # ------- decoder: (first 1x1 folded into codebook gather) -> CABs -> 1x1 -----
  feat = jnp.dot(wd_embed_ref[...], onehot, preferred_element_type=f32)   # (hidden, hw)
  for i in range(dec_wb1_ref.shape[0]):
    feat = cab(feat, dec_wb1_ref[i], dec_wb2_ref[i],
               dec_wca1_ref[i], dec_wca2_ref[i])
  # lane-dense (out_ch, hw) head: NCHW result is then a pure reshape in the wrapper
  out_ref[0] = jnp.dot(w_dec_out_ref[...], feat.astype(bf16),
                       preferred_element_type=f32).astype(out_ref.dtype)


# ----------------------------------------------------------------------------
# Wrapper
# ----------------------------------------------------------------------------
def vq_prompt_block_forward(kp, x_nchw):
  n, c_in, h, w = x_nchw.shape
  hw = h * w
  hidden = kp["w_enc_in"].shape[0]
  out_ch = kp["w_dec_out"].shape[0]
  n_embed, embed_ch = kp["embed_t"].shape
  n_enc_cab = kp["enc_wb1"].shape[0]
  n_dec_cab = kp["dec_wb1"].shape[0]
  cr = kp["enc_wca1"].shape[1]

  # NCHW -> (N, C, H*W): pure reshape, no transpose (channels live on sublanes).
  # bf16 input halves the per-step input DMA; all matmuls accumulate in f32.
  x = x_nchw.reshape(n, c_in, hw).astype(jnp.bfloat16)

  # 0/1 keep-masks for the column wrap of the flattened 3x3 taps (dx = -1 / +1).
  col = jnp.arange(hw, dtype=jnp.int32) % w
  masks = jnp.stack([(col != 0), (col != w - 1)], axis=0).astype(jnp.float32)

  lpad = ((w + 1 + 127) // 128) * 128          # lane-aligned halo for the padded scratch

  # VMEM budget: double-buffered inputs/outputs + scratch + headroom.
  weight_bytes = sum(int(v.size) * v.dtype.itemsize for v in kp.values())
  io_bytes = (c_in * hw * 2 + 2 * hw * 4 + out_ch * hw * 4 + 128 * 4)
  scratch_bytes = hidden * (hw + 2 * lpad) * 4 + 9 * hidden * hw * 2
  vmem_limit = int(min(max(2 * (weight_bytes + io_bytes) + scratch_bytes + (2 << 20),
                           8 << 20), 64 << 20))

  kern = functools.partial(_vqprompt_kernel, h=h, w=w, alpha=PRELU_ALPHA)
  bcast2 = lambda b: (0, 0)
  bcast3 = lambda b: (0, 0, 0)

  out, dsum = pl.pallas_call(
      kern,
      grid=(n,),
      in_specs=[
          pl.BlockSpec((1, c_in, hw), lambda b: (b, 0, 0)),
          pl.BlockSpec((2, hw), bcast2),
          pl.BlockSpec((hidden, c_in), bcast2),
          pl.BlockSpec((n_enc_cab, hidden, 9 * hidden), bcast3),
          pl.BlockSpec((n_enc_cab, hidden, 9 * hidden), bcast3),
          pl.BlockSpec((n_enc_cab, cr, hidden), bcast3),
          pl.BlockSpec((n_enc_cab, hidden, cr), bcast3),
          pl.BlockSpec((embed_ch, hidden), bcast2),
          pl.BlockSpec((n_embed, embed_ch), bcast2),
          pl.BlockSpec((hidden, n_embed), bcast2),
          pl.BlockSpec((n_dec_cab, hidden, 9 * hidden), bcast3),
          pl.BlockSpec((n_dec_cab, hidden, 9 * hidden), bcast3),
          pl.BlockSpec((n_dec_cab, cr, hidden), bcast3),
          pl.BlockSpec((n_dec_cab, hidden, cr), bcast3),
          pl.BlockSpec((out_ch, hidden), bcast2),
      ],
      out_specs=[
          pl.BlockSpec((1, out_ch, hw), lambda b: (b, 0, 0)),
          pl.BlockSpec((1, 1, 128), lambda b: (b, 0, 0)),
      ],
      out_shape=(jax.ShapeDtypeStruct((n, out_ch, hw), jnp.float32),
                 jax.ShapeDtypeStruct((n, 1, 128), jnp.float32)),
      scratch_shapes=[
          pltpu.VMEM((hidden, hw + 2 * lpad), jnp.float32),   # halo-padded feature map
          pltpu.VMEM((9 * hidden, hw), jnp.bfloat16),         # im2col buffer (bf16)
      ],
      compiler_params=pltpu.CompilerParams(
          dimension_semantics=("parallel",),   # batch across both TCs on v7x
          vmem_limit_bytes=vmem_limit),
  )(x, masks,
    kp["w_enc_in"], kp["enc_wb1"], kp["enc_wb2"], kp["enc_wca1"], kp["enc_wca2"],
    kp["w_enc_out"], kp["embed_t"], kp["wd_embed"],
    kp["dec_wb1"], kp["dec_wb2"], kp["dec_wca1"], kp["dec_wca2"], kp["w_dec_out"])

  quant = out.reshape(n, out_ch, h, w)                         # already NCHW
  diff = (jnp.sum(dsum[:, 0, 0]) / (n * hw * embed_ch)).reshape(1)  # diff.unsqueeze(0)
  return quant, diff


# ----------------------------------------------------------------------------
# Synthetic parameters (PyTorch layouts) and one-time repack to kernel layouts.
# ----------------------------------------------------------------------------
def init_params(key, in_ch, out_ch, hidden, embed_ch, n_enc_cab, n_dec_cab,
                reduction, n_embed):
  keys = iter(jax.random.split(key, 64))

  def wgt(shape, fan_in):
    scale = 1.0 / jnp.sqrt(jnp.float32(fan_in))
    return (scale * jax.random.normal(next(keys), shape)).astype(jnp.float32)

  def cab():
    return dict(
        w_body1=wgt((hidden, hidden, 3, 3), 9 * hidden),
        w_body2=wgt((hidden, hidden, 3, 3), 9 * hidden),
        w_ca1=wgt((hidden // reduction, hidden, 1, 1), hidden),
        w_ca2=wgt((hidden, hidden // reduction, 1, 1), hidden // reduction),
    )

  return dict(
      w_enc_in=wgt((hidden, in_ch, 1, 1), in_ch),
      enc_cabs=[cab() for _ in range(n_enc_cab)],
      w_enc_out=wgt((embed_ch, hidden, 1, 1), hidden),
      embed=jax.random.normal(next(keys), (embed_ch, n_embed), dtype=jnp.float32),
      w_dec_in=wgt((hidden, embed_ch, 1, 1), embed_ch),
      dec_cabs=[cab() for _ in range(n_dec_cab)],
      w_dec_out=wgt((out_ch, hidden, 1, 1), hidden),
  )


def _im2col_w(wt):
  """(cout, cin, 3, 3) torch conv weight -> (cout, 9*cin), tap-major columns."""
  cout, cin = wt.shape[0], wt.shape[1]
  return jnp.transpose(wt, (0, 2, 3, 1)).reshape(cout, 9 * cin)


def prepare_params(p):
  """One-time host-side repack of PyTorch-layout params into kernel layouts (bf16 weights)."""
  bf16 = jnp.bfloat16

  def stack(cabs):
    return (jnp.stack([_im2col_w(c["w_body1"]) for c in cabs]).astype(bf16),
            jnp.stack([_im2col_w(c["w_body2"]) for c in cabs]).astype(bf16),
            jnp.stack([c["w_ca1"][:, :, 0, 0] for c in cabs]).astype(bf16),
            jnp.stack([c["w_ca2"][:, :, 0, 0] for c in cabs]).astype(bf16))

  enc_wb1, enc_wb2, enc_wca1, enc_wca2 = stack(p["enc_cabs"])
  dec_wb1, dec_wb2, dec_wca1, dec_wca2 = stack(p["dec_cabs"])
  w_dec_in = p["w_dec_in"][:, :, 0, 0]
  return dict(
      w_enc_in=p["w_enc_in"][:, :, 0, 0].astype(bf16),
      enc_wb1=enc_wb1, enc_wb2=enc_wb2, enc_wca1=enc_wca1, enc_wca2=enc_wca2,
      w_enc_out=p["w_enc_out"][:, :, 0, 0].astype(bf16),
      embed_t=p["embed"].T.astype(bf16),                    # (n_embed, embed_ch)
      wd_embed=(w_dec_in @ p["embed"]).astype(bf16),        # dec first 1x1 folded into gather
      dec_wb1=dec_wb1, dec_wb2=dec_wb2, dec_wca1=dec_wca1, dec_wca2=dec_wca2,
      w_dec_out=p["w_dec_out"][:, :, 0, 0].astype(bf16),
  )


if __name__ == "__main__":
  key = jax.random.PRNGKey(0)
  kparam_key, kx = jax.random.split(key)

  in_ch, out_ch = 3, 1
  hidden, embed_ch = 16, 16
  n_enc_cab = n_dec_cab = 2
  reduction, n_embed = 4, 64
  batch, spatial = 2, 16

  params = init_params(kparam_key, in_ch, out_ch, hidden, embed_ch,
                       n_enc_cab, n_dec_cab, reduction, n_embed)
  kparams = prepare_params(params)
  x = jax.random.normal(kx, (batch, in_ch, spatial, spatial), dtype=jnp.float32)

  fwd = jax.jit(functools.partial(vq_prompt_block_forward, kparams))
  quant, diff = fwd(x)
  jax.block_until_ready((quant, diff))

  assert quant.shape == (batch, out_ch, spatial, spatial), quant.shape
  assert diff.shape == (1,), diff.shape
  assert bool(jnp.all(jnp.isfinite(quant))) and bool(jnp.isfinite(diff[0]))
  print("KERNEL_OK")
</pallas_src>

<mosaic_0001>
module attributes {stable_mosaic.version = 11 : i64} {
  func.func @_vqprompt_kernel(%arg0: i32, %arg1: memref<1x3x256xbf16, #tpu.memory_space<vmem>>, %arg2: memref<2x256xf32, #tpu.memory_space<vmem>>, %arg3: memref<16x3xbf16, #tpu.memory_space<vmem>>, %arg4: memref<2x16x144xbf16, #tpu.memory_space<vmem>>, %arg5: memref<2x16x144xbf16, #tpu.memory_space<vmem>>, %arg6: memref<2x4x16xbf16, #tpu.memory_space<vmem>>, %arg7: memref<2x16x4xbf16, #tpu.memory_space<vmem>>, %arg8: memref<16x16xbf16, #tpu.memory_space<vmem>>, %arg9: memref<64x16xbf16, #tpu.memory_space<vmem>>, %arg10: memref<16x64xbf16, #tpu.memory_space<vmem>>, %arg11: memref<2x16x144xbf16, #tpu.memory_space<vmem>>, %arg12: memref<2x16x144xbf16, #tpu.memory_space<vmem>>, %arg13: memref<2x4x16xbf16, #tpu.memory_space<vmem>>, %arg14: memref<2x16x4xbf16, #tpu.memory_space<vmem>>, %arg15: memref<1x16xbf16, #tpu.memory_space<vmem>>, %arg16: memref<1x1x256xf32, #tpu.memory_space<vmem>>, %arg17: memref<1x1x128xf32, #tpu.memory_space<vmem>>, %arg18: memref<16x512xf32, #tpu.memory_space<vmem>>, %arg19: memref<144x256xbf16, #tpu.memory_space<vmem>>) attributes {dimension_semantics = [#tpu.dimension_semantics<parallel>], iteration_bounds = array<i64: 2>, scalar_prefetch = 0 : i64, scratch_operands = 2 : i64, tpu.core_type = #tpu.core_type<tc>, window_params = [{transform_indices = @transform_0, window_bounds = array<i64: 1, 3, 256>}, {pipeline_mode = #tpu.pipeline_mode<synchronous>, transform_indices = @transform_1, window_bounds = array<i64: 2, 256>}, {pipeline_mode = #tpu.pipeline_mode<synchronous>, transform_indices = @transform_2, window_bounds = array<i64: 16, 3>}, {pipeline_mode = #tpu.pipeline_mode<synchronous>, transform_indices = @transform_3, window_bounds = array<i64: 2, 16, 144>}, {pipeline_mode = #tpu.pipeline_mode<synchronous>, transform_indices = @transform_4, window_bounds = array<i64: 2, 16, 144>}, {pipeline_mode = #tpu.pipeline_mode<synchronous>, transform_indices = @transform_5, window_bounds = array<i64: 2, 4, 16>}, {pipeline_mode = #tpu.pipeline_mode<synchronous>, transform_indices = @transform_6, window_bounds = array<i64: 2, 16, 4>}, {pipeline_mode = #tpu.pipeline_mode<synchronous>, transform_indices = @transform_7, window_bounds = array<i64: 16, 16>}, {pipeline_mode = #tpu.pipeline_mode<synchronous>, transform_indices = @transform_8, window_bounds = array<i64: 64, 16>}, {pipeline_mode = #tpu.pipeline_mode<synchronous>, transform_indices = @transform_9, window_bounds = array<i64: 16, 64>}, {pipeline_mode = #tpu.pipeline_mode<synchronous>, transform_indices = @transform_10, window_bounds = array<i64: 2, 16, 144>}, {pipeline_mode = #tpu.pipeline_mode<synchronous>, transform_indices = @transform_11, window_bounds = array<i64: 2, 16, 144>}, {pipeline_mode = #tpu.pipeline_mode<synchronous>, transform_indices = @transform_12, window_bounds = array<i64: 2, 4, 16>}, {pipeline_mode = #tpu.pipeline_mode<synchronous>, transform_indices = @transform_13, window_bounds = array<i64: 2, 16, 4>}, {pipeline_mode = #tpu.pipeline_mode<synchronous>, transform_indices = @transform_14, window_bounds = array<i64: 1, 16>}, {transform_indices = @transform_15, window_bounds = array<i64: 1, 1, 256>}, {transform_indices = @transform_16, window_bounds = array<i64: 1, 1, 128>}]} {
    %cst = arith.constant 0.000000e+00 : f32
    %0 = vector.broadcast %cst : f32 to vector<16x128xf32>
    %c0 = arith.constant 0 : index
    %c0_0 = arith.constant 0 : index
    %1 = vector.load %arg18[%c0, %c0_0] : memref<16x512xf32, #tpu.memory_space<vmem>>, vector<16x128xf32>
    tpu.vector_store %arg18[%c0, %c0_0], %0 {strides = array<i32>} : memref<16x512xf32, #tpu.memory_space<vmem>>, vector<16x128xf32>,
    %c0_1 = arith.constant 0 : index
    %c384 = arith.constant 384 : index
    %2 = vector.load %arg18[%c0_1, %c384] : memref<16x512xf32, #tpu.memory_space<vmem>>, vector<16x128xf32>
    tpu.vector_store %arg18[%c0_1, %c384], %0 {strides = array<i32>} : memref<16x512xf32, #tpu.memory_space<vmem>>, vector<16x128xf32>,
    %c0_2 = arith.constant 0 : index
    %c0_3 = arith.constant 0 : index
    %3 = vector.load %arg2[%c0_2, %c0_3] : memref<2x256xf32, #tpu.memory_space<vmem>>, vector<1x256xf32>
    %c1 = arith.constant 1 : index
    %c0_4 = arith.constant 0 : index
    %4 = vector.load %arg2[%c1, %c0_4] : memref<2x256xf32, #tpu.memory_space<vmem>>, vector<1x256xf32>
    %c0_5 = arith.constant 0 : index
    %c0_6 = arith.constant 0 : index
    %c0_7 = arith.constant 0 : index
    %5 = vector.load %arg1[%c0_5, %c0_6, %c0_7] : memref<1x3x256xbf16, #tpu.memory_space<vmem>>, vector<1x3x256xbf16>
    %6 = vector.shape_cast %5 : vector<1x3x256xbf16> to vector<3x256xbf16>
    %c0_8 = arith.constant 0 : index
    %c0_9 = arith.constant 0 : index
    %7 = vector.load %arg3[%c0_8, %c0_9] : memref<16x3xbf16, #tpu.memory_space<vmem>>, vector<16x3xbf16>
    %cst_10 = arith.constant dense<0.000000e+00> : vector<16x256xf32>
    %8 = tpu.matmul %7, %6, %cst_10 {dimension_numbers = #tpu.dot_dimension_numbers<[1], [0], [0], [1], [0, 0, 1, 1], [], []>} : vector<16x3xbf16>, vector<3x256xbf16>, vector<16x256xf32> -> vector<16x256xf32>
    %c0_11 = arith.constant 0 : index
    %c0_12 = arith.constant 0 : index
    %c0_13 = arith.constant 0 : index
    %9 = vector.load %arg4[%c0_11, %c0_12, %c0_13] : memref<2x16x144xbf16, #tpu.memory_space<vmem>>, vector<1x16x144xbf16>
    %10 = vector.shape_cast %9 : vector<1x16x144xbf16> to vector<16x144xbf16>
    %c0_14 = arith.constant 0 : index
    %c0_15 = arith.constant 0 : index
    %c0_16 = arith.constant 0 : index
    %11 = vector.load %arg5[%c0_14, %c0_15, %c0_16] : memref<2x16x144xbf16, #tpu.memory_space<vmem>>, vector<1x16x144xbf16>
    %12 = vector.shape_cast %11 : vector<1x16x144xbf16> to vector<16x144xbf16>
    %c0_17 = arith.constant 0 : index
    %c0_18 = arith.constant 0 : index
    %c0_19 = arith.constant 0 : index
    %13 = vector.load %arg6[%c0_17, %c0_18, %c0_19] : memref<2x4x16xbf16, #tpu.memory_space<vmem>>, vector<1x4x16xbf16>
    %14 = vector.shape_cast %13 : vector<1x4x16xbf16> to vector<4x16xbf16>
    %c0_20 = arith.constant 0 : index
    %c0_21 = arith.constant 0 : index
    %c0_22 = arith.constant 0 : index
    %15 = vector.load %arg7[%c0_20, %c0_21, %c0_22] : memref<2x16x4xbf16, #tpu.memory_space<vmem>>, vector<1x16x4xbf16>
    %16 = vector.shape_cast %15 : vector<1x16x4xbf16> to vector<16x4xbf16>
    %c0_23 = arith.constant 0 : index
    %c128 = arith.constant 128 : index
    %17 = vector.load %arg18[%c0_23, %c128] : memref<16x512xf32, #tpu.memory_space<vmem>>, vector<16x256xf32>
    tpu.vector_store %arg18[%c0_23, %c128], %8 {strides = array<i32>} : memref<16x512xf32, #tpu.memory_space<vmem>>, vector<16x256xf32>,
    %c0_24 = arith.constant 0 : index
    %c111 = arith.constant 111 : index
    %18 = vector.load %arg18[%c0_24, %c111] : memref<16x512xf32, #tpu.memory_space<vmem>>, vector<16x256xf32>
    %19 = vector.broadcast %3 : vector<1x256xf32> to vector<16x256xf32>
    %20 = arith.mulf %18, %19 : vector<16x256xf32>
    %21 = arith.truncf %20 : vector<16x256xf32> to vector<16x256xbf16>
    %c0_25 = arith.constant 0 : index
    %c0_26 = arith.constant 0 : index
    %22 = vector.load %arg19[%c0_25, %c0_26] : memref<144x256xbf16, #tpu.memory_space<vmem>>, vector<16x256xbf16>
    tpu.vector_store %arg19[%c0_25, %c0_26], %21 {strides = array<i32>} : memref<144x256xbf16, #tpu.memory_space<vmem>>, vector<16x256xbf16>,
    %c0_27 = arith.constant 0 : index
    %c112 = arith.constant 112 : index
    %23 = vector.load %arg18[%c0_27, %c112] : memref<16x512xf32, #tpu.memory_space<vmem>>, vector<16x256xf32>
    %24 = arith.truncf %23 : vector<16x256xf32> to vector<16x256xbf16>
    %c16 = arith.constant 16 : index
    %c0_28 = arith.constant 0 : index
    %25 = vector.load %arg19[%c16, %c0_28] : memref<144x256xbf16, #tpu.memory_space<vmem>>, vector<16x256xbf16>
    tpu.vector_store %arg19[%c16, %c0_28], %24 {strides = array<i32>} : memref<144x256xbf16, #tpu.memory_space<vmem>>, vector<16x256xbf16>,
    %c0_29 = arith.constant 0 : index
    %c113 = arith.constant 113 : index
    %26 = vector.load %arg18[%c0_29, %c113] : memref<16x512xf32, #tpu.memory_space<vmem>>, vector<16x256xf32>
    %27 = vector.broadcast %4 : vector<1x256xf32> to vector<16x256xf32>
    %28 = arith.mulf %26, %27 : vector<16x256xf32>
    %29 = arith.truncf %28 : vector<16x256xf32> to vector<16x256xbf16>
    %c32 = arith.constant 32 : index
    %c0_30 = arith.constant 0 : index
    %30 = vector.load %arg19[%c32, %c0_30] : memref<144x256xbf16, #tpu.memory_space<vmem>>, vector<16x256xbf16>
    tpu.vector_store %arg19[%c32, %c0_30], %29 {strides = array<i32>} : memref<144x256xbf16, #tpu.memory_space<vmem>>, vector<16x256xbf16>,
    %c0_31 = arith.constant 0 : index
    %c127 = arith.constant 127 : index
    %31 = vector.load %arg18[%c0_31, %c127] : memref<16x512xf32, #tpu.memory_space<vmem>>, vector<16x256xf32>
    %32 = vector.broadcast %3 : vector<1x256xf32> to vector<16x256xf32>
    %33 = arith.mulf %31, %32 : vector<16x256xf32>
    %34 = arith.truncf %33 : vector<16x256xf32> to vector<16x256xbf16>
    %c48 = arith.constant 48 : index
    %c0_32 = arith.constant 0 : index
    %35 = vector.load %arg19[%c48, %c0_32] : memref<144x256xbf16, #tpu.memory_space<vmem>>, vector<16x256xbf16>
    tpu.vector_store %arg19[%c48, %c0_32], %34 {strides = array<i32>} : memref<144x256xbf16, #tpu.memory_space<vmem>>, vector<16x256xbf16>,
    %c0_33 = arith.constant 0 : index
    %c128_34 = arith.constant 128 : index
    %36 = vector.load %arg18[%c0_33, %c128_34] : memref<16x512xf32, #tpu.memory_space<vmem>>, vector<16x256xf32>
    %37 = arith.truncf %36 : vector<16x256xf32> to vector<16x256xbf16>
    %c64 = arith.constant 64 : index
    %c0_35 = arith.constant 0 : index
    %38 = vector.load %arg19[%c64, %c0_35] : memref<144x256xbf16, #tpu.memory_space<vmem>>, vector<16x256xbf16>
    tpu.vector_store %arg19[%c64, %c0_35], %37 {strides = array<i32>} : memref<144x256xbf16, #tpu.memory_space<vmem>>, vector<16x256xbf16>,
    %c0_36 = arith.constant 0 : index
    %c129 = arith.constant 129 : index
    %39 = vector.load %arg18[%c0_36, %c129] : memref<16x512xf32, #tpu.memory_space<vmem>>, vector<16x256xf32>
    %40 = vector.broadcast %4 : vector<1x256xf32> to vector<16x256xf32>
    %41 = arith.mulf %39, %40 : vector<16x256xf32>
    %42 = arith.truncf %41 : vector<16x256xf32> to vector<16x256xbf16>
    %c80 = arith.constant 80 : index
    %c0_37 = arith.constant 0 : index
    %43 = vector.load %arg19[%c80, %c0_37] : memref<144x256xbf16, #tpu.memory_space<vmem>>, vector<16x256xbf16>
    tpu.vector_store %arg19[%c80, %c0_37], %42 {strides = array<i32>} : memref<144x256xbf16, #tpu.memory_space<vmem>>, vector<16x256xbf16>,
    %c0_38 = arith.constant 0 : index
    %c143 = arith.constant 143 : index
    %44 = vector.load %arg18[%c0_38, %c143] : memref<16x512xf32, #tpu.memory_space<vmem>>, vector<16x256xf32>
    %45 = vector.broadcast %3 : vector<1x256xf32> to vector<16x256xf32>
    %46 = arith.mulf %44, %45 : vector<16x256xf32>
    %47 = arith.truncf %46 : vector<16x256xf32> to vector<16x256xbf16>
    %c96 = arith.constant 96 : index
    %c0_39 = arith.constant 0 : index
    %48 = vector.load %arg19[%c96, %c0_39] : memref<144x256xbf16, #tpu.memory_space<vmem>>, vector<16x256xbf16>
    tpu.vector_store %arg19[%c96, %c0_39], %47 {strides = array<i32>} : memref<144x256xbf16, #tpu.memory_space<vmem>>, vector<16x256xbf16>,
    %c0_40 = arith.constant 0 : index
    %c144 = arith.constant 144 : index
    %49 = vector.load %arg18[%c0_40, %c144] : memref<16x512xf32, #tpu.memory_space<vmem>>, vector<16x256xf32>
    %50 = arith.truncf %49 : vector<16x256xf32> to vector<16x256xbf16>
    %c112_41 = arith.constant 112 : index
    %c0_42 = arith.constant 0 : index
    %51 = vector.load %arg19[%c112_41, %c0_42] : memref<144x256xbf16, #tpu.memory_space<vmem>>, vector<16x256xbf16>
    tpu.vector_store %arg19[%c112_41, %c0_42], %50 {strides = array<i32>} : memref<144x256xbf16, #tpu.memory_space<vmem>>, vector<16x256xbf16>,
    %c0_43 = arith.constant 0 : index
    %c145 = arith.constant 145 : index
    %52 = vector.load %arg18[%c0_43, %c145] : memref<16x512xf32, #tpu.memory_space<vmem>>, vector<16x256xf32>
    %53 = vector.broadcast %4 : vector<1x256xf32> to vector<16x256xf32>
    %54 = arith.mulf %52, %53 : vector<16x256xf32>
    %55 = arith.truncf %54 : vector<16x256xf32> to vector<16x256xbf16>
    %c128_44 = arith.constant 128 : index
    %c0_45 = arith.constant 0 : index
    %56 = vector.load %arg19[%c128_44, %c0_45] : memref<144x256xbf16, #tpu.memory_space<vmem>>, vector<16x256xbf16>
    tpu.vector_store %arg19[%c128_44, %c0_45], %55 {strides = array<i32>} : memref<144x256xbf16, #tpu.memory_space<vmem>>, vector<16x256xbf16>,
    %c0_46 = arith.constant 0 : index
    %c0_47 = arith.constant 0 : index
    %57 = vector.load %arg19[%c0_46, %c0_47] : memref<144x256xbf16, #tpu.memory_space<vmem>>, vector<144x256xbf16>
    %cst_48 = arith.constant dense<0.000000e+00> : vector<16x256xf32>
    %58 = tpu.matmul %10, %57, %cst_48 {dimension_numbers = #tpu.dot_dimension_numbers<[1], [0], [0], [1], [0, 0, 1, 1], [], []>} : vector<16x144xbf16>, vector<144x256xbf16>, vector<16x256xf32> -> vector<16x256xf32>
    %cst_49 = arith.constant 0.000000e+00 : f32
    %59 = vector.broadcast %cst_49 : f32 to vector<16x256xf32>
    %60 = arith.cmpf oge, %58, %59 : vector<16x256xf32>
    %cst_50 = arith.constant 2.500000e-01 : f32
    %61 = vector.broadcast %cst_50 : f32 to vector<16x256xf32>
    %62 = arith.mulf %61, %58 : vector<16x256xf32>
    %63 = arith.select %60, %58, %62 : vector<16x256xi1>, vector<16x256xf32>
    %c0_51 = arith.constant 0 : index
    %c128_52 = arith.constant 128 : index
    %64 = vector.load %arg18[%c0_51, %c128_52] : memref<16x512xf32, #tpu.memory_space<vmem>>, vector<16x256xf32>
    tpu.vector_store %arg18[%c0_51, %c128_52], %63 {strides = array<i32>} : memref<16x512xf32, #tpu.memory_space<vmem>>, vector<16x256xf32>,
    %c0_53 = arith.constant 0 : index
    %c111_54 = arith.constant 111 : index
    %65 = vector.load %arg18[%c0_53, %c111_54] : memref<16x512xf32, #tpu.memory_space<vmem>>, vector<16x256xf32>
    %66 = vector.broadcast %3 : vector<1x256xf32> to vector<16x256xf32>
    %67 = arith.mulf %65, %66 : vector<16x256xf32>
    %68 = arith.truncf %67 : vector<16x256xf32> to vector<16x256xbf16>
    %c0_55 = arith.constant 0 : index
    %c0_56 = arith.constant 0 : index
    %69 = vector.load %arg19[%c0_55, %c0_56] : memref<144x256xbf16, #tpu.memory_space<vmem>>, vector<16x256xbf16>
    tpu.vector_store %arg19[%c0_55, %c0_56], %68 {strides = array<i32>} : memref<144x256xbf16, #tpu.memory_space<vmem>>, vector<16x256xbf16>,
    %c0_57 = arith.constant 0 : index
    %c112_58 = arith.constant 112 : index
    %70 = vector.load %arg18[%c0_57, %c112_58] : memref<16x512xf32, #tpu.memory_space<vmem>>, vector<16x256xf32>
    %71 = arith.truncf %70 : vector<16x256xf32> to vector<16x256xbf16>
    %c16_59 = arith.constant 16 : index
    %c0_60 = arith.constant 0 : index
    %72 = vector.load %arg19[%c16_59, %c0_60] : memref<144x256xbf16, #tpu.memory_space<vmem>>, vector<16x256xbf16>
    tpu.vector_store %arg19[%c16_59, %c0_60], %71 {strides = array<i32>} : memref<144x256xbf16, #tpu.memory_space<vmem>>, vector<16x256xbf16>,
    %c0_61 = arith.constant 0 : index
    %c113_62 = arith.constant 113 : index
    %73 = vector.load %arg18[%c0_61, %c113_62] : memref<16x512xf32, #tpu.memory_space<vmem>>, vector<16x256xf32>
    %74 = vector.broadcast %4 : vector<1x256xf32> to vector<16x256xf32>
    %75 = arith.mulf %73, %74 : vector<16x256xf32>
    %76 = arith.truncf %75 : vector<16x256xf32> to vector<16x256xbf16>
    %c32_63 = arith.constant 32 : index
    %c0_64 = arith.constant 0 : index
    %77 = vector.load %arg19[%c32_63, %c0_64] : memref<144x256xbf16, #tpu.memory_space<vmem>>, vector<16x256xbf16>
    tpu.vector_store %arg19[%c32_63, %c0_64], %76 {strides = array<i32>} : memref<144x256xbf16, #tpu.memory_space<vmem>>, vector<16x256xbf16>,
    %c0_65 = arith.constant 0 : index
    %c127_66 = arith.constant 127 : index
    %78 = vector.load %arg18[%c0_65, %c127_66] : memref<16x512xf32, #tpu.memory_space<vmem>>, vector<16x256xf32>
    %79 = vector.broadcast %3 : vector<1x256xf32> to vector<16x256xf32>
    %80 = arith.mulf %78, %79 : vector<16x256xf32>
    %81 = arith.truncf %80 : vector<16x256xf32> to vector<16x256xbf16>
    %c48_67 = arith.constant 48 : index
    %c0_68 = arith.constant 0 : index
    %82 = vector.load %arg19[%c48_67, %c0_68] : memref<144x256xbf16, #tpu.memory_space<vmem>>, vector<16x256xbf16>
    tpu.vector_store %arg19[%c48_67, %c0_68], %81 {strides = array<i32>} : memref<144x256xbf16, #tpu.memory_space<vmem>>, vector<16x256xbf16>,
    %c0_69 = arith.constant 0 : index
    %c128_70 = arith.constant 128 : index
    %83 = vector.load %arg18[%c0_69, %c128_70] : memref<16x512xf32, #tpu.memory_space<vmem>>, vector<16x256xf32>
    %84 = arith.truncf %83 : vector<16x256xf32> to vector<16x256xbf16>
    %c64_71 = arith.constant 64 : index
    %c0_72 = arith.constant 0 : index
    %85 = vector.load %arg19[%c64_71, %c0_72] : memref<144x256xbf16, #tpu.memory_space<vmem>>, vector<16x256xbf16>
    tpu.vector_store %arg19[%c64_71, %c0_72], %84 {strides = array<i32>} : memref<144x256xbf16, #tpu.memory_space<vmem>>, vector<16x256xbf16>,
    %c0_73 = arith.constant 0 : index
    %c129_74 = arith.constant 129 : index
    %86 = vector.load %arg18[%c0_73, %c129_74] : memref<16x512xf32, #tpu.memory_space<vmem>>, vector<16x256xf32>
    %87 = vector.broadcast %4 : vector<1x256xf32> to vector<16x256xf32>
    %88 = arith.mulf %86, %87 : vector<16x256xf32>
    %89 = arith.truncf %88 : vector<16x256xf32> to vector<16x256xbf16>
    %c80_75 = arith.constant 80 : index
    %c0_76 = arith.constant 0 : index
    %90 = vector.load %arg19[%c80_75, %c0_76] : memref<144x256xbf16, #tpu.memory_space<vmem>>, vector<16x256xbf16>
    tpu.vector_store %arg19[%c80_75, %c0_76], %89 {strides = array<i32>} : memref<144x256xbf16, #tpu.memory_space<vmem>>, vector<16x256xbf16>,
    %c0_77 = arith.constant 0 : index
    %c143_78 = arith.constant 143 : index
    %91 = vector.load %arg18[%c0_77, %c143_78] : memref<16x512xf32, #tpu.memory_space<vmem>>, vector<16x256xf32>
    %92 = vector.broadcast %3 : vector<1x256xf32> to vector<16x256xf32>
    %93 = arith.mulf %91, %92 : vector<16x256xf32>
    %94 = arith.truncf %93 : vector<16x256xf32> to vector<16x256xbf16>
    %c96_79 = arith.constant 96 : index
    %c0_80 = arith.constant 0 : index
    %95 = vector.load %arg19[%c96_79, %c0_80] : memref<144x256xbf16, #tpu.memory_space<vmem>>, vector<16x256xbf16>
    tpu.vector_store %arg19[%c96_79, %c0_80], %94 {strides = array<i32>} : memref<144x256xbf16, #tpu.memory_space<vmem>>, vector<16x256xbf16>,
    %c0_81 = arith.constant 0 : index
    %c144_82 = arith.constant 144 : index
    %96 = vector.load %arg18[%c0_81, %c144_82] : memref<16x512xf32, #tpu.memory_space<vmem>>, vector<16x256xf32>
    %97 = arith.truncf %96 : vector<16x256xf32> to vector<16x256xbf16>
    %c112_83 = arith.constant 112 : index
    %c0_84 = arith.constant 0 : index
    %98 = vector.load %arg19[%c112_83, %c0_84] : memref<144x256xbf16, #tpu.memory_space<vmem>>, vector<16x256xbf16>
    tpu.vector_store %arg19[%c112_83, %c0_84], %97 {strides = array<i32>} : memref<144x256xbf16, #tpu.memory_space<vmem>>, vector<16x256xbf16>,
    %c0_85 = arith.constant 0 : index
    %c145_86 = arith.constant 145 : index
    %99 = vector.load %arg18[%c0_85, %c145_86] : memref<16x512xf32, #tpu.memory_space<vmem>>, vector<16x256xf32>
    %100 = vector.broadcast %4 : vector<1x256xf32> to vector<16x256xf32>
    %101 = arith.mulf %99, %100 : vector<16x256xf32>
    %102 = arith.truncf %101 : vector<16x256xf32> to vector<16x256xbf16>
    %c128_87 = arith.constant 128 : index
    %c0_88 = arith.constant 0 : index
    %103 = vector.load %arg19[%c128_87, %c0_88] : memref<144x256xbf16, #tpu.memory_space<vmem>>, vector<16x256xbf16>
    tpu.vector_store %arg19[%c128_87, %c0_88], %102 {strides = array<i32>} : memref<144x256xbf16, #tpu.memory_space<vmem>>, vector<16x256xbf16>,
    %c0_89 = arith.constant 0 : index
    %c0_90 = arith.constant 0 : index
    %104 = vector.load %arg19[%c0_89, %c0_90] : memref<144x256xbf16, #tpu.memory_space<vmem>>, vector<144x256xbf16>
    %cst_91 = arith.constant dense<0.000000e+00> : vector<16x256xf32>
    %105 = tpu.matmul %12, %104, %cst_91 {dimension_numbers = #tpu.dot_dimension_numbers<[1], [0], [0], [1], [0, 0, 1, 1], [], []>} : vector<16x144xbf16>, vector<144x256xbf16>, vector<16x256xf32> -> vector<16x256xf32>
    %cst_92 = arith.constant dense<0.000000e+00> : vector<16xf32>
    %106 = vector.multi_reduction <add>, %105, %cst_92 [1] : vector<16x256xf32> to vector<16xf32>
    %107 = vector.shape_cast %106 : vector<16xf32> to vector<16x1xf32>
    %cst_93 = arith.constant 3.906250e-03 : f32
    %108 = vector.broadcast %cst_93 : f32 to vector<16x1xf32>
    %109 = arith.mulf %107, %108 : vector<16x1xf32>
    %110 = vector.shape_cast %109 : vector<16x1xf32> to vector<16x1xf32>
    %111 = vector.broadcast %110 : vector<16x1xf32> to vector<16x128xf32>
    %112 = arith.truncf %111 : vector<16x128xf32> to vector<16x128xbf16>
    %cst_94 = arith.constant dense<0.000000e+00> : vector<4x128xf32>
    %113 = tpu.matmul %14, %112, %cst_94 {dimension_numbers = #tpu.dot_dimension_numbers<[1], [0], [0], [1], [0, 0, 1, 1], [], []>} : vector<4x16xbf16>, vector<16x128xbf16>, vector<4x128xf32> -> vector<4x128xf32>
    %cst_95 = arith.constant 0.000000e+00 : f32
    %114 = vector.broadcast %cst_95 : f32 to vector<4x128xf32>
    %115 = arith.maximumf %113, %114 : vector<4x128xf32>
    %116 = arith.truncf %115 : vector<4x128xf32> to vector<4x128xbf16>
    %cst_96 = arith.constant dense<0.000000e+00> : vector<16x128xf32>
    %117 = tpu.matmul %16, %116, %cst_96 {dimension_numbers = #tpu.dot_dimension_numbers<[1], [0], [0], [1], [0, 0, 1, 1], [], []>} : vector<16x4xbf16>, vector<4x128xbf16>, vector<16x128xf32> -> vector<16x128xf32>
    %cst_97 = arith.constant 0.000000e+00 : f32
    %118 = vector.broadcast %cst_97 : f32 to vector<16x128xf32>
    %119 = arith.subf %118, %117 : vector<16x128xf32>
    %120 = math.exp %119 : vector<16x128xf32>
    %cst_98 = arith.constant 1.000000e+00 : f32
    %121 = vector.broadcast %cst_98 : f32 to vector<16x128xf32>
    %122 = arith.addf %121, %120 : vector<16x128xf32>
    %123 = tpu.reciprocal %122 {approx = true} : vector<16x128xf32> -> vector<16x128xf32>
    %124 = vector.extract_strided_slice %123 {offsets = [0, 0], sizes = [16, 1], strides = [1, 1]} : vector<16x128xf32> to vector<16x1xf32>
    %125 = vector.broadcast %124 : vector<16x1xf32> to vector<16x256xf32>
    %126 = arith.mulf %105, %125 : vector<16x256xf32>
    %127 = arith.addf %126, %8 : vector<16x256xf32>
    %c1_99 = arith.constant 1 : index
    %c0_100 = arith.constant 0 : index
    %c0_101 = arith.constant 0 : index
    %128 = vector.load %arg4[%c1_99, %c0_100, %c0_101] : memref<2x16x144xbf16, #tpu.memory_space<vmem>>, vector<1x16x144xbf16>
    %129 = vector.shape_cast %128 : vector<1x16x144xbf16> to vector<16x144xbf16>
    %c1_102 = arith.constant 1 : index
    %c0_103 = arith.constant 0 : index
    %c0_104 = arith.constant 0 : index
    %130 = vector.load %arg5[%c1_102, %c0_103, %c0_104] : memref<2x16x144xbf16, #tpu.memory_space<vmem>>, vector<1x16x144xbf16>
    %131 = vector.shape_cast %130 : vector<1x16x144xbf16> to vector<16x144xbf16>
    %c1_105 = arith.constant 1 : index
    %c0_106 = arith.constant 0 : index
    %c0_107 = arith.constant 0 : index
    %132 = vector.load %arg6[%c1_105, %c0_106, %c0_107] : memref<2x4x16xbf16, #tpu.memory_space<vmem>>, vector<1x4x16xbf16>
    %133 = vector.shape_cast %132 : vector<1x4x16xbf16> to vector<4x16xbf16>
    %c1_108 = arith.constant 1 : index
    %c0_109 = arith.constant 0 : index
    %c0_110 = arith.constant 0 : index
    %134 = vector.load %arg7[%c1_108, %c0_109, %c0_110] : memref<2x16x4xbf16, #tpu.memory_space<vmem>>, vector<1x16x4xbf16>
    %135 = vector.shape_cast %134 : vector<1x16x4xbf16> to vector<16x4xbf16>
    %c0_111 = arith.constant 0 : index
    %c128_112 = arith.constant 128 : index
    %136 = vector.load %arg18[%c0_111, %c128_112] : memref<16x512xf32, #tpu.memory_space<vmem>>, vector<16x256xf32>
    tpu.vector_store %arg18[%c0_111, %c128_112], %127 {strides = array<i32>} : memref<16x512xf32, #tpu.memory_space<vmem>>, vector<16x256xf32>,
    %c0_113 = arith.constant 0 : index
    %c111_114 = arith.constant 111 : index
    %137 = vector.load %arg18[%c0_113, %c111_114] : memref<16x512xf32, #tpu.memory_space<vmem>>, vector<16x256xf32>
    %138 = vector.broadcast %3 : vector<1x256xf32> to vector<16x256xf32>
    %139 = arith.mulf %137, %138 : vector<16x256xf32>
    %140 = arith.truncf %139 : vector<16x256xf32> to vector<16x256xbf16>
    %c0_115 = arith.constant 0 : index
    %c0_116 = arith.constant 0 : index
    %141 = vector.load %arg19[%c0_115, %c0_116] : memref<144x256xbf16, #tpu.memory_space<vmem>>, vector<16x256xbf16>
    tpu.vector_store %arg19[%c0_115, %c0_116], %140 {strides = array<i32>} : memref<144x256xbf16, #tpu.memory_space<vmem>>, vector<16x256xbf16>,
    %c0_117 = arith.constant 0 : index
    %c112_118 = arith.constant 112 : index
    %142 = vector.load %arg18[%c0_117, %c112_118] : memref<16x512xf32, #tpu.memory_space<vmem>>, vector<16x256xf32>
    %143 = arith.truncf %142 : vector<16x256xf32> to vector<16x256xbf16>
    %c16_119 = arith.constant 16 : index
    %c0_120 = arith.constant 0 : index
    %144 = vector.load %arg19[%c16_119, %c0_120] : memref<144x256xbf16, #tpu.memory_space<vmem>>, vector<16x256xbf16>
    tpu.vector_store %arg19[%c16_119, %c0_120], %143 {strides = array<i32>} : memref<144x256xbf16, #tpu.memory_space<vmem>>, vector<16x256xbf16>,
    %c0_121 = arith.constant 0 : index
    %c113_122 = arith.constant 113 : index
    %145 = vector.load %arg18[%c0_121, %c113_122] : memref<16x512xf32, #tpu.memory_space<vmem>>, vector<16x256xf32>
    %146 = vector.broadcast %4 : vector<1x256xf32> to vector<16x256xf32>
    %147 = arith.mulf %145, %146 : vector<16x256xf32>
    %148 = arith.truncf %147 : vector<16x256xf32> to vector<16x256xbf16>
    %c32_123 = arith.constant 32 : index
    %c0_124 = arith.constant 0 : index
    %149 = vector.load %arg19[%c32_123, %c0_124] : memref<144x256xbf16, #tpu.memory_space<vmem>>, vector<16x256xbf16>
    tpu.vector_store %arg19[%c32_123, %c0_124], %148 {strides = array<i32>} : memref<144x256xbf16, #tpu.memory_space<vmem>>, vector<16x256xbf16>,
    %c0_125 = arith.constant 0 : index
    %c127_126 = arith.constant 127 : index
    %150 = vector.load %arg18[%c0_125, %c127_126] : memref<16x512xf32, #tpu.memory_space<vmem>>, vector<16x256xf32>
    %151 = vector.broadcast %3 : vector<1x256xf32> to vector<16x256xf32>
    %152 = arith.mulf %150, %151 : vector<16x256xf32>
    %153 = arith.truncf %152 : vector<16x256xf32> to vector<16x256xbf16>
    %c48_127 = arith.constant 48 : index
    %c0_128 = arith.constant 0 : index
    %154 = vector.load %arg19[%c48_127, %c0_128] : memref<144x256xbf16, #tpu.memory_space<vmem>>, vector<16x256xbf16>
    tpu.vector_store %arg19[%c48_127, %c0_128], %153 {strides = array<i32>} : memref<144x256xbf16, #tpu.memory_space<vmem>>, vector<16x256xbf16>,
    %c0_129 = arith.constant 0 : index
    %c128_130 = arith.constant 128 : index
    %155 = vector.load %arg18[%c0_129, %c128_130] : memref<16x512xf32, #tpu.memory_space<vmem>>, vector<16x256xf32>
    %156 = arith.truncf %155 : vector<16x256xf32> to vector<16x256xbf16>
    %c64_131 = arith.constant 64 : index
    %c0_132 = arith.constant 0 : index
    %157 = vector.load %arg19[%c64_131, %c0_132] : memref<144x256xbf16, #tpu.memory_space<vmem>>, vector<16x256xbf16>
    tpu.vector_store %arg19[%c64_131, %c0_132], %156 {strides = array<i32>} : memref<144x256xbf16, #tpu.memory_space<vmem>>, vector<16x256xbf16>,
    %c0_133 = arith.constant 0 : index
    %c129_134 = arith.constant 129 : index
    %158 = vector.load %arg18[%c0_133, %c129_134] : memref<16x512xf32, #tpu.memory_space<vmem>>, vector<16x256xf32>
    %159 = vector.broadcast %4 : vector<1x256xf32> to vector<16x256xf32>
    %160 = arith.mulf %158, %159 : vector<16x256xf32>
    %161 = arith.truncf %160 : vector<16x256xf32> to vector<16x256xbf16>
    %c80_135 = arith.constant 80 : index
    %c0_136 = arith.constant 0 : index
    %162 = vector.load %arg19[%c80_135, %c0_136] : memref<144x256xbf16, #tpu.memory_space<vmem>>, vector<16x256xbf16>
    tpu.vector_store %arg19[%c80_135, %c0_136], %161 {strides = array<i32>} : memref<144x256xbf16, #tpu.memory_space<vmem>>, vector<16x256xbf16>,
    %c0_137 = arith.constant 0 : index
    %c143_138 = arith.constant 143 : index
    %163 = vector.load %arg18[%c0_137, %c143_138] : memref<16x512xf32, #tpu.memory_space<vmem>>, vector<16x256xf32>
    %164 = vector.broadcast %3 : vector<1x256xf32> to vector<16x256xf32>
    %165 = arith.mulf %163, %164 : vector<16x256xf32>
    %166 = arith.truncf %165 : vector<16x256xf32> to vector<16x256xbf16>
    %c96_139 = arith.constant 96 : index
    %c0_140 = arith.constant 0 : index
    %167 = vector.load %arg19[%c96_139, %c0_140] : memref<144x256xbf16, #tpu.memory_space<vmem>>, vector<16x256xbf16>
    tpu.vector_store %arg19[%c96_139, %c0_140], %166 {strides = array<i32>} : memref<144x256xbf16, #tpu.memory_space<vmem>>, vector<16x256xbf16>,
    %c0_141 = arith.constant 0 : index
    %c144_142 = arith.constant 144 : index
    %168 = vector.load %arg18[%c0_141, %c144_142] : memref<16x512xf32, #tpu.memory_space<vmem>>, vector<16x256xf32>
    %169 = arith.truncf %168 : vector<16x256xf32> to vector<16x256xbf16>
    %c112_143 = arith.constant 112 : index
    %c0_144 = arith.constant 0 : index
    %170 = vector.load %arg19[%c112_143, %c0_144] : memref<144x256xbf16, #tpu.memory_space<vmem>>, vector<16x256xbf16>
    tpu.vector_store %arg19[%c112_143, %c0_144], %169 {strides = array<i32>} : memref<144x256xbf16, #tpu.memory_space<vmem>>, vector<16x256xbf16>,
    %c0_145 = arith.constant 0 : index
    %c145_146 = arith.constant 145 : index
    %171 = vector.load %arg18[%c0_145, %c145_146] : memref<16x512xf32, #tpu.memory_space<vmem>>, vector<16x256xf32>
    %172 = vector.broadcast %4 : vector<1x256xf32> to vector<16x256xf32>
    %173 = arith.mulf %171, %172 : vector<16x256xf32>
    %174 = arith.truncf %173 : vector<16x256xf32> to vector<16x256xbf16>
    %c128_147 = arith.constant 128 : index
    %c0_148 = arith.constant 0 : index
    %175 = vector.load %arg19[%c128_147, %c0_148] : memref<144x256xbf16, #tpu.memory_space<vmem>>, vector<16x256xbf16>
    tpu.vector_store %arg19[%c128_147, %c0_148], %174 {strides = array<i32>} : memref<144x256xbf16, #tpu.memory_space<vmem>>, vector<16x256xbf16>,
    %c0_149 = arith.constant 0 : index
    %c0_150 = arith.constant 0 : index
    %176 = vector.load %arg19[%c0_149, %c0_150] : memref<144x256xbf16, #tpu.memory_space<vmem>>, vector<144x256xbf16>
    %cst_151 = arith.constant dense<0.000000e+00> : vector<16x256xf32>
    %177 = tpu.matmul %129, %176, %cst_151 {dimension_numbers = #tpu.dot_dimension_numbers<[1], [0], [0], [1], [0, 0, 1, 1], [], []>} : vector<16x144xbf16>, vector<144x256xbf16>, vector<16x256xf32> -> vector<16x256xf32>
    %cst_152 = arith.constant 0.000000e+00 : f32
    %178 = vector.broadcast %cst_152 : f32 to vector<16x256xf32>
    %179 = arith.cmpf oge, %177, %178 : vector<16x256xf32>
    %cst_153 = arith.constant 2.500000e-01 : f32
    %180 = vector.broadcast %cst_153 : f32 to vector<16x256xf32>
    %181 = arith.mulf %180, %177 : vector<16x256xf32>
    %182 = arith.select %179, %177, %181 : vector<16x256xi1>, vector<16x256xf32>
    %c0_154 = arith.constant 0 : index
    %c128_155 = arith.constant 128 : index
    %183 = vector.load %arg18[%c0_154, %c128_155] : memref<16x512xf32, #tpu.memory_space<vmem>>, vector<16x256xf32>
    tpu.vector_store %arg18[%c0_154, %c128_155], %182 {strides = array<i32>} : memref<16x512xf32, #tpu.memory_space<vmem>>, vector<16x256xf32>,
    %c0_156 = arith.constant 0 : index
    %c111_157 = arith.constant 111 : index
    %184 = vector.load %arg18[%c0_156, %c111_157] : memref<16x512xf32, #tpu.memory_space<vmem>>, vector<16x256xf32>
    %185 = vector.broadcast %3 : vector<1x256xf32> to vector<16x256xf32>
    %186 = arith.mulf %184, %185 : vector<16x256xf32>
    %187 = arith.truncf %186 : vector<16x256xf32> to vector<16x256xbf16>
    %c0_158 = arith.constant 0 : index
    %c0_159 = arith.constant 0 : index
    %188 = vector.load %arg19[%c0_158, %c0_159] : memref<144x256xbf16, #tpu.memory_space<vmem>>, vector<16x256xbf16>
    tpu.vector_store %arg19[%c0_158, %c0_159], %187 {strides = array<i32>} : memref<144x256xbf16, #tpu.memory_space<vmem>>, vector<16x256xbf16>,
    %c0_160 = arith.constant 0 : index
    %c112_161 = arith.constant 112 : index
    %189 = vector.load %arg18[%c0_160, %c112_161] : memref<16x512xf32, #tpu.memory_space<vmem>>, vector<16x256xf32>
    %190 = arith.truncf %189 : vector<16x256xf32> to vector<16x256xbf16>
    %c16_162 = arith.constant 16 : index
    %c0_163 = arith.constant 0 : index
    %191 = vector.load %arg19[%c16_162, %c0_163] : memref<144x256xbf16, #tpu.memory_space<vmem>>, vector<16x256xbf16>
    tpu.vector_store %arg19[%c16_162, %c0_163], %190 {strides = array<i32>} : memref<144x256xbf16, #tpu.memory_space<vmem>>, vector<16x256xbf16>,
    %c0_164 = arith.constant 0 : index
    %c113_165 = arith.constant 113 : index
    %192 = vector.load %arg18[%c0_164, %c113_165] : memref<16x512xf32, #tpu.memory_space<vmem>>, vector<16x256xf32>
    %193 = vector.broadcast %4 : vector<1x256xf32> to vector<16x256xf32>
    %194 = arith.mulf %192, %193 : vector<16x256xf32>
    %195 = arith.truncf %194 : vector<16x256xf32> to vector<16x256xbf16>
    %c32_166 = arith.constant 32 : index
    %c0_167 = arith.constant 0 : index
    %196 = vector.load %arg19[%c32_166, %c0_167] : memref<144x256xbf16, #tpu.memory_space<vmem>>, vector<16x256xbf16>
    tpu.vector_store %arg19[%c32_166, %c0_167], %195 {strides = array<i32>} : memref<144x256xbf16, #tpu.memory_space<vmem>>, vector<16x256xbf16>,
    %c0_168 = arith.constant 0 : index
    %c127_169 = arith.constant 127 : index
    %197 = vector.load %arg18[%c0_168, %c127_169] : memref<16x512xf32, #tpu.memory_space<vmem>>, vector<16x256xf32>
    %198 = vector.broadcast %3 : vector<1x256xf32> to vector<16x256xf32>
    %199 = arith.mulf %197, %198 : vector<16x256xf32>
    %200 = arith.truncf %199 : vector<16x256xf32> to vector<16x256xbf16>
    %c48_170 = arith.constant 48 : index
    %c0_171 = arith.constant 0 : index
    %201 = vector.load %arg19[%c48_170, %c0_171] : memref<144x256xbf16, #tpu.memory_space<vmem>>, vector<16x256xbf16>
    tpu.vector_store %arg19[%c48_170, %c0_171], %200 {strides = array<i32>} : memref<144x256xbf16, #tpu.memory_space<vmem>>, vector<16x256xbf16>,
    %c0_172 = arith.constant 0 : index
    %c128_173 = arith.constant 128 : index
    %202 = vector.load %arg18[%c0_172, %c128_173] : memref<16x512xf32, #tpu.memory_space<vmem>>, vector<16x256xf32>
    %203 = arith.truncf %202 : vector<16x256xf32> to vector<16x256xbf16>
    %c64_174 = arith.constant 64 : index
    %c0_175 = arith.constant 0 : index
    %204 = vector.load %arg19[%c64_174, %c0_175] : memref<144x256xbf16, #tpu.memory_space<vmem>>, vector<16x256xbf16>
    tpu.vector_store %arg19[%c64_174, %c0_175], %203 {strides = array<i32>} : memref<144x256xbf16, #tpu.memory_space<vmem>>, vector<16x256xbf16>,
    %c0_176 = arith.constant 0 : index
    %c129_177 = arith.constant 129 : index
    %205 = vector.load %arg18[%c0_176, %c129_177] : memref<16x512xf32, #tpu.memory_space<vmem>>, vector<16x256xf32>
    %206 = vector.broadcast %4 : vector<1x256xf32> to vector<16x256xf32>
    %207 = arith.mulf %205, %206 : vector<16x256xf32>
    %208 = arith.truncf %207 : vector<16x256xf32> to vector<16x256xbf16>
    %c80_178 = arith.constant 80 : index
    %c0_179 = arith.constant 0 : index
    %209 = vector.load %arg19[%c80_178, %c0_179] : memref<144x256xbf16, #tpu.memory_space<vmem>>, vector<16x256xbf16>
    tpu.vector_store %arg19[%c80_178, %c0_179], %208 {strides = array<i32>} : memref<144x256xbf16, #tpu.memory_space<vmem>>, vector<16x256xbf16>,
    %c0_180 = arith.constant 0 : index
    %c143_181 = arith.constant 143 : index
    %210 = vector.load %arg18[%c0_180, %c143_181] : memref<16x512xf32, #tpu.memory_space<vmem>>, vector<16x256xf32>
    %211 = vector.broadcast %3 : vector<1x256xf32> to vector<16x256xf32>
    %212 = arith.mulf %210, %211 : vector<16x256xf32>
    %213 = arith.truncf %212 : vector<16x256xf32> to vector<16x256xbf16>
    %c96_182 = arith.constant 96 : index
    %c0_183 = arith.constant 0 : index
    %214 = vector.load %arg19[%c96_182, %c0_183] : memref<144x256xbf16, #tpu.memory_space<vmem>>, vector<16x256xbf16>
    tpu.vector_store %arg19[%c96_182, %c0_183], %213 {strides = array<i32>} : memref<144x256xbf16, #tpu.memory_space<vmem>>, vector<16x256xbf16>,
    %c0_184 = arith.constant 0 : index
    %c144_185 = arith.constant 144 : index
    %215 = vector.load %arg18[%c0_184, %c144_185] : memref<16x512xf32, #tpu.memory_space<vmem>>, vector<16x256xf32>
    %216 = arith.truncf %215 : vector<16x256xf32> to vector<16x256xbf16>
    %c112_186 = arith.constant 112 : index
    %c0_187 = arith.constant 0 : index
    %217 = vector.load %arg19[%c112_186, %c0_187] : memref<144x256xbf16, #tpu.memory_space<vmem>>, vector<16x256xbf16>
    tpu.vector_store %arg19[%c112_186, %c0_187], %216 {strides = array<i32>} : memref<144x256xbf16, #tpu.memory_space<vmem>>, vector<16x256xbf16>,
    %c0_188 = arith.constant 0 : index
    %c145_189 = arith.constant 145 : index
    %218 = vector.load %arg18[%c0_188, %c145_189] : memref<16x512xf32, #tpu.memory_space<vmem>>, vector<16x256xf32>
    %219 = vector.broadcast %4 : vector<1x256xf32> to vector<16x256xf32>
    %220 = arith.mulf %218, %219 : vector<16x256xf32>
    %221 = arith.truncf %220 : vector<16x256xf32> to vector<16x256xbf16>
    %c128_190 = arith.constant 128 : index
    %c0_191 = arith.constant 0 : index
    %222 = vector.load %arg19[%c128_190, %c0_191] : memref<144x256xbf16, #tpu.memory_space<vmem>>, vector<16x256xbf16>
    tpu.vector_store %arg19[%c128_190, %c0_191], %221 {strides = array<i32>} : memref<144x256xbf16, #tpu.memory_space<vmem>>, vector<16x256xbf16>,
    %c0_192 = arith.constant 0 : index
    %c0_193 = arith.constant 0 : index
    %223 = vector.load %arg19[%c0_192, %c0_193] : memref<144x256xbf16, #tpu.memory_space<vmem>>, vector<144x256xbf16>
    %cst_194 = arith.constant dense<0.000000e+00> : vector<16x256xf32>
    %224 = tpu.matmul %131, %223, %cst_194 {dimension_numbers = #tpu.dot_dimension_numbers<[1], [0], [0], [1], [0, 0, 1, 1], [], []>} : vector<16x144xbf16>, vector<144x256xbf16>, vector<16x256xf32> -> vector<16x256xf32>
    %cst_195 = arith.constant dense<0.000000e+00> : vector<16xf32>
    %225 = vector.multi_reduction <add>, %224, %cst_195 [1] : vector<16x256xf32> to vector<16xf32>
    %226 = vector.shape_cast %225 : vector<16xf32> to vector<16x1xf32>
    %cst_196 = arith.constant 3.906250e-03 : f32
    %227 = vector.broadcast %cst_196 : f32 to vector<16x1xf32>
    %228 = arith.mulf %226, %227 : vector<16x1xf32>
    %229 = vector.shape_cast %228 : vector<16x1xf32> to vector<16x1xf32>
    %230 = vector.broadcast %229 : vector<16x1xf32> to vector<16x128xf32>
    %231 = arith.truncf %230 : vector<16x128xf32> to vector<16x128xbf16>
    %cst_197 = arith.constant dense<0.000000e+00> : vector<4x128xf32>
    %232 = tpu.matmul %133, %231, %cst_197 {dimension_numbers = #tpu.dot_dimension_numbers<[1], [0], [0], [1], [0, 0, 1, 1], [], []>} : vector<4x16xbf16>, vector<16x128xbf16>, vector<4x128xf32> -> vector<4x128xf32>
    %cst_198 = arith.constant 0.000000e+00 : f32
    %233 = vector.broadcast %cst_198 : f32 to vector<4x128xf32>
    %234 = arith.maximumf %232, %233 : vector<4x128xf32>
    %235 = arith.truncf %234 : vector<4x128xf32> to vector<4x128xbf16>
    %cst_199 = arith.constant dense<0.000000e+00> : vector<16x128xf32>
    %236 = tpu.matmul %135, %235, %cst_199 {dimension_numbers = #tpu.dot_dimension_numbers<[1], [0], [0], [1], [0, 0, 1, 1], [], []>} : vector<16x4xbf16>, vector<4x128xbf16>, vector<16x128xf32> -> vector<16x128xf32>
    %cst_200 = arith.constant 0.000000e+00 : f32
    %237 = vector.broadcast %cst_200 : f32 to vector<16x128xf32>
    %238 = arith.subf %237, %236 : vector<16x128xf32>
    %239 = math.exp %238 : vector<16x128xf32>
    %cst_201 = arith.constant 1.000000e+00 : f32
    %240 = vector.broadcast %cst_201 : f32 to vector<16x128xf32>
    %241 = arith.addf %240, %239 : vector<16x128xf32>
    %242 = tpu.reciprocal %241 {approx = true} : vector<16x128xf32> -> vector<16x128xf32>
    %243 = vector.extract_strided_slice %242 {offsets = [0, 0], sizes = [16, 1], strides = [1, 1]} : vector<16x128xf32> to vector<16x1xf32>
    %244 = vector.broadcast %243 : vector<16x1xf32> to vector<16x256xf32>
    %245 = arith.mulf %224, %244 : vector<16x256xf32>
    %246 = arith.addf %245, %127 : vector<16x256xf32>
    %c0_202 = arith.constant 0 : index
    %c0_203 = arith.constant 0 : index
    %247 = vector.load %arg8[%c0_202, %c0_203] : memref<16x16xbf16, #tpu.memory_space<vmem>>, vector<16x16xbf16>
    %248 = arith.truncf %246 : vector<16x256xf32> to vector<16x256xbf16>
    %cst_204 = arith.constant dense<0.000000e+00> : vector<16x256xf32>
    %249 = tpu.matmul %247, %248, %cst_204 {dimension_numbers = #tpu.dot_dimension_numbers<[1], [0], [0], [1], [0, 0, 1, 1], [], []>} : vector<16x16xbf16>, vector<16x256xbf16>, vector<16x256xf32> -> vector<16x256xf32>
    %c0_205 = arith.constant 0 : index
    %c0_206 = arith.constant 0 : index
    %250 = vector.load %arg9[%c0_205, %c0_206] : memref<64x16xbf16, #tpu.memory_space<vmem>>, vector<64x16xbf16>
    %251 = arith.extf %250 : vector<64x16xbf16> to vector<64x16xf32>
    %252 = arith.truncf %249 : vector<16x256xf32> to vector<16x256xbf16>
    %cst_207 = arith.constant dense<0.000000e+00> : vector<64x256xf32>
    %253 = tpu.matmul %250, %252, %cst_207 {dimension_numbers = #tpu.dot_dimension_numbers<[1], [0], [0], [1], [0, 0, 1, 1], [], []>} : vector<64x16xbf16>, vector<16x256xbf16>, vector<64x256xf32> -> vector<64x256xf32>
    %254 = arith.mulf %251, %251 : vector<64x16xf32>
    %cst_208 = arith.constant dense<0.000000e+00> : vector<64xf32>
    %255 = vector.multi_reduction <add>, %254, %cst_208 [1] : vector<64x16xf32> to vector<64xf32>
    %256 = vector.shape_cast %255 : vector<64xf32> to vector<64x1xf32>
    %cst_209 = arith.constant 2.000000e+00 : f32
    %257 = vector.broadcast %cst_209 : f32 to vector<64x256xf32>
    %258 = arith.mulf %257, %253 : vector<64x256xf32>
    %259 = vector.broadcast %256 : vector<64x1xf32> to vector<64x256xf32>
    %260 = arith.subf %259, %258 : vector<64x256xf32>
    %cst_210 = arith.constant dense<0x7F800000> : vector<256xf32>
    %261 = vector.multi_reduction <minimumf>, %260, %cst_210 [0] : vector<64x256xf32> to vector<256xf32>
    %262 = vector.shape_cast %261 : vector<256xf32> to vector<1x256xf32>
    %263 = tpu.iota {dimensions = array<i32: 0>} : vector<64x256xi32>
    %264 = arith.sitofp %263 : vector<64x256xi32> to vector<64x256xf32>
    %265 = vector.broadcast %262 : vector<1x256xf32> to vector<64x256xf32>
    %266 = arith.cmpf ole, %260, %265 : vector<64x256xf32>
    %cst_211 = arith.constant 6.400000e+01 : f32
    %267 = vector.broadcast %cst_211 : f32 to vector<64x256xf32>
    %268 = arith.select %266, %264, %267 : vector<64x256xi1>, vector<64x256xf32>
    %cst_212 = arith.constant dense<0x7F800000> : vector<256xf32>
    %269 = vector.multi_reduction <minimumf>, %268, %cst_212 [0] : vector<64x256xf32> to vector<256xf32>
    %270 = vector.shape_cast %269 : vector<256xf32> to vector<1x256xf32>
    %271 = vector.broadcast %270 : vector<1x256xf32> to vector<64x256xf32>
    %272 = arith.cmpf oeq, %264, %271 : vector<64x256xf32>
    %273 = arith.extui %272 : vector<64x256xi1> to vector<64x256xi32>
    %274 = arith.sitofp %273 : vector<64x256xi32> to vector<64x256xf32>
    %275 = arith.truncf %274 : vector<64x256xf32> to vector<64x256xbf16>
    %276 = arith.mulf %249, %249 : vector<16x256xf32>
    %cst_213 = arith.constant dense<0.000000e+00> : vector<256xf32>
    %277 = vector.multi_reduction <add>, %276, %cst_213 [0] : vector<16x256xf32> to vector<256xf32>
    %278 = vector.shape_cast %277 : vector<256xf32> to vector<1x256xf32>
    %279 = arith.addf %262, %278 : vector<1x256xf32>
    %cst_214 = arith.constant dense<0.000000e+00> : vector<1xf32>
    %280 = vector.multi_reduction <add>, %279, %cst_214 [1] : vector<1x256xf32> to vector<1xf32>
    %281 = vector.shape_cast %280 : vector<1xf32> to vector<1x1xf32>
    %282 = vector.shape_cast %281 : vector<1x1xf32> to vector<1x1xf32>
    %283 = vector.broadcast %282 : vector<1x1xf32> to vector<1x128xf32>
    %c0_215 = arith.constant 0 : index
    %c0_216 = arith.constant 0 : index
    %c0_217 = arith.constant 0 : index
    %284 = vector.load %arg17[%c0_215, %c0_216, %c0_217] : memref<1x1x128xf32, #tpu.memory_space<vmem>>, vector<1x1x128xf32>
    %285 = vector.shape_cast %284 : vector<1x1x128xf32> to vector<1x128xf32>
    %286 = vector.shape_cast %283 : vector<1x128xf32> to vector<1x1x128xf32>
    tpu.vector_store %arg17[%c0_215, %c0_216, %c0_217], %286 {strides = array<i32>} : memref<1x1x128xf32, #tpu.memory_space<vmem>>, vector<1x1x128xf32>,
    %c0_218 = arith.constant 0 : index
    %c0_219 = arith.constant 0 : index
    %287 = vector.load %arg10[%c0_218, %c0_219] : memref<16x64xbf16, #tpu.memory_space<vmem>>, vector<16x64xbf16>
    %cst_220 = arith.constant dense<0.000000e+00> : vector<16x256xf32>
    %288 = tpu.matmul %287, %275, %cst_220 {dimension_numbers = #tpu.dot_dimension_numbers<[1], [0], [0], [1], [0, 0, 1, 1], [], []>} : vector<16x64xbf16>, vector<64x256xbf16>, vector<16x256xf32> -> vector<16x256xf32>
    %c0_221 = arith.constant 0 : index
    %c0_222 = arith.constant 0 : index
    %c0_223 = arith.constant 0 : index
    %289 = vector.load %arg11[%c0_221, %c0_222, %c0_223] : memref<2x16x144xbf16, #tpu.memory_space<vmem>>, vector<1x16x144xbf16>
    %290 = vector.shape_cast %289 : vector<1x16x144xbf16> to vector<16x144xbf16>
    %c0_224 = arith.constant 0 : index
    %c0_225 = arith.constant 0 : index
    %c0_226 = arith.constant 0 : index
    %291 = vector.load %arg12[%c0_224, %c0_225, %c0_226] : memref<2x16x144xbf16, #tpu.memory_space<vmem>>, vector<1x16x144xbf16>
    %292 = vector.shape_cast %291 : vector<1x16x144xbf16> to vector<16x144xbf16>
    %c0_227 = arith.constant 0 : index
    %c0_228 = arith.constant 0 : index
    %c0_229 = arith.constant 0 : index
    %293 = vector.load %arg13[%c0_227, %c0_228, %c0_229] : memref<2x4x16xbf16, #tpu.memory_space<vmem>>, vector<1x4x16xbf16>
    %294 = vector.shape_cast %293 : vector<1x4x16xbf16> to vector<4x16xbf16>
    %c0_230 = arith.constant 0 : index
    %c0_231 = arith.constant 0 : index
    %c0_232 = arith.constant 0 : index
    %295 = vector.load %arg14[%c0_230, %c0_231, %c0_232] : memref<2x16x4xbf16, #tpu.memory_space<vmem>>, vector<1x16x4xbf16>
    %296 = vector.shape_cast %295 : vector<1x16x4xbf16> to vector<16x4xbf16>
    %c0_233 = arith.constant 0 : index
    %c128_234 = arith.constant 128 : index
    %297 = vector.load %arg18[%c0_233, %c128_234] : memref<16x512xf32, #tpu.memory_space<vmem>>, vector<16x256xf32>
    tpu.vector_store %arg18[%c0_233, %c128_234], %288 {strides = array<i32>} : memref<16x512xf32, #tpu.memory_space<vmem>>, vector<16x256xf32>,
    %c0_235 = arith.constant 0 : index
    %c111_236 = arith.constant 111 : index
    %298 = vector.load %arg18[%c0_235, %c111_236] : memref<16x512xf32, #tpu.memory_space<vmem>>, vector<16x256xf32>
    %299 = vector.broadcast %3 : vector<1x256xf32> to vector<16x256xf32>
    %300 = arith.mulf %298, %299 : vector<16x256xf32>
    %301 = arith.truncf %300 : vector<16x256xf32> to vector<16x256xbf16>
    %c0_237 = arith.constant 0 : index
    %c0_238 = arith.constant 0 : index
    %302 = vector.load %arg19[%c0_237, %c0_238] : memref<144x256xbf16, #tpu.memory_space<vmem>>, vector<16x256xbf16>
    tpu.vector_store %arg19[%c0_237, %c0_238], %301 {strides = array<i32>} : memref<144x256xbf16, #tpu.memory_space<vmem>>, vector<16x256xbf16>,
    %c0_239 = arith.constant 0 : index
    %c112_240 = arith.constant 112 : index
    %303 = vector.load %arg18[%c0_239, %c112_240] : memref<16x512xf32, #tpu.memory_space<vmem>>, vector<16x256xf32>
    %304 = arith.truncf %303 : vector<16x256xf32> to vector<16x256xbf16>
    %c16_241 = arith.constant 16 : index
    %c0_242 = arith.constant 0 : index
    %305 = vector.load %arg19[%c16_241, %c0_242] : memref<144x256xbf16, #tpu.memory_space<vmem>>, vector<16x256xbf16>
    tpu.vector_store %arg19[%c16_241, %c0_242], %304 {strides = array<i32>} : memref<144x256xbf16, #tpu.memory_space<vmem>>, vector<16x256xbf16>,
    %c0_243 = arith.constant 0 : index
    %c113_244 = arith.constant 113 : index
    %306 = vector.load %arg18[%c0_243, %c113_244] : memref<16x512xf32, #tpu.memory_space<vmem>>, vector<16x256xf32>
    %307 = vector.broadcast %4 : vector<1x256xf32> to vector<16x256xf32>
    %308 = arith.mulf %306, %307 : vector<16x256xf32>
    %309 = arith.truncf %308 : vector<16x256xf32> to vector<16x256xbf16>
    %c32_245 = arith.constant 32 : index
    %c0_246 = arith.constant 0 : index
    %310 = vector.load %arg19[%c32_245, %c0_246] : memref<144x256xbf16, #tpu.memory_space<vmem>>, vector<16x256xbf16>
    tpu.vector_store %arg19[%c32_245, %c0_246], %309 {strides = array<i32>} : memref<144x256xbf16, #tpu.memory_space<vmem>>, vector<16x256xbf16>,
    %c0_247 = arith.constant 0 : index
    %c127_248 = arith.constant 127 : index
    %311 = vector.load %arg18[%c0_247, %c127_248] : memref<16x512xf32, #tpu.memory_space<vmem>>, vector<16x256xf32>
    %312 = vector.broadcast %3 : vector<1x256xf32> to vector<16x256xf32>
    %313 = arith.mulf %311, %312 : vector<16x256xf32>
    %314 = arith.truncf %313 : vector<16x256xf32> to vector<16x256xbf16>
    %c48_249 = arith.constant 48 : index
    %c0_250 = arith.constant 0 : index
    %315 = vector.load %arg19[%c48_249, %c0_250] : memref<144x256xbf16, #tpu.memory_space<vmem>>, vector<16x256xbf16>
    tpu.vector_store %arg19[%c48_249, %c0_250], %314 {strides = array<i32>} : memref<144x256xbf16, #tpu.memory_space<vmem>>, vector<16x256xbf16>,
    %c0_251 = arith.constant 0 : index
    %c128_252 = arith.constant 128 : index
    %316 = vector.load %arg18[%c0_251, %c128_252] : memref<16x512xf32, #tpu.memory_space<vmem>>, vector<16x256xf32>
    %317 = arith.truncf %316 : vector<16x256xf32> to vector<16x256xbf16>
    %c64_253 = arith.constant 64 : index
    %c0_254 = arith.constant 0 : index
    %318 = vector.load %arg19[%c64_253, %c0_254] : memref<144x256xbf16, #tpu.memory_space<vmem>>, vector<16x256xbf16>
    tpu.vector_store %arg19[%c64_253, %c0_254], %317 {strides = array<i32>} : memref<144x256xbf16, #tpu.memory_space<vmem>>, vector<16x256xbf16>,
    %c0_255 = arith.constant 0 : index
    %c129_256 = arith.constant 129 : index
    %319 = vector.load %arg18[%c0_255, %c129_256] : memref<16x512xf32, #tpu.memory_space<vmem>>, vector<16x256xf32>
    %320 = vector.broadcast %4 : vector<1x256xf32> to vector<16x256xf32>
    %321 = arith.mulf %319, %320 : vector<16x256xf32>
    %322 = arith.truncf %321 : vector<16x256xf32> to vector<16x256xbf16>
    %c80_257 = arith.constant 80 : index
    %c0_258 = arith.constant 0 : index
    %323 = vector.load %arg19[%c80_257, %c0_258] : memref<144x256xbf16, #tpu.memory_space<vmem>>, vector<16x256xbf16>
    tpu.vector_store %arg19[%c80_257, %c0_258], %322 {strides = array<i32>} : memref<144x256xbf16, #tpu.memory_space<vmem>>, vector<16x256xbf16>,
    %c0_259 = arith.constant 0 : index
    %c143_260 = arith.constant 143 : index
    %324 = vector.load %arg18[%c0_259, %c143_260] : memref<16x512xf32, #tpu.memory_space<vmem>>, vector<16x256xf32>
    %325 = vector.broadcast %3 : vector<1x256xf32> to vector<16x256xf32>
    %326 = arith.mulf %324, %325 : vector<16x256xf32>
    %327 = arith.truncf %326 : vector<16x256xf32> to vector<16x256xbf16>
    %c96_261 = arith.constant 96 : index
    %c0_262 = arith.constant 0 : index
    %328 = vector.load %arg19[%c96_261, %c0_262] : memref<144x256xbf16, #tpu.memory_space<vmem>>, vector<16x256xbf16>
    tpu.vector_store %arg19[%c96_261, %c0_262], %327 {strides = array<i32>} : memref<144x256xbf16, #tpu.memory_space<vmem>>, vector<16x256xbf16>,
    %c0_263 = arith.constant 0 : index
    %c144_264 = arith.constant 144 : index
    %329 = vector.load %arg18[%c0_263, %c144_264] : memref<16x512xf32, #tpu.memory_space<vmem>>, vector<16x256xf32>
    %330 = arith.truncf %329 : vector<16x256xf32> to vector<16x256xbf16>
    %c112_265 = arith.constant 112 : index
    %c0_266 = arith.constant 0 : index
    %331 = vector.load %arg19[%c112_265, %c0_266] : memref<144x256xbf16, #tpu.memory_space<vmem>>, vector<16x256xbf16>
    tpu.vector_store %arg19[%c112_265, %c0_266], %330 {strides = array<i32>} : memref<144x256xbf16, #tpu.memory_space<vmem>>, vector<16x256xbf16>,
    %c0_267 = arith.constant 0 : index
    %c145_268 = arith.constant 145 : index
    %332 = vector.load %arg18[%c0_267, %c145_268] : memref<16x512xf32, #tpu.memory_space<vmem>>, vector<16x256xf32>
    %333 = vector.broadcast %4 : vector<1x256xf32> to vector<16x256xf32>
    %334 = arith.mulf %332, %333 : vector<16x256xf32>
    %335 = arith.truncf %334 : vector<16x256xf32> to vector<16x256xbf16>
    %c128_269 = arith.constant 128 : index
    %c0_270 = arith.constant 0 : index
    %336 = vector.load %arg19[%c128_269, %c0_270] : memref<144x256xbf16, #tpu.memory_space<vmem>>, vector<16x256xbf16>
    tpu.vector_store %arg19[%c128_269, %c0_270], %335 {strides = array<i32>} : memref<144x256xbf16, #tpu.memory_space<vmem>>, vector<16x256xbf16>,
    %c0_271 = arith.constant 0 : index
    %c0_272 = arith.constant 0 : index
    %337 = vector.load %arg19[%c0_271, %c0_272] : memref<144x256xbf16, #tpu.memory_space<vmem>>, vector<144x256xbf16>
    %cst_273 = arith.constant dense<0.000000e+00> : vector<16x256xf32>
    %338 = tpu.matmul %290, %337, %cst_273 {dimension_numbers = #tpu.dot_dimension_numbers<[1], [0], [0], [1], [0, 0, 1, 1], [], []>} : vector<16x144xbf16>, vector<144x256xbf16>, vector<16x256xf32> -> vector<16x256xf32>
    %cst_274 = arith.constant 0.000000e+00 : f32
    %339 = vector.broadcast %cst_274 : f32 to vector<16x256xf32>
    %340 = arith.cmpf oge, %338, %339 : vector<16x256xf32>
    %cst_275 = arith.constant 2.500000e-01 : f32
    %341 = vector.broadcast %cst_275 : f32 to vector<16x256xf32>
    %342 = arith.mulf %341, %338 : vector<16x256xf32>
    %343 = arith.select %340, %338, %342 : vector<16x256xi1>, vector<16x256xf32>
    %c0_276 = arith.constant 0 : index
    %c128_277 = arith.constant 128 : index
    %344 = vector.load %arg18[%c0_276, %c128_277] : memref<16x512xf32, #tpu.memory_space<vmem>>, vector<16x256xf32>
    tpu.vector_store %arg18[%c0_276, %c128_277], %343 {strides = array<i32>} : memref<16x512xf32, #tpu.memory_space<vmem>>, vector<16x256xf32>,
    %c0_278 = arith.constant 0 : index
    %c111_279 = arith.constant 111 : index
    %345 = vector.load %arg18[%c0_278, %c111_279] : memref<16x512xf32, #tpu.memory_space<vmem>>, vector<16x256xf32>
    %346 = vector.broadcast %3 : vector<1x256xf32> to vector<16x256xf32>
    %347 = arith.mulf %345, %346 : vector<16x256xf32>
    %348 = arith.truncf %347 : vector<16x256xf32> to vector<16x256xbf16>
    %c0_280 = arith.constant 0 : index
    %c0_281 = arith.constant 0 : index
    %349 = vector.load %arg19[%c0_280, %c0_281] : memref<144x256xbf16, #tpu.memory_space<vmem>>, vector<16x256xbf16>
    tpu.vector_store %arg19[%c0_280, %c0_281], %348 {strides = array<i32>} : memref<144x256xbf16, #tpu.memory_space<vmem>>, vector<16x256xbf16>,
    %c0_282 = arith.constant 0 : index
    %c112_283 = arith.constant 112 : index
    %350 = vector.load %arg18[%c0_282, %c112_283] : memref<16x512xf32, #tpu.memory_space<vmem>>, vector<16x256xf32>
    %351 = arith.truncf %350 : vector<16x256xf32> to vector<16x256xbf16>
    %c16_284 = arith.constant 16 : index
    %c0_285 = arith.constant 0 : index
    %352 = vector.load %arg19[%c16_284, %c0_285] : memref<144x256xbf16, #tpu.memory_space<vmem>>, vector<16x256xbf16>
    tpu.vector_store %arg19[%c16_284, %c0_285], %351 {strides = array<i32>} : memref<144x256xbf16, #tpu.memory_space<vmem>>, vector<16x256xbf16>,
    %c0_286 = arith.constant 0 : index
    %c113_287 = arith.constant 113 : index
    %353 = vector.load %arg18[%c0_286, %c113_287] : memref<16x512xf32, #tpu.memory_space<vmem>>, vector<16x256xf32>
    %354 = vector.broadcast %4 : vector<1x256xf32> to vector<16x256xf32>
    %355 = arith.mulf %353, %354 : vector<16x256xf32>
    %356 = arith.truncf %355 : vector<16x256xf32> to vector<16x256xbf16>
    %c32_288 = arith.constant 32 : index
    %c0_289 = arith.constant 0 : index
    %357 = vector.load %arg19[%c32_288, %c0_289] : memref<144x256xbf16, #tpu.memory_space<vmem>>, vector<16x256xbf16>
    tpu.vector_store %arg19[%c32_288, %c0_289], %356 {strides = array<i32>} : memref<144x256xbf16, #tpu.memory_space<vmem>>, vector<16x256xbf16>,
    %c0_290 = arith.constant 0 : index
    %c127_291 = arith.constant 127 : index
    %358 = vector.load %arg18[%c0_290, %c127_291] : memref<16x512xf32, #tpu.memory_space<vmem>>, vector<16x256xf32>
    %359 = vector.broadcast %3 : vector<1x256xf32> to vector<16x256xf32>
    %360 = arith.mulf %358, %359 : vector<16x256xf32>
    %361 = arith.truncf %360 : vector<16x256xf32> to vector<16x256xbf16>
    %c48_292 = arith.constant 48 : index
    %c0_293 = arith.constant 0 : index
    %362 = vector.load %arg19[%c48_292, %c0_293] : memref<144x256xbf16, #tpu.memory_space<vmem>>, vector<16x256xbf16>
    tpu.vector_store %arg19[%c48_292, %c0_293], %361 {strides = array<i32>} : memref<144x256xbf16, #tpu.memory_space<vmem>>, vector<16x256xbf16>,
    %c0_294 = arith.constant 0 : index
    %c128_295 = arith.constant 128 : index
    %363 = vector.load %arg18[%c0_294, %c128_295] : memref<16x512xf32, #tpu.memory_space<vmem>>, vector<16x256xf32>
    %364 = arith.truncf %363 : vector<16x256xf32> to vector<16x256xbf16>
    %c64_296 = arith.constant 64 : index
    %c0_297 = arith.constant 0 : index
    %365 = vector.load %arg19[%c64_296, %c0_297] : memref<144x256xbf16, #tpu.memory_space<vmem>>, vector<16x256xbf16>
    tpu.vector_store %arg19[%c64_296, %c0_297], %364 {strides = array<i32>} : memref<144x256xbf16, #tpu.memory_space<vmem>>, vector<16x256xbf16>,
    %c0_298 = arith.constant 0 : index
    %c129_299 = arith.constant 129 : index
    %366 = vector.load %arg18[%c0_298, %c129_299] : memref<16x512xf32, #tpu.memory_space<vmem>>, vector<16x256xf32>
    %367 = vector.broadcast %4 : vector<1x256xf32> to vector<16x256xf32>
    %368 = arith.mulf %366, %367 : vector<16x256xf32>
    %369 = arith.truncf %368 : vector<16x256xf32> to vector<16x256xbf16>
    %c80_300 = arith.constant 80 : index
    %c0_301 = arith.constant 0 : index
    %370 = vector.load %arg19[%c80_300, %c0_301] : memref<144x256xbf16, #tpu.memory_space<vmem>>, vector<16x256xbf16>
    tpu.vector_store %arg19[%c80_300, %c0_301], %369 {strides = array<i32>} : memref<144x256xbf16, #tpu.memory_space<vmem>>, vector<16x256xbf16>,
    %c0_302 = arith.constant 0 : index
    %c143_303 = arith.constant 143 : index
    %371 = vector.load %arg18[%c0_302, %c143_303] : memref<16x512xf32, #tpu.memory_space<vmem>>, vector<16x256xf32>
    %372 = vector.broadcast %3 : vector<1x256xf32> to vector<16x256xf32>
    %373 = arith.mulf %371, %372 : vector<16x256xf32>
    %374 = arith.truncf %373 : vector<16x256xf32> to vector<16x256xbf16>
    %c96_304 = arith.constant 96 : index
    %c0_305 = arith.constant 0 : index
    %375 = vector.load %arg19[%c96_304, %c0_305] : memref<144x256xbf16, #tpu.memory_space<vmem>>, vector<16x256xbf16>
    tpu.vector_store %arg19[%c96_304, %c0_305], %374 {strides = array<i32>} : memref<144x256xbf16, #tpu.memory_space<vmem>>, vector<16x256xbf16>,
    %c0_306 = arith.constant 0 : index
    %c144_307 = arith.constant 144 : index
    %376 = vector.load %arg18[%c0_306, %c144_307] : memref<16x512xf32, #tpu.memory_space<vmem>>, vector<16x256xf32>
    %377 = arith.truncf %376 : vector<16x256xf32> to vector<16x256xbf16>
    %c112_308 = arith.constant 112 : index
    %c0_309 = arith.constant 0 : index
    %378 = vector.load %arg19[%c112_308, %c0_309] : memref<144x256xbf16, #tpu.memory_space<vmem>>, vector<16x256xbf16>
    tpu.vector_store %arg19[%c112_308, %c0_309], %377 {strides = array<i32>} : memref<144x256xbf16, #tpu.memory_space<vmem>>, vector<16x256xbf16>,
    %c0_310 = arith.constant 0 : index
    %c145_311 = arith.constant 145 : index
    %379 = vector.load %arg18[%c0_310, %c145_311] : memref<16x512xf32, #tpu.memory_space<vmem>>, vector<16x256xf32>
    %380 = vector.broadcast %4 : vector<1x256xf32> to vector<16x256xf32>
    %381 = arith.mulf %379, %380 : vector<16x256xf32>
    %382 = arith.truncf %381 : vector<16x256xf32> to vector<16x256xbf16>
    %c128_312 = arith.constant 128 : index
    %c0_313 = arith.constant 0 : index
    %383 = vector.load %arg19[%c128_312, %c0_313] : memref<144x256xbf16, #tpu.memory_space<vmem>>, vector<16x256xbf16>
    tpu.vector_store %arg19[%c128_312, %c0_313], %382 {strides = array<i32>} : memref<144x256xbf16, #tpu.memory_space<vmem>>, vector<16x256xbf16>,
    %c0_314 = arith.constant 0 : index
    %c0_315 = arith.constant 0 : index
    %384 = vector.load %arg19[%c0_314, %c0_315] : memref<144x256xbf16, #tpu.memory_space<vmem>>, vector<144x256xbf16>
    %cst_316 = arith.constant dense<0.000000e+00> : vector<16x256xf32>
    %385 = tpu.matmul %292, %384, %cst_316 {dimension_numbers = #tpu.dot_dimension_numbers<[1], [0], [0], [1], [0, 0, 1, 1], [], []>} : vector<16x144xbf16>, vector<144x256xbf16>, vector<16x256xf32> -> vector<16x256xf32>
    %cst_317 = arith.constant dense<0.000000e+00> : vector<16xf32>
    %386 = vector.multi_reduction <add>, %385, %cst_317 [1] : vector<16x256xf32> to vector<16xf32>
    %387 = vector.shape_cast %386 : vector<16xf32> to vector<16x1xf32>
    %cst_318 = arith.constant 3.906250e-03 : f32
    %388 = vector.broadcast %cst_318 : f32 to vector<16x1xf32>
    %389 = arith.mulf %387, %388 : vector<16x1xf32>
    %390 = vector.shape_cast %389 : vector<16x1xf32> to vector<16x1xf32>
    %391 = vector.broadcast %390 : vector<16x1xf32> to vector<16x128xf32>
    %392 = arith.truncf %391 : vector<16x128xf32> to vector<16x128xbf16>
    %cst_319 = arith.constant dense<0.000000e+00> : vector<4x128xf32>
    %393 = tpu.matmul %294, %392, %cst_319 {dimension_numbers = #tpu.dot_dimension_numbers<[1], [0], [0], [1], [0, 0, 1, 1], [], []>} : vector<4x16xbf16>, vector<16x128xbf16>, vector<4x128xf32> -> vector<4x128xf32>
    %cst_320 = arith.constant 0.000000e+00 : f32
    %394 = vector.broadcast %cst_320 : f32 to vector<4x128xf32>
    %395 = arith.maximumf %393, %394 : vector<4x128xf32>
    %396 = arith.truncf %395 : vector<4x128xf32> to vector<4x128xbf16>
    %cst_321 = arith.constant dense<0.000000e+00> : vector<16x128xf32>
    %397 = tpu.matmul %296, %396, %cst_321 {dimension_numbers = #tpu.dot_dimension_numbers<[1], [0], [0], [1], [0, 0, 1, 1], [], []>} : vector<16x4xbf16>, vector<4x128xbf16>, vector<16x128xf32> -> vector<16x128xf32>
    %cst_322 = arith.constant 0.000000e+00 : f32
    %398 = vector.broadcast %cst_322 : f32 to vector<16x128xf32>
    %399 = arith.subf %398, %397 : vector<16x128xf32>
    %400 = math.exp %399 : vector<16x128xf32>
    %cst_323 = arith.constant 1.000000e+00 : f32
    %401 = vector.broadcast %cst_323 : f32 to vector<16x128xf32>
    %402 = arith.addf %401, %400 : vector<16x128xf32>
    %403 = tpu.reciprocal %402 {approx = true} : vector<16x128xf32> -> vector<16x128xf32>
    %404 = vector.extract_strided_slice %403 {offsets = [0, 0], sizes = [16, 1], strides = [1, 1]} : vector<16x128xf32> to vector<16x1xf32>
    %405 = vector.broadcast %404 : vector<16x1xf32> to vector<16x256xf32>
    %406 = arith.mulf %385, %405 : vector<16x256xf32>
    %407 = arith.addf %406, %288 : vector<16x256xf32>
    %c1_324 = arith.constant 1 : index
    %c0_325 = arith.constant 0 : index
    %c0_326 = arith.constant 0 : index
    %408 = vector.load %arg11[%c1_324, %c0_325, %c0_326] : memref<2x16x144xbf16, #tpu.memory_space<vmem>>, vector<1x16x144xbf16>
    %409 = vector.shape_cast %408 : vector<1x16x144xbf16> to vector<16x144xbf16>
    %c1_327 = arith.constant 1 : index
    %c0_328 = arith.constant 0 : index
    %c0_329 = arith.constant 0 : index
    %410 = vector.load %arg12[%c1_327, %c0_328, %c0_329] : memref<2x16x144xbf16, #tpu.memory_space<vmem>>, vector<1x16x144xbf16>
    %411 = vector.shape_cast %410 : vector<1x16x144xbf16> to vector<16x144xbf16>
    %c1_330 = arith.constant 1 : index
    %c0_331 = arith.constant 0 : index
    %c0_332 = arith.constant 0 : index
    %412 = vector.load %arg13[%c1_330, %c0_331, %c0_332] : memref<2x4x16xbf16, #tpu.memory_space<vmem>>, vector<1x4x16xbf16>
    %413 = vector.shape_cast %412 : vector<1x4x16xbf16> to vector<4x16xbf16>
    %c1_333 = arith.constant 1 : index
    %c0_334 = arith.constant 0 : index
    %c0_335 = arith.constant 0 : index
    %414 = vector.load %arg14[%c1_333, %c0_334, %c0_335] : memref<2x16x4xbf16, #tpu.memory_space<vmem>>, vector<1x16x4xbf16>
    %415 = vector.shape_cast %414 : vector<1x16x4xbf16> to vector<16x4xbf16>
    %c0_336 = arith.constant 0 : index
    %c128_337 = arith.constant 128 : index
    %416 = vector.load %arg18[%c0_336, %c128_337] : memref<16x512xf32, #tpu.memory_space<vmem>>, vector<16x256xf32>
    tpu.vector_store %arg18[%c0_336, %c128_337], %407 {strides = array<i32>} : memref<16x512xf32, #tpu.memory_space<vmem>>, vector<16x256xf32>,
    %c0_338 = arith.constant 0 : index
    %c111_339 = arith.constant 111 : index
    %417 = vector.load %arg18[%c0_338, %c111_339] : memref<16x512xf32, #tpu.memory_space<vmem>>, vector<16x256xf32>
    %418 = vector.broadcast %3 : vector<1x256xf32> to vector<16x256xf32>
    %419 = arith.mulf %417, %418 : vector<16x256xf32>
    %420 = arith.truncf %419 : vector<16x256xf32> to vector<16x256xbf16>
    %c0_340 = arith.constant 0 : index
    %c0_341 = arith.constant 0 : index
    %421 = vector.load %arg19[%c0_340, %c0_341] : memref<144x256xbf16, #tpu.memory_space<vmem>>, vector<16x256xbf16>
    tpu.vector_store %arg19[%c0_340, %c0_341], %420 {strides = array<i32>} : memref<144x256xbf16, #tpu.memory_space<vmem>>, vector<16x256xbf16>,
    %c0_342 = arith.constant 0 : index
    %c112_343 = arith.constant 112 : index
    %422 = vector.load %arg18[%c0_342, %c112_343] : memref<16x512xf32, #tpu.memory_space<vmem>>, vector<16x256xf32>
    %423 = arith.truncf %422 : vector<16x256xf32> to vector<16x256xbf16>
    %c16_344 = arith.constant 16 : index
    %c0_345 = arith.constant 0 : index
    %424 = vector.load %arg19[%c16_344, %c0_345] : memref<144x256xbf16, #tpu.memory_space<vmem>>, vector<16x256xbf16>
    tpu.vector_store %arg19[%c16_344, %c0_345], %423 {strides = array<i32>} : memref<144x256xbf16, #tpu.memory_space<vmem>>, vector<16x256xbf16>,
    %c0_346 = arith.constant 0 : index
    %c113_347 = arith.constant 113 : index
    %425 = vector.load %arg18[%c0_346, %c113_347] : memref<16x512xf32, #tpu.memory_space<vmem>>, vector<16x256xf32>
    %426 = vector.broadcast %4 : vector<1x256xf32> to vector<16x256xf32>
    %427 = arith.mulf %425, %426 : vector<16x256xf32>
    %428 = arith.truncf %427 : vector<16x256xf32> to vector<16x256xbf16>
    %c32_348 = arith.constant 32 : index
    %c0_349 = arith.constant 0 : index
    %429 = vector.load %arg19[%c32_348, %c0_349] : memref<144x256xbf16, #tpu.memory_space<vmem>>, vector<16x256xbf16>
    tpu.vector_store %arg19[%c32_348, %c0_349], %428 {strides = array<i32>} : memref<144x256xbf16, #tpu.memory_space<vmem>>, vector<16x256xbf16>,
    %c0_350 = arith.constant 0 : index
    %c127_351 = arith.constant 127 : index
    %430 = vector.load %arg18[%c0_350, %c127_351] : memref<16x512xf32, #tpu.memory_space<vmem>>, vector<16x256xf32>
    %431 = vector.broadcast %3 : vector<1x256xf32> to vector<16x256xf32>
    %432 = arith.mulf %430, %431 : vector<16x256xf32>
    %433 = arith.truncf %432 : vector<16x256xf32> to vector<16x256xbf16>
    %c48_352 = arith.constant 48 : index
    %c0_353 = arith.constant 0 : index
    %434 = vector.load %arg19[%c48_352, %c0_353] : memref<144x256xbf16, #tpu.memory_space<vmem>>, vector<16x256xbf16>
    tpu.vector_store %arg19[%c48_352, %c0_353], %433 {strides = array<i32>} : memref<144x256xbf16, #tpu.memory_space<vmem>>, vector<16x256xbf16>,
    %c0_354 = arith.constant 0 : index
    %c128_355 = arith.constant 128 : index
    %435 = vector.load %arg18[%c0_354, %c128_355] : memref<16x512xf32, #tpu.memory_space<vmem>>, vector<16x256xf32>
    %436 = arith.truncf %435 : vector<16x256xf32> to vector<16x256xbf16>
    %c64_356 = arith.constant 64 : index
    %c0_357 = arith.constant 0 : index
    %437 = vector.load %arg19[%c64_356, %c0_357] : memref<144x256xbf16, #tpu.memory_space<vmem>>, vector<16x256xbf16>
    tpu.vector_store %arg19[%c64_356, %c0_357], %436 {strides = array<i32>} : memref<144x256xbf16, #tpu.memory_space<vmem>>, vector<16x256xbf16>,
    %c0_358 = arith.constant 0 : index
    %c129_359 = arith.constant 129 : index
    %438 = vector.load %arg18[%c0_358, %c129_359] : memref<16x512xf32, #tpu.memory_space<vmem>>, vector<16x256xf32>
    %439 = vector.broadcast %4 : vector<1x256xf32> to vector<16x256xf32>
    %440 = arith.mulf %438, %439 : vector<16x256xf32>
    %441 = arith.truncf %440 : vector<16x256xf32> to vector<16x256xbf16>
    %c80_360 = arith.constant 80 : index
    %c0_361 = arith.constant 0 : index
    %442 = vector.load %arg19[%c80_360, %c0_361] : memref<144x256xbf16, #tpu.memory_space<vmem>>, vector<16x256xbf16>
    tpu.vector_store %arg19[%c80_360, %c0_361], %441 {strides = array<i32>} : memref<144x256xbf16, #tpu.memory_space<vmem>>, vector<16x256xbf16>,
    %c0_362 = arith.constant 0 : index
    %c143_363 = arith.constant 143 : index
    %443 = vector.load %arg18[%c0_362, %c143_363] : memref<16x512xf32, #tpu.memory_space<vmem>>, vector<16x256xf32>
    %444 = vector.broadcast %3 : vector<1x256xf32> to vector<16x256xf32>
    %445 = arith.mulf %443, %444 : vector<16x256xf32>
    %446 = arith.truncf %445 : vector<16x256xf32> to vector<16x256xbf16>
    %c96_364 = arith.constant 96 : index
    %c0_365 = arith.constant 0 : index
    %447 = vector.load %arg19[%c96_364, %c0_365] : memref<144x256xbf16, #tpu.memory_space<vmem>>, vector<16x256xbf16>
    tpu.vector_store %arg19[%c96_364, %c0_365], %446 {strides = array<i32>} : memref<144x256xbf16, #tpu.memory_space<vmem>>, vector<16x256xbf16>,
    %c0_366 = arith.constant 0 : index
    %c144_367 = arith.constant 144 : index
    %448 = vector.load %arg18[%c0_366, %c144_367] : memref<16x512xf32, #tpu.memory_space<vmem>>, vector<16x256xf32>
    %449 = arith.truncf %448 : vector<16x256xf32> to vector<16x256xbf16>
    %c112_368 = arith.constant 112 : index
    %c0_369 = arith.constant 0 : index
    %450 = vector.load %arg19[%c112_368, %c0_369] : memref<144x256xbf16, #tpu.memory_space<vmem>>, vector<16x256xbf16>
    tpu.vector_store %arg19[%c112_368, %c0_369], %449 {strides = array<i32>} : memref<144x256xbf16, #tpu.memory_space<vmem>>, vector<16x256xbf16>,
    %c0_370 = arith.constant 0 : index
    %c145_371 = arith.constant 145 : index
    %451 = vector.load %arg18[%c0_370, %c145_371] : memref<16x512xf32, #tpu.memory_space<vmem>>, vector<16x256xf32>
    %452 = vector.broadcast %4 : vector<1x256xf32> to vector<16x256xf32>
    %453 = arith.mulf %451, %452 : vector<16x256xf32>
    %454 = arith.truncf %453 : vector<16x256xf32> to vector<16x256xbf16>
    %c128_372 = arith.constant 128 : index
    %c0_373 = arith.constant 0 : index
    %455 = vector.load %arg19[%c128_372, %c0_373] : memref<144x256xbf16, #tpu.memory_space<vmem>>, vector<16x256xbf16>
    tpu.vector_store %arg19[%c128_372, %c0_373], %454 {strides = array<i32>} : memref<144x256xbf16, #tpu.memory_space<vmem>>, vector<16x256xbf16>,
    %c0_374 = arith.constant 0 : index
    %c0_375 = arith.constant 0 : index
    %456 = vector.load %arg19[%c0_374, %c0_375] : memref<144x256xbf16, #tpu.memory_space<vmem>>, vector<144x256xbf16>
    %cst_376 = arith.constant dense<0.000000e+00> : vector<16x256xf32>
    %457 = tpu.matmul %409, %456, %cst_376 {dimension_numbers = #tpu.dot_dimension_numbers<[1], [0], [0], [1], [0, 0, 1, 1], [], []>} : vector<16x144xbf16>, vector<144x256xbf16>, vector<16x256xf32> -> vector<16x256xf32>
    %cst_377 = arith.constant 0.000000e+00 : f32
    %458 = vector.broadcast %cst_377 : f32 to vector<16x256xf32>
    %459 = arith.cmpf oge, %457, %458 : vector<16x256xf32>
    %cst_378 = arith.constant 2.500000e-01 : f32
    %460 = vector.broadcast %cst_378 : f32 to vector<16x256xf32>
    %461 = arith.mulf %460, %457 : vector<16x256xf32>
    %462 = arith.select %459, %457, %461 : vector<16x256xi1>, vector<16x256xf32>
    %c0_379 = arith.constant 0 : index
    %c128_380 = arith.constant 128 : index
    %463 = vector.load %arg18[%c0_379, %c128_380] : memref<16x512xf32, #tpu.memory_space<vmem>>, vector<16x256xf32>
    tpu.vector_store %arg18[%c0_379, %c128_380], %462 {strides = array<i32>} : memref<16x512xf32, #tpu.memory_space<vmem>>, vector<16x256xf32>,
    %c0_381 = arith.constant 0 : index
    %c111_382 = arith.constant 111 : index
    %464 = vector.load %arg18[%c0_381, %c111_382] : memref<16x512xf32, #tpu.memory_space<vmem>>, vector<16x256xf32>
    %465 = vector.broadcast %3 : vector<1x256xf32> to vector<16x256xf32>
    %466 = arith.mulf %464, %465 : vector<16x256xf32>
    %467 = arith.truncf %466 : vector<16x256xf32> to vector<16x256xbf16>
    %c0_383 = arith.constant 0 : index
    %c0_384 = arith.constant 0 : index
    %468 = vector.load %arg19[%c0_383, %c0_384] : memref<144x256xbf16, #tpu.memory_space<vmem>>, vector<16x256xbf16>
    tpu.vector_store %arg19[%c0_383, %c0_384], %467 {strides = array<i32>} : memref<144x256xbf16, #tpu.memory_space<vmem>>, vector<16x256xbf16>,
    %c0_385 = arith.constant 0 : index
    %c112_386 = arith.constant 112 : index
    %469 = vector.load %arg18[%c0_385, %c112_386] : memref<16x512xf32, #tpu.memory_space<vmem>>, vector<16x256xf32>
    %470 = arith.truncf %469 : vector<16x256xf32> to vector<16x256xbf16>
    %c16_387 = arith.constant 16 : index
    %c0_388 = arith.constant 0 : index
    %471 = vector.load %arg19[%c16_387, %c0_388] : memref<144x256xbf16, #tpu.memory_space<vmem>>, vector<16x256xbf16>
    tpu.vector_store %arg19[%c16_387, %c0_388], %470 {strides = array<i32>} : memref<144x256xbf16, #tpu.memory_space<vmem>>, vector<16x256xbf16>,
    %c0_389 = arith.constant 0 : index
    %c113_390 = arith.constant 113 : index
    %472 = vector.load %arg18[%c0_389, %c113_390] : memref<16x512xf32, #tpu.memory_space<vmem>>, vector<16x256xf32>
    %473 = vector.broadcast %4 : vector<1x256xf32> to vector<16x256xf32>
    %474 = arith.mulf %472, %473 : vector<16x256xf32>
    %475 = arith.truncf %474 : vector<16x256xf32> to vector<16x256xbf16>
    %c32_391 = arith.constant 32 : index
    %c0_392 = arith.constant 0 : index
    %476 = vector.load %arg19[%c32_391, %c0_392] : memref<144x256xbf16, #tpu.memory_space<vmem>>, vector<16x256xbf16>
    tpu.vector_store %arg19[%c32_391, %c0_392], %475 {strides = array<i32>} : memref<144x256xbf16, #tpu.memory_space<vmem>>, vector<16x256xbf16>,
    %c0_393 = arith.constant 0 : index
    %c127_394 = arith.constant 127 : index
    %477 = vector.load %arg18[%c0_393, %c127_394] : memref<16x512xf32, #tpu.memory_space<vmem>>, vector<16x256xf32>
    %478 = vector.broadcast %3 : vector<1x256xf32> to vector<16x256xf32>
    %479 = arith.mulf %477, %478 : vector<16x256xf32>
    %480 = arith.truncf %479 : vector<16x256xf32> to vector<16x256xbf16>
    %c48_395 = arith.constant 48 : index
    %c0_396 = arith.constant 0 : index
    %481 = vector.load %arg19[%c48_395, %c0_396] : memref<144x256xbf16, #tpu.memory_space<vmem>>, vector<16x256xbf16>
    tpu.vector_store %arg19[%c48_395, %c0_396], %480 {strides = array<i32>} : memref<144x256xbf16, #tpu.memory_space<vmem>>, vector<16x256xbf16>,
    %c0_397 = arith.constant 0 : index
    %c128_398 = arith.constant 128 : index
    %482 = vector.load %arg18[%c0_397, %c128_398] : memref<16x512xf32, #tpu.memory_space<vmem>>, vector<16x256xf32>
    %483 = arith.truncf %482 : vector<16x256xf32> to vector<16x256xbf16>
    %c64_399 = arith.constant 64 : index
    %c0_400 = arith.constant 0 : index
    %484 = vector.load %arg19[%c64_399, %c0_400] : memref<144x256xbf16, #tpu.memory_space<vmem>>, vector<16x256xbf16>
    tpu.vector_store %arg19[%c64_399, %c0_400], %483 {strides = array<i32>} : memref<144x256xbf16, #tpu.memory_space<vmem>>, vector<16x256xbf16>,
    %c0_401 = arith.constant 0 : index
    %c129_402 = arith.constant 129 : index
    %485 = vector.load %arg18[%c0_401, %c129_402] : memref<16x512xf32, #tpu.memory_space<vmem>>, vector<16x256xf32>
    %486 = vector.broadcast %4 : vector<1x256xf32> to vector<16x256xf32>
    %487 = arith.mulf %485, %486 : vector<16x256xf32>
    %488 = arith.truncf %487 : vector<16x256xf32> to vector<16x256xbf16>
    %c80_403 = arith.constant 80 : index
    %c0_404 = arith.constant 0 : index
    %489 = vector.load %arg19[%c80_403, %c0_404] : memref<144x256xbf16, #tpu.memory_space<vmem>>, vector<16x256xbf16>
    tpu.vector_store %arg19[%c80_403, %c0_404], %488 {strides = array<i32>} : memref<144x256xbf16, #tpu.memory_space<vmem>>, vector<16x256xbf16>,
    %c0_405 = arith.constant 0 : index
    %c143_406 = arith.constant 143 : index
    %490 = vector.load %arg18[%c0_405, %c143_406] : memref<16x512xf32, #tpu.memory_space<vmem>>, vector<16x256xf32>
    %491 = vector.broadcast %3 : vector<1x256xf32> to vector<16x256xf32>
    %492 = arith.mulf %490, %491 : vector<16x256xf32>
    %493 = arith.truncf %492 : vector<16x256xf32> to vector<16x256xbf16>
    %c96_407 = arith.constant 96 : index
    %c0_408 = arith.constant 0 : index
    %494 = vector.load %arg19[%c96_407, %c0_408] : memref<144x256xbf16, #tpu.memory_space<vmem>>, vector<16x256xbf16>
    tpu.vector_store %arg19[%c96_407, %c0_408], %493 {strides = array<i32>} : memref<144x256xbf16, #tpu.memory_space<vmem>>, vector<16x256xbf16>,
    %c0_409 = arith.constant 0 : index
    %c144_410 = arith.constant 144 : index
    %495 = vector.load %arg18[%c0_409, %c144_410] : memref<16x512xf32, #tpu.memory_space<vmem>>, vector<16x256xf32>
    %496 = arith.truncf %495 : vector<16x256xf32> to vector<16x256xbf16>
    %c112_411 = arith.constant 112 : index
    %c0_412 = arith.constant 0 : index
    %497 = vector.load %arg19[%c112_411, %c0_412] : memref<144x256xbf16, #tpu.memory_space<vmem>>, vector<16x256xbf16>
    tpu.vector_store %arg19[%c112_411, %c0_412], %496 {strides = array<i32>} : memref<144x256xbf16, #tpu.memory_space<vmem>>, vector<16x256xbf16>,
    %c0_413 = arith.constant 0 : index
    %c145_414 = arith.constant 145 : index
    %498 = vector.load %arg18[%c0_413, %c145_414] : memref<16x512xf32, #tpu.memory_space<vmem>>, vector<16x256xf32>
    %499 = vector.broadcast %4 : vector<1x256xf32> to vector<16x256xf32>
    %500 = arith.mulf %498, %499 : vector<16x256xf32>
    %501 = arith.truncf %500 : vector<16x256xf32> to vector<16x256xbf16>
    %c128_415 = arith.constant 128 : index
    %c0_416 = arith.constant 0 : index
    %502 = vector.load %arg19[%c128_415, %c0_416] : memref<144x256xbf16, #tpu.memory_space<vmem>>, vector<16x256xbf16>
    tpu.vector_store %arg19[%c128_415, %c0_416], %501 {strides = array<i32>} : memref<144x256xbf16, #tpu.memory_space<vmem>>, vector<16x256xbf16>,
    %c0_417 = arith.constant 0 : index
    %c0_418 = arith.constant 0 : index
    %503 = vector.load %arg19[%c0_417, %c0_418] : memref<144x256xbf16, #tpu.memory_space<vmem>>, vector<144x256xbf16>
    %cst_419 = arith.constant dense<0.000000e+00> : vector<16x256xf32>
    %504 = tpu.matmul %411, %503, %cst_419 {dimension_numbers = #tpu.dot_dimension_numbers<[1], [0], [0], [1], [0, 0, 1, 1], [], []>} : vector<16x144xbf16>, vector<144x256xbf16>, vector<16x256xf32> -> vector<16x256xf32>
    %cst_420 = arith.constant dense<0.000000e+00> : vector<16xf32>
    %505 = vector.multi_reduction <add>, %504, %cst_420 [1] : vector<16x256xf32> to vector<16xf32>
    %506 = vector.shape_cast %505 : vector<16xf32> to vector<16x1xf32>
    %cst_421 = arith.constant 3.906250e-03 : f32
    %507 = vector.broadcast %cst_421 : f32 to vector<16x1xf32>
    %508 = arith.mulf %506, %507 : vector<16x1xf32>
    %509 = vector.shape_cast %508 : vector<16x1xf32> to vector<16x1xf32>
    %510 = vector.broadcast %509 : vector<16x1xf32> to vector<16x128xf32>
    %511 = arith.truncf %510 : vector<16x128xf32> to vector<16x128xbf16>
    %cst_422 = arith.constant dense<0.000000e+00> : vector<4x128xf32>
    %512 = tpu.matmul %413, %511, %cst_422 {dimension_numbers = #tpu.dot_dimension_numbers<[1], [0], [0], [1], [0, 0, 1, 1], [], []>} : vector<4x16xbf16>, vector<16x128xbf16>, vector<4x128xf32> -> vector<4x128xf32>
    %cst_423 = arith.constant 0.000000e+00 : f32
    %513 = vector.broadcast %cst_423 : f32 to vector<4x128xf32>
    %514 = arith.maximumf %512, %513 : vector<4x128xf32>
    %515 = arith.truncf %514 : vector<4x128xf32> to vector<4x128xbf16>
    %cst_424 = arith.constant dense<0.000000e+00> : vector<16x128xf32>
    %516 = tpu.matmul %415, %515, %cst_424 {dimension_numbers = #tpu.dot_dimension_numbers<[1], [0], [0], [1], [0, 0, 1, 1], [], []>} : vector<16x4xbf16>, vector<4x128xbf16>, vector<16x128xf32> -> vector<16x128xf32>
    %cst_425 = arith.constant 0.000000e+00 : f32
    %517 = vector.broadcast %cst_425 : f32 to vector<16x128xf32>
    %518 = arith.subf %517, %516 : vector<16x128xf32>
    %519 = math.exp %518 : vector<16x128xf32>
    %cst_426 = arith.constant 1.000000e+00 : f32
    %520 = vector.broadcast %cst_426 : f32 to vector<16x128xf32>
    %521 = arith.addf %520, %519 : vector<16x128xf32>
    %522 = tpu.reciprocal %521 {approx = true} : vector<16x128xf32> -> vector<16x128xf32>
    %523 = vector.extract_strided_slice %522 {offsets = [0, 0], sizes = [16, 1], strides = [1, 1]} : vector<16x128xf32> to vector<16x1xf32>
    %524 = vector.broadcast %523 : vector<16x1xf32> to vector<16x256xf32>
    %525 = arith.mulf %504, %524 : vector<16x256xf32>
    %526 = arith.addf %525, %407 : vector<16x256xf32>
    %c0_427 = arith.constant 0 : index
    %c0_428 = arith.constant 0 : index
    %527 = vector.load %arg15[%c0_427, %c0_428] : memref<1x16xbf16, #tpu.memory_space<vmem>>, vector<1x16xbf16>
    %528 = arith.truncf %526 : vector<16x256xf32> to vector<16x256xbf16>
    %cst_429 = arith.constant dense<0.000000e+00> : vector<1x256xf32>
    %529 = tpu.matmul %527, %528, %cst_429 {dimension_numbers = #tpu.dot_dimension_numbers<[1], [0], [0], [1], [0, 0, 1, 1], [], []>} : vector<1x16xbf16>, vector<16x256xbf16>, vector<1x256xf32> -> vector<1x256xf32>
    %c0_430 = arith.constant 0 : index
    %c0_431 = arith.constant 0 : index
    %c0_432 = arith.constant 0 : index
    %530 = vector.load %arg16[%c0_430, %c0_431, %c0_432] : memref<1x1x256xf32, #tpu.memory_space<vmem>>, vector<1x1x256xf32>
    %531 = vector.shape_cast %530 : vector<1x1x256xf32> to vector<1x256xf32>
    %532 = vector.shape_cast %529 : vector<1x256xf32> to vector<1x1x256xf32>
    tpu.vector_store %arg16[%c0_430, %c0_431, %c0_432], %532 {strides = array<i32>} : memref<1x1x256xf32, #tpu.memory_space<vmem>>, vector<1x1x256xf32>,
    return
  }
  func.func @transform_0(%arg0: i32) -> (i32, i32, i32) {
    %c0_i32 = arith.constant 0 : i32
    %c0_i32_0 = arith.constant 0 : i32
    %c0_i32_1 = arith.constant 0 : i32
    return %arg0, %c0_i32, %c0_i32_0 : i32, i32, i32
  }
  func.func @transform_1(%arg0: i32) -> (i32, i32) {
    %c0_i32 = arith.constant 0 : i32
    %c0_i32_0 = arith.constant 0 : i32
    %c0_i32_1 = arith.constant 0 : i32
    return %c0_i32, %c0_i32_0 : i32, i32
  }
  func.func @transform_2(%arg0: i32) -> (i32, i32) {
    %c0_i32 = arith.constant 0 : i32
    %c0_i32_0 = arith.constant 0 : i32
    %c0_i32_1 = arith.constant 0 : i32
    return %c0_i32, %c0_i32_0 : i32, i32
  }
  func.func @transform_3(%arg0: i32) -> (i32, i32, i32) {
    %c0_i32 = arith.constant 0 : i32
    %c0_i32_0 = arith.constant 0 : i32
    %c0_i32_1 = arith.constant 0 : i32
    %c0_i32_2 = arith.constant 0 : i32
    return %c0_i32, %c0_i32_0, %c0_i32_1 : i32, i32, i32
  }
  func.func @transform_4(%arg0: i32) -> (i32, i32, i32) {
    %c0_i32 = arith.constant 0 : i32
    %c0_i32_0 = arith.constant 0 : i32
    %c0_i32_1 = arith.constant 0 : i32
    %c0_i32_2 = arith.constant 0 : i32
    return %c0_i32, %c0_i32_0, %c0_i32_1 : i32, i32, i32
  }
  func.func @transform_5(%arg0: i32) -> (i32, i32, i32) {
    %c0_i32 = arith.constant 0 : i32
    %c0_i32_0 = arith.constant 0 : i32
    %c0_i32_1 = arith.constant 0 : i32
    %c0_i32_2 = arith.constant 0 : i32
    return %c0_i32, %c0_i32_0, %c0_i32_1 : i32, i32, i32
  }
  func.func @transform_6(%arg0: i32) -> (i32, i32, i32) {
    %c0_i32 = arith.constant 0 : i32
    %c0_i32_0 = arith.constant 0 : i32
    %c0_i32_1 = arith.constant 0 : i32
    %c0_i32_2 = arith.constant 0 : i32
    return %c0_i32, %c0_i32_0, %c0_i32_1 : i32, i32, i32
  }
  func.func @transform_7(%arg0: i32) -> (i32, i32) {
    %c0_i32 = arith.constant 0 : i32
    %c0_i32_0 = arith.constant 0 : i32
    %c0_i32_1 = arith.constant 0 : i32
    return %c0_i32, %c0_i32_0 : i32, i32
  }
  func.func @transform_8(%arg0: i32) -> (i32, i32) {
    %c0_i32 = arith.constant 0 : i32
    %c0_i32_0 = arith.constant 0 : i32
    %c0_i32_1 = arith.constant 0 : i32
    return %c0_i32, %c0_i32_0 : i32, i32
  }
  func.func @transform_9(%arg0: i32) -> (i32, i32) {
    %c0_i32 = arith.constant 0 : i32
    %c0_i32_0 = arith.constant 0 : i32
    %c0_i32_1 = arith.constant 0 : i32
    return %c0_i32, %c0_i32_0 : i32, i32
  }
  func.func @transform_10(%arg0: i32) -> (i32, i32, i32) {
    %c0_i32 = arith.constant 0 : i32
    %c0_i32_0 = arith.constant 0 : i32
    %c0_i32_1 = arith.constant 0 : i32
    %c0_i32_2 = arith.constant 0 : i32
    return %c0_i32, %c0_i32_0, %c0_i32_1 : i32, i32, i32
  }
  func.func @transform_11(%arg0: i32) -> (i32, i32, i32) {
    %c0_i32 = arith.constant 0 : i32
    %c0_i32_0 = arith.constant 0 : i32
    %c0_i32_1 = arith.constant 0 : i32
    %c0_i32_2 = arith.constant 0 : i32
    return %c0_i32, %c0_i32_0, %c0_i32_1 : i32, i32, i32
  }
  func.func @transform_12(%arg0: i32) -> (i32, i32, i32) {
    %c0_i32 = arith.constant 0 : i32
    %c0_i32_0 = arith.constant 0 : i32
    %c0_i32_1 = arith.constant 0 : i32
    %c0_i32_2 = arith.constant 0 : i32
    return %c0_i32, %c0_i32_0, %c0_i32_1 : i32, i32, i32
  }
  func.func @transform_13(%arg0: i32) -> (i32, i32, i32) {
    %c0_i32 = arith.constant 0 : i32
    %c0_i32_0 = arith.constant 0 : i32
    %c0_i32_1 = arith.constant 0 : i32
    %c0_i32_2 = arith.constant 0 : i32
    return %c0_i32, %c0_i32_0, %c0_i32_1 : i32, i32, i32
  }
  func.func @transform_14(%arg0: i32) -> (i32, i32) {
    %c0_i32 = arith.constant 0 : i32
    %c0_i32_0 = arith.constant 0 : i32
    %c0_i32_1 = arith.constant 0 : i32
    return %c0_i32, %c0_i32_0 : i32, i32
  }
  func.func @transform_15(%arg0: i32) -> (i32, i32, i32) {
    %c0_i32 = arith.constant 0 : i32
    %c0_i32_0 = arith.constant 0 : i32
    %c0_i32_1 = arith.constant 0 : i32
    return %arg0, %c0_i32, %c0_i32_0 : i32, i32, i32
  }
  func.func @transform_16(%arg0: i32) -> (i32, i32, i32) {
    %c0_i32 = arith.constant 0 : i32
    %c0_i32_0 = arith.constant 0 : i32
    %c0_i32_1 = arith.constant 0 : i32
    return %arg0, %c0_i32, %c0_i32_0 : i32, i32, i32
  }
}

</mosaic_0001>

<bundles_post_ra>
// kernel: vq_prompt_block_forward.1
= control target key start
LH: loop header
LB: loop body
LE: loop exit
PB: predicated region body
PF: predicated region fallthrough
CT: control target
= control target key end

     0   :  { %s9400_s0 = inlined_call_operand.vmem [shape: bf16[2,3,256], index: 0, kind: input, shape index: {}]   ;;  %s9401_s1 = inlined_call_operand.vmem [shape: f32[2,256], index: 1, kind: input, shape index: {}]   ;;  %s9402_s2 = inlined_call_operand.vmem [shape: bf16[16,3], index: 2, kind: input, shape index: {}]   ;;  %s9403_s3 = inlined_call_operand.vmem [shape: bf16[2,16,144], index: 3, kind: input, shape index: {}]   ;;  %s9404_s4 = inlined_call_operand.vmem [shape: bf16[2,16,144], index: 4, kind: input, shape index: {}]   ;;  %s9405_s5 = inlined_call_operand.vmem [shape: bf16[2,4,16], index: 5, kind: input, shape index: {}]   ;;  %s9406_s6 = inlined_call_operand.vmem [shape: bf16[2,16,4], index: 6, kind: input, shape index: {}]   ;;  %s9407_s7 = inlined_call_operand.vmem [shape: bf16[16,16], index: 7, kind: input, shape index: {}]   ;;  %s9408_s8 = inlined_call_operand.vmem [shape: bf16[64,16], index: 8, kind: input, shape index: {}]   ;;  %s9409_s9 = inlined_call_operand.vmem [shape: bf16[16,64], index: 9, kind: input, shape index: {}]   ;;  %s9410_s10 = inlined_call_operand.vmem [shape: bf16[2,16,144], index: 10, kind: input, shape index: {}]   ;;  %s9411_s11 = inlined_call_operand.vmem [shape: bf16[2,16,144], index: 11, kind: input, shape index: {}]   ;;  %s9412_s12 = inlined_call_operand.hbm [shape: bf16[2,4,16], index: 12, kind: input, shape index: {}]   ;;  %s9413_s13 = inlined_call_operand.vmem [shape: bf16[2,16,4], index: 13, kind: input, shape index: {}]   ;;  %s9414_s14 = inlined_call_operand.vmem [shape: bf16[1,16], index: 14, kind: input, shape index: {}]   ;;  %s9415_s15 = inlined_call_operand.vmem [shape: f32[2,1,256], index: 15, kind: output, shape index: {0}]   ;;  %s9416_s16 = inlined_call_operand.vmem [shape: f32[2,1,128], index: 16, kind: output, shape index: {1}]  }
   0x1   :  { %9440 = sst [smem:[#allocation8_spill]] %s9400_s0 }
   0x2   :  { %22 = vsyncpa [#allocation5], 0  ;;  %s7551_s21 = smov 0  }
   0x3 LB: > { %s6422_s22 = sadd.s32 4294967295, %s7446_s21   ;;  %p6424_p0 = scmp.ge.s32.totalorder %s7446_s21, 1  ;;  %s7446_s21 = sphi %s7551_s21, %s28_s21  }
   0x4   : > { %p405_p1 = scmp.lt.s32.totalorder %s7446_s21, 3  ;;  %s7448_s23 = smov [#allocation4]  }
   0x5   : > { %s450_s24 = sshll.u32 %s7448_s23, 4  ;;  %p7309_p3 = scmp.eq.s32.totalorder %s6422_s22, 0  ;;  %s451_s24 = int_to_ptr.vmem [resolvable:$true] %s450_s24 }
   0x6   : > { %p7559_p2 = pnand %p6424_p0, %p405_p1  ;;  %s7421_s26 = scalar_lea.vmem %s451_s24, 64 }
   0x7   : > { %p7422_p7 = scmp.ne.s32.totalorder %s451_s24, %s7421_s26  ;;  %p7429_p10 = scmp.lt.s32.totalorder %s451_s24, %s451_s24 }
   0x8   : > { %p7305_p4 = pneg %p7559_p2  ;;  %p7430_p11 = scmp.lt.s32.totalorder %s7421_s26, %s7421_s26 }
   0xa   : > { %p7306_p5 = pnand %p7309_p3, %p7305_p4  ;;  %p7431_p12 = por %p7430_p11, %p7429_p10 }
   0xc   : > { %p7412_p6 = pneg %p7306_p5 }
   0xe   : > { %p7424_p8 = pnand %p7422_p7, %p7412_p6 }
  0x10   : > { %p7425_p9 = pneg %p7424_p8 }
  0x12   : > { %p7432_p13 = pnand %p7431_p12, %p7425_p9 }
  0x14   : > { %7435 = shalt.err (!%p7432_p13)
}
  0x15   : > { %s7449_s27 = smov 32   ;;  %s7450_s28 = smov 2  }
  0x16   : > { %7308 = dma.hbm_to_vmem [thread:$0]  (!%p7306_p5), %s9412_s12, 64, %s451_s24, [#allocation5], %s7449_s27, %s7449_s27, %s7450_s28  }
  0x17   : > { %480 = sbr.rel (%p7559_p2) target bundleno = 7027 (0x1b73), region = 80 }
  0x1c   : > { %7441 = dma.done.wait (%p7309_p3), [#allocation5], 64  }
  0x1d   : > { %7443 = vsyncadd (%p7309_p3), [#allocation5], 4294967232  ;;  %p532_p0 = scmp.lt.s32.totalorder %s6422_s22, 1  ;;  %vm573_vm0 = vcmask 1040384   ;;  %v9417_v0 = vlaneseq  ;;  %v9418_v1 = vmov 0   ;;  %vm9427_vm1 = vcmask 1041408  }
  0x1e   : > { %615 = vmatprep.mubr.bf16.mxu0 %v9418_v1  ;;  %7337 = vset.pattern.permute.xlu0 %v9418_v1  ;;  %v7452_v3 = vmov 65535   ;;  %s9443_s19 = sld [smem:[#allocation8_spill]]  ;;  %v549_v10 = vld [vmem:[%s9401_s1] ss:$2 sm:$0x3]  ;;  %s7453_s29 = smov 15  }
  0x1f   : > { %s9590_s22 = smov (!%p532_p0, %s6422_s22), 1  ;;  %v7577_v2 = vshrl.u32 %v9417_v0, 7  ;;  %v575_v4 = vsel %vm573_vm0, 4294967295, %v7452_v3  ;;  %7338 = vset.pattern.permute.xlu1 %v9418_v1  ;;  %v6432_v13 = vld [vmem:[%s9401_s1 + $0x1] ss:$2 sm:$0x3] }
  0x20   : > { %s6948_s0 = sshll.u32 %s9590_s22, 2  ;;  %v576_v6 = vsel %vm9427_vm1, %v575_v4, 0  ;;  %v7339_v15 = vld [vmem:[%s9402_s2] sm:$0xff]   ;;  %vm569_vm2 = vcmask 23552   ;;  %s7454_s30 = smov 1   ;;  %v9420_v19 = vmov 0.0|0.0  }
  0x21   : > { %9442 = vst [vmem:[#allocation7_spill] sm:$0xff] %v7577_v2  ;;  %v646_v5 = vsub.s32 0, %v7577_v2  ;;  %v650_v7 = vsub.s32 1, %v7577_v2  ;;  %s7456_s17 = smov 113   ;;  %s9424_s18 = smov 111   ;;  %vm9434_vm3 = vcmask 1039360  }
  0x22   : > { %vm9435_vm4 = vcmask 924672   ;;  %vm9432_vm5 = vcmask 121856   ;;  %vm9433_vm6 = vcmask 7168   ;;  %s7461_s23 = smov 16   ;;  %vm9430_vm7 = vcmask 908288   ;;  %s543_s24 = scalar_lea.vmem %s9416_s16, %s9590_s22 }
  0x23   : > { %v647_v12 = vrot.slane %v549_v10, %v646_v5  ;;  %v758_v16 = vrot.slane %v6432_v13, %v646_v5  ;;  %v651_v17 = vrot.slane %v549_v10, %v650_v7  ;;  %v762_v18 = vrot.slane %v6432_v13, %v650_v7  ;;  %s6431_s25 = sshll.u32 %s9590_s22, 1 }
  0x24   : > { %s536_s20 = scalar_lea.vmem %s9443_s19, %s6948_s0  ;;  %s7455_s0 = smov 127   ;;  %vm9431_vm8 = vcmask 138240   ;;  %vm9438_vm9 = vcmask 130048   ;;  %vm9437_vm10 = vcmask 1043456   ;;  %vm9436_vm11 = vcmask 916480  }
  0x25   : > { %v6434_v8 = vld.sshfl [vmem:[%s536_s20] sm:$0x33 pattern:$0x76325410]  ;;  %955 = vrot.lane.b32.xlu0 %v647_v12, %s7453_s29  ;;  %897 = vrot.lane.b32.xlu1 %v758_v16, %s7454_s30  ;;  %s7458_s19 = smov 17   ;;  %s7460_s20 = smov 112  }
  0x26   : > { %v568_v9 = vcombine.high %v6434_v8, %v6434_v8  ;;  %v578_v11 = vand.u32 %v6434_v8, %v576_v6  ;;  %vm9428_vm0 = vmmov 0  }
  0x28   : > { %v581_v14 = vand.u32 %v576_v6, %v568_v9 }
  0x29   : > { %957 = vrot.lane.b32.xlu0 %v651_v17, %s7453_s29  ;;  %899 = vrot.lane.b32.xlu1 %v762_v18, %s7454_s30 }
  0x2a   : > { %597 = vmatprep.subr.bf16.mxu0 %v581_v14 }
  0x2b   : > { %598 = vmatpush1.bf16.msra.mxu0 %v578_v11 }
  0x2d   : > { %821 = vrot.lane.b32.xlu0 %v647_v12, %s7455_s0  ;;  %823 = vrot.lane.b32.xlu1 %v651_v17, %s7455_s0 }
  0x2e   : > { %6435 = vmatmul.mubr.msk.bf16.vlgmr.msra.gmra.mxu0 %vm569_vm2, %v7339_v15  ;;  %vm9426_vm2 = vcmask 31744  }
  0x31   : > { %763 = vrot.lane.b32.xlu0 %v758_v16, %s7456_s17  ;;  %765 = vrot.lane.b32.xlu1 %v762_v18, %s7456_s17 }
  0x35   : > { %652 = vrot.lane.b32.xlu0 %v647_v12, %s9424_s18  ;;  %654 = vrot.lane.b32.xlu1 %v651_v17, %s9424_s18 }
  0x39   : > { %1056 = vrot.lane.b32.xlu0 %v758_v16, %s7458_s19  ;;  %1058 = vrot.lane.b32.xlu1 %v762_v18, %s7458_s19 }
  0x3d   : > { %1031 = vrot.lane.b32.xlu1 %v9420_v19, %s7460_s20 }
  0x41   : > { %1035 = vrot.lane.b32.xlu1 %v9420_v19, %s7460_s20 }
  0x97   : > { %v7613_v20 = vpop.permute.xlu0 %955  ;;  %v7615_v21 = vpop.permute.xlu1 %897 }
  0x9b   : > { %v958_v22 = vpop.permute.xlu0 %957  ;;  %v900_v25 = vpop.permute.xlu1 %899 }
  0x9c   : > { %v966_v23 = vmul.f32 0.0, %v958_v22  ;;  %v908_v26 = vmul.f32 0.0, %v900_v25  ;;  %v7665_v46 = vsel %vm9432_vm5, %v7613_v20, %v958_v22  ;;  %v7680_v52 = vsel %vm9433_vm6, %v7615_v21, %v900_v25 }
  0x9e   : > { %v7617_v24 = vpack.c.bf16 %v966_v23, %v966_v23  ;;  %v7621_v27 = vpack.c.bf16 %v908_v26, %v908_v26  ;;  %v9422_v26 = vmov 0.0  }
  0x9f   : > { %v822_v28 = vpop.permute.xlu0 %821  ;;  %v7629_v29 = vpop.permute.xlu1 %823 }
  0xa0   : > { %988 = vrot.lane.b32.xlu1 %v7617_v24, %s7456_s17  ;;  %v7635_v31 = vsel %vm9434_vm3, %v822_v28, %v7629_v29  ;;  %v7639_v33 = vmul.f32 0.0, %v822_v28 }
  0xa3   : > { %v764_v34 = vpop.permute.xlu0 %763  ;;  %v7641_v35 = vpop.permute.xlu1 %765 }
  0xa4   : > { %992 = vrot.lane.b32.xlu1 %v7617_v24, %s7456_s17  ;;  %v7651_v39 = vsel %vm9435_vm4, %v764_v34, %v7641_v35  ;;  %v7656_v42 = vmul.f32 0.0, %v764_v34 }
  0xa7   : > { %v7687_v56 = vpop.permute.xlu1 %654  ;;  %v653_v25 = vpop.permute.xlu0 %652 }
  0xa8   : > { %930 = vrot.lane.b32.xlu1 %v7621_v27, %s7455_s0  ;;  %v7739_v34 = vsel %vm9430_vm7, %v653_v25, %v7687_v56 }
  0xab   : > { %v1059_v6 = vpop.permute.xlu1 %1058 }
  0xac   : > { %934 = vrot.lane.b32.xlu1 %v7621_v27, %s7455_s0  ;;  %v1067_v7 = vmul.f32 0.0, %v1059_v6 }
  0xae   : > { %v7713_v11 = vpack.c.bf16 %v1067_v7, %v1067_v7 }
  0xee   : > { %v7631_v30 = vpop.f32.mrf.mxu0 }
  0xef   : > { %v831_v38 = vmul.f32 %v7635_v31, %v7631_v30  ;;  %v773_v44 = vmul.f32 %v7651_v39, %v7631_v30  ;;  %v964_v51 = vmul.f32 %v7613_v20, %v7631_v30  ;;  %v906_v58 = vmul.f32 %v7615_v21, %v7631_v30 }
  0xf0   : > { %v7637_v32 = vpop.f32.mrf.mxu0  ;;  %v6953_v28 = vpack.c.bf16 %v7631_v30, %v9422_v26 }
  0xf1   : > { %v6965_v36 = vpack.c.bf16 %v7637_v32, %v7631_v30  ;;  %v832_v37 = vmul.f32 %v7629_v29, %v7637_v32  ;;  %v774_v41 = vmul.f32 %v7641_v35, %v7637_v32  ;;  %v6961_v43 = vpack.c.bf16 %v831_v38, %v7639_v33 }
  0xf2   : > { %v7667_v47 = vpop.f32.mrf.mxu0  ;;  %v6957_v48 = vpack.c.bf16 %v773_v44, %v7656_v42  ;;  %v965_v49 = vmul.f32 %v7665_v46, %v7637_v32  ;;  %v6954_v50 = vpack.c.bf16 %v7637_v32, %v7637_v32  ;;  %v907_v55 = vmul.f32 %v7680_v52, %v7637_v32 }
  0xf3   : > { %1029 = vrot.lane.b32.xlu0 %v6965_v36, %s7460_s20  ;;  %v6962_v40 = vpack.c.bf16 %v832_v37, %v832_v37  ;;  %v6958_v45 = vpack.c.bf16 %v774_v41, %v774_v41  ;;  %v663_v59 = vmul.f32 %v7687_v56, %v7637_v32  ;;  %v834_v3 = vmul.f32 %v7635_v31, %v7667_v47 }
  0xf4   : > { %v7682_v53 = vpop.f32.mrf.mxu0  ;;  %v6971_v54 = vpack.c.bf16 %v965_v49, %v964_v51  ;;  %v6967_v60 = vpack.c.bf16 %v907_v55, %v906_v58  ;;  %v776_v9 = vmul.f32 %v7651_v39, %v7667_v47  ;;  %v967_v14 = vmul.f32 %v7613_v20, %v7667_v47  ;;  %v1032_v58 = vpop.permute.xlu1 %1031 }
  0xf5   : > { %854 = vrot.lane.b32.xlu1 %v6962_v40, %s7454_s30  ;;  %v6956_v57 = vpack.c.bf16 %v7682_v53, %v7682_v53  ;;  %v6950_v61 = vpack.c.bf16 %v663_v59, %v663_v59  ;;  %v835_v62 = vmul.f32 %v7629_v29, %v7682_v53  ;;  %v6966_v63 = vpack.c.bf16 %v7682_v53, %v7667_v47  ;;  %v7750_v40 = vpop.permute.xlu0 %1056 }
  0xf6   : > { %v777_v5 = vmul.f32 %v7641_v35, %v7682_v53  ;;  %v6963_v8 = vpack.c.bf16 %v834_v3, %v7639_v33  ;;  %v6959_v12 = vpack.c.bf16 %v776_v9, %v7656_v42  ;;  %v968_v13 = vmul.f32 %v7665_v46, %v7682_v53 }
  0xf7   : > { %852 = vrot.lane.b32.xlu0 %v6961_v43, %s7454_s30  ;;  %v6964_v4 = vpack.c.bf16 %v835_v62, %v835_v62  ;;  %v666_v15 = vmul.f32 %v7687_v56, %v7682_v53  ;;  %v910_v17 = vmul.f32 %v7680_v52, %v7682_v53  ;;  %v909_v22 = vmul.f32 %v7615_v21, %v7667_v47 }
  0xf8   : > { %v6960_v10 = vpack.c.bf16 %v777_v5, %v777_v5  ;;  %v6973_v16 = vpack.c.bf16 %v968_v13, %v967_v14  ;;  %v7742_v36 = vmul.f32 0.0, %v653_v25  ;;  %v6955_v37 = vpack.c.bf16 %v7667_v47, %v9422_v26  ;;  %v1036_v59 = vpop.permute.xlu1 %1035 }
  0xf9   : > { %796 = vrot.lane.b32.xlu1 %v6958_v45, %s7453_s29  ;;  %v6952_v18 = vpack.c.bf16 %v666_v15, %v666_v15  ;;  %v6969_v23 = vpack.c.bf16 %v910_v17, %v909_v22  ;;  %v662_v38 = vmul.f32 %v7739_v34, %v7631_v30  ;;  %v665_v43 = vmul.f32 %v7739_v34, %v7667_v47 }
  0xfa   : > { %v7760_v44 = vsel %vm9431_vm8, %v7750_v40, %v1059_v6  ;;  %v1065_v49 = vmul.f32 %v7750_v40, %v7631_v30  ;;  %v1068_v55 = vmul.f32 %v7750_v40, %v7667_v47 }
  0xfb   : > { %794 = vrot.lane.b32.xlu0 %v6957_v48, %s7453_s29  ;;  %v6949_v41 = vpack.c.bf16 %v662_v38, %v7742_v36  ;;  %v6951_v45 = vpack.c.bf16 %v665_v43, %v7742_v36  ;;  %v1066_v48 = vmul.f32 %v7760_v44, %v7637_v32  ;;  %v1069_v51 = vmul.f32 %v7760_v44, %v7682_v53 }
  0xfd   : > { %729 = vrot.lane.b32.xlu1 %v6954_v50, %s7461_s23  ;;  %v6979_v50 = vpack.c.bf16 %v1066_v48, %v1065_v49 }
  0xff   : > { %986 = vrot.lane.b32.xlu0 %v6971_v54, %s7456_s17  ;;  %v7342_v54 = vld [vmem:[%s9403_s3 + $0x4] ss:$8 sps:$4 sm:$0xff]  }
 0x100   : > { %6490 = vmatprep.mubr.msk.bf16.mxu1 %vm9438_vm9, %v7342_v54 }
 0x101   : > { %733 = vrot.lane.b32.xlu1 %v6956_v57, %s7461_s23  ;;  %v6981_v57 = vpack.c.bf16 %v1069_v51, %v1068_v55 }
 0x103   : > { %928 = vrot.lane.b32.xlu0 %v6967_v60, %s7455_s0 }
 0x105   : > { %685 = vrot.lane.b32.xlu1 %v6950_v61, %s7458_s19 }
 0x107   : > { %1033 = vrot.lane.b32.xlu0 %v6966_v63, %s7460_s20 }
 0x109   : > { %858 = vrot.lane.b32.xlu1 %v6964_v4, %s7454_s30 }
 0x10b   : > { %856 = vrot.lane.b32.xlu0 %v6963_v8, %s7454_s30 }
 0x10d   : > { %800 = vrot.lane.b32.xlu1 %v6960_v10, %s7453_s29 }
 0x10f   : > { %798 = vrot.lane.b32.xlu0 %v6959_v12, %s7453_s29  ;;  %v1038_v12 = vrot.slane %v1032_v58, 4 }
 0x111   : > { %1089 = vrot.lane.b32.xlu1 %v7713_v11, %s9424_s18 }
 0x112   : > { %v989_v60 = vpop.permute.xlu1 %988 }
 0x113   : > { %990 = vrot.lane.b32.xlu0 %v6973_v16, %s7456_s17  ;;  %v1040_v16 = vrot.slane %v1036_v59, 4  ;;  %v995_v48 = vrot.slane %v989_v60, 4 }
 0x115   : > { %689 = vrot.lane.b32.xlu1 %v6952_v18, %s7458_s19 }
 0x116   : > { %v993_v61 = vpop.permute.xlu1 %992 }
 0x117   : > { %932 = vrot.lane.b32.xlu0 %v6969_v23, %s7455_s0  ;;  %v997_v54 = vrot.slane %v993_v61, 4 }
 0x119   : > { %1093 = vrot.lane.b32.xlu1 %v7713_v11, %s9424_s18 }
 0x11a   : > { %v931_v62 = vpop.permute.xlu1 %930 }
 0x11b   : > { %727 = vrot.lane.b32.xlu0 %v6953_v28, %s7461_s23  ;;  %v937_v58 = vrot.slane %v931_v62, 4 }
 0x11d   : > { %1612 = vrot.lane.b32.xlu1 %v9420_v19, %s7460_s20 }
 0x11e   : > { %v935_v63 = vpop.permute.xlu1 %934 }
 0x11f   : > { %731 = vrot.lane.b32.xlu0 %v6955_v37, %s7461_s23 }
 0x121   : > { %1616 = vrot.lane.b32.xlu1 %v9420_v19, %s7460_s20 }
 0x123   : > { %683 = vrot.lane.b32.xlu0 %v6949_v41, %s7458_s19 }
 0x125   : > { %1570 = vrot.lane.b32.xlu1 %v7617_v24, %s7456_s17 }
 0x127   : > { %687 = vrot.lane.b32.xlu0 %v6951_v45, %s7458_s19 }
 0x129   : > { %1574 = vrot.lane.b32.xlu1 %v7617_v24, %s7456_s17 }
 0x12b   : > { %1087 = vrot.lane.b32.xlu0 %v6979_v50, %s9424_s18 }
 0x12d   : > { %1522 = vrot.lane.b32.xlu1 %v7621_v27, %s7455_s0 }
 0x12f   : > { %1091 = vrot.lane.b32.xlu0 %v6981_v57, %s9424_s18 }
 0x131   : > { %1526 = vrot.lane.b32.xlu1 %v7621_v27, %s7455_s0 }
 0x165   : > { %v1030_v3 = vpop.permute.xlu0 %1029 }
 0x166   : > { %v1037_v13 = vrot.slane %v1030_v3, 4 }
 0x167   : > { %v855_v4 = vpop.permute.xlu1 %854 }
 0x168   : > { %v1041_v18 = vsel %vm9437_vm10, %v1037_v13, %v1038_v12 }
 0x169   : > { %v7787_v5 = vpop.permute.xlu0 %852  ;;  %v1043_v25 = vsel %vm9436_vm11, %v1030_v3, %v1041_v18  ;;  %v939_v3 = vrot.slane %v935_v63, 4 }
 0x16a   : > { %v860_v61 = vrot.slane %v7787_v5, 4 }
 0x16b   : > { %v7789_v6 = vpop.permute.xlu1 %796 }
 0x16d   : > { %v7791_v7 = vpop.permute.xlu0 %794 }
 0x16f   : > { %v7793_v9 = vpop.permute.xlu1 %729 }
 0x171   : > { %v987_v8 = vpop.permute.xlu0 %986 }
 0x172   : > { %v994_v45 = vrot.slane %v987_v8, 4 }
 0x173   : > { %v7795_v14 = vpop.permute.xlu1 %733 }
 0x174   : > { %v998_v55 = vsel %vm9437_vm10, %v994_v45, %v995_v48 }
 0x175   : > { %v929_v10 = vpop.permute.xlu0 %928  ;;  %v1000_v12 = vsel %vm9435_vm4, %v987_v8, %v998_v55  ;;  %v802_v55 = vrot.slane %v7791_v7, 4 }
 0x176   : > { %v936_v49 = vrot.slane %v929_v10, 4 }
 0x177   : > { %v7801_v41 = vpop.permute.xlu1 %685 }
 0x178   : > { %v940_v13 = vsel %vm9437_vm10, %v936_v49, %v937_v58 }
 0x179   : > { %v1034_v15 = vpop.permute.xlu0 %1033  ;;  %v942_v63 = vsel %vm9434_vm3, %v929_v10, %v940_v13 }
 0x17a   : > { %v1039_v17 = vrot.slane %v1034_v15, 4 }
 0x17b   : > { %v859_v50 = vpop.permute.xlu1 %858 }
 0x17c   : > { %v1044_v22 = vsel %vm9437_vm10, %v1039_v17, %v1040_v16 }
 0x17d   : > { %v857_v23 = vpop.permute.xlu0 %856  ;;  %v1045_v28 = vsel %vm9436_vm11, %v1034_v15, %v1044_v22 }
 0x17e   : > { %v6487_v37 = vcombine.high %v1043_v25, %v1045_v28  ;;  %v6486_v38 = vcombine.low %v1043_v25, %v1045_v28  ;;  %v862_v17 = vrot.slane %v857_v23, 4  ;;  %v863_v28 = vrot.slane %v859_v50, 4 }
 0x17f   : > { %v801_v25 = vpop.permute.xlu1 %800 }
 0x180   : > { %1229 = vmatprep.subr.bf16.mxu1 %v6487_v37  ;;  %v861_v37 = vrot.slane %v855_v4, 4  ;;  %v867_v45 = vsel %vm9437_vm10, %v862_v17, %v863_v28  ;;  %v805_v50 = vrot.slane %v801_v25, 4  ;;  %v7222_v4 = vpack.c.bf16 %v7682_v53, %v7637_v32 }
 0x181   : > { %1230 = vmatpush1.bf16.msra.mxu1 %v6486_v38  ;;  %v799_v43 = vpop.permute.xlu0 %798  ;;  %v868_v10 = vsel %vm9433_vm6, %v857_v23, %v867_v45  ;;  %v738_v17 = vrot.slane %v7795_v14, 4 }
 0x182   : > { %v804_v48 = vrot.slane %v799_v43, 4 }
 0x185   : > { %v991_v51 = vpop.permute.xlu0 %990 }
 0x186   : > { %v996_v57 = vrot.slane %v991_v51, 4 }
 0x188   : > { %v1001_v59 = vsel %vm9437_vm10, %v996_v57, %v997_v54  ;;  %v864_v54 = vsel %vm9437_vm10, %v860_v61, %v861_v37  ;;  %v1090_v57 = vpop.permute.xlu1 %1089 }
 0x189   : > { %v1002_v15 = vsel %vm9435_vm4, %v991_v51, %v1001_v59  ;;  %v933_v16 = vpop.permute.xlu0 %932  ;;  %v803_v59 = vrot.slane %v7789_v6, 4  ;;  %v866_v13 = vsel %vm9433_vm6, %v7787_v5, %v864_v54 }
 0x18a   : > { %v938_v60 = vrot.slane %v933_v16, 4  ;;  %v6485_v18 = vcombine.high %v1000_v12, %v1002_v15  ;;  %v6484_v22 = vcombine.low %v1000_v12, %v1002_v15  ;;  %v7221_v15 = vpack.c.bf16 %v7667_v47, %v7631_v30 }
 0x18b   : > { %v6478_v28 = vcombine.low %v866_v13, %v868_v10 }
 0x18c   : > { %v943_v62 = vsel %vm9437_vm10, %v938_v60, %v939_v3  ;;  %1231 = vmatprep.subr.bf16.mxu1 %v6485_v18  ;;  %v809_v3 = vsel %vm9437_vm10, %v804_v48, %v805_v50  ;;  %v6479_v60 = vcombine.high %v866_v13, %v868_v10  ;;  %v690_v61 = vpop.permute.xlu1 %689 }
 0x18d   : > { %v944_v8 = vsel %vm9434_vm3, %v933_v16, %v943_v62  ;;  %1232 = vmatpush1.bf16.msra.mxu1 %v6484_v22  ;;  %v728_v38 = vpop.permute.xlu0 %727  ;;  %v806_v16 = vsel %vm9437_vm10, %v802_v55, %v803_v59  ;;  %v810_v18 = vsel %vm9432_vm5, %v799_v43, %v809_v3  ;;  %v736_v22 = vrot.slane %v7793_v9, 4 }
 0x18e   : > { %v6483_v49 = vcombine.high %v942_v63, %v944_v8  ;;  %v6482_v51 = vcombine.low %v942_v63, %v944_v8  ;;  %v735_v23 = vrot.slane %v728_v38, 4  ;;  %v808_v5 = vsel %vm9432_vm5, %v7791_v7, %v806_v16 }
 0x18f   : > { %v6477_v14 = vcombine.high %v808_v5, %v810_v18  ;;  %v692_v8 = vrot.slane %v7801_v41, 4  ;;  %v694_v45 = vrot.slane %v690_v61, 4 }
 0x190   : > { %1233 = vmatprep.subr.bf16.mxu1 %v6483_v49  ;;  %v739_v62 = vsel %vm9437_vm10, %v735_v23, %v736_v22  ;;  %v6476_v49 = vcombine.low %v808_v5, %v810_v18  ;;  %v1094_v3 = vpop.permute.xlu1 %1093 }
 0x191   : > { %1234 = vmatpush1.bf16.msra.mxu1 %v6482_v51  ;;  %v732_v58 = vpop.permute.xlu0 %731  ;;  %v741_v48 = vsel %vm9438_vm9, %v728_v38, %v739_v62 }
 0x192   : > { %v737_v12 = vrot.slane %v732_v58, 4  ;;  %1235 = vmatprep.subr.bf16.mxu1 %v7222_v4 }
 0x194   : > { %v742_v25 = vsel %vm9437_vm10, %v737_v12, %v738_v17  ;;  %v1098_v12 = vrot.slane %v1094_v3, 4 }
 0x195   : > { %1236 = vmatpush1.bf16.msra.mxu1 %v7221_v15  ;;  %v684_v6 = vpop.permute.xlu0 %683  ;;  %v743_v63 = vsel %vm9438_vm9, %v732_v58, %v742_v25  ;;  %v1096_v58 = vrot.slane %v1090_v57, 4  ;;  %v7340_v57 = vld [vmem:[%s9403_s3] ss:$8 sps:$4 sm:$0xff]  }
 0x196   : > { %1237 = vmatprep.subr.bf16.mxu1 %v6479_v60  ;;  %v691_v37 = vrot.slane %v684_v6, 4  ;;  %v6475_v54 = vcombine.high %v741_v48, %v743_v63  ;;  %v6474_v41 = vcombine.low %v741_v48, %v743_v63 }
 0x198   : > { %v696_v7 = vsel %vm9437_vm10, %v691_v37, %v692_v8 }
 0x199   : > { %1238 = vmatpush1.bf16.msra.mxu1 %v6478_v28  ;;  %v688_v43 = vpop.permute.xlu0 %687  ;;  %v698_v10 = vsel %vm9431_vm8, %v684_v6, %v696_v7 }
 0x19a   : > { %v693_v9 = vrot.slane %v688_v43, 4  ;;  %1239 = vmatprep.subr.bf16.mxu1 %v6477_v14 }
 0x19c   : > { %v699_v51 = vsel %vm9437_vm10, %v693_v9, %v694_v45 }
 0x19d   : > { %v700_v55 = vsel %vm9431_vm8, %v688_v43, %v699_v51  ;;  %1240 = vmatpush1.bf16.msra.mxu1 %v6476_v49  ;;  %v1088_v50 = vpop.permute.xlu0 %1087 }
 0x19e   : > { %v1095_v4 = vrot.slane %v1088_v50, 4  ;;  %1241 = vmatprep.subr.bf16.mxu1 %v6475_v54  ;;  %v6473_v59 = vcombine.high %v698_v10, %v700_v55  ;;  %v6472_v16 = vcombine.low %v698_v10, %v700_v55 }
 0x1a0   : > { %v1099_v13 = vsel %vm9437_vm10, %v1095_v4, %v1096_v58 }
 0x1a1   : > { %1242 = vmatpush1.bf16.msra.mxu1 %v6474_v41  ;;  %v1092_v38 = vpop.permute.xlu0 %1091  ;;  %v1101_v23 = vsel %vm9430_vm7, %v1088_v50, %v1099_v13 }
 0x1a2   : > { %v1097_v15 = vrot.slane %v1092_v38, 4  ;;  %1243 = vmatprep.subr.bf16.mxu1 %v6473_v59 }
 0x1a4   : > { %v1102_v17 = vsel %vm9437_vm10, %v1097_v15, %v1098_v12 }
 0x1a5   : > { %v1103_v60 = vsel %vm9430_vm7, %v1092_v38, %v1102_v17  ;;  %1244 = vmatpush1.bf16.msra.mxu1 %v6472_v16 }
 0x1a6   : > { %v6489_v18 = vcombine.high %v1101_v23, %v1103_v60  ;;  %v6488_v6 = vcombine.low %v1101_v23, %v1103_v60 }
 0x1a8   : > { %1259 = vmatprep.subr.bf16.mxu1 %v6489_v18 }
 0x1a9   : > { %1260 = vmatpush2.bf16.msra.mxu1 %v6488_v6 }
 0x1aa   : > { %7253 = vmatprep.subr.bf16.mxu1 %v9422_v26 }
 0x1ac   : > { %1262 = vmatmul.mubr.bf16.vlgmr.msra.gmra.mxu1 %v7340_v57 }
 0x1ad   : > { %7255 = vmatprep.mubr.msk.bf16.mxu1 %vm9428_vm0, %v9422_v26 }
 0x26c   : > { %v1263_v22 = vpop.f32.mrf.mxu1 }
 0x26d   : > { %vm1272_vm12 = vcmp.ge.f32.partialorder %v1263_v22, 0.0  ;;  %v1276_v25 = vmul.f32 0.25, %v1263_v22 }
 0x26e   : > { %v1265_v5 = vpop.f32.mrf.mxu1 }
 0x26f   : > { %v7847_v61 = vsel %vm1272_vm12, %v1263_v22, %v1276_v25  ;;  %vm1273_vm13 = vcmp.ge.f32.partialorder %v1265_v5, 0.0  ;;  %v1277_v28 = vmul.f32 0.25, %v1265_v5 }
 0x270   : > { %v1267_v62 = vpop.f32.mrf.mxu1  ;;  %v1433_v43 = vmul.f32 %v7847_v61, %v7635_v31  ;;  %v1385_v51 = vmul.f32 %v7847_v61, %v7651_v39  ;;  %v1546_v58 = vmul.f32 %v7847_v61, %v7613_v20  ;;  %v1498_v15 = vmul.f32 %v7847_v61, %v7615_v21 }
 0x271   : > { %v7849_v37 = vsel %vm1273_vm13, %v1265_v5, %v1277_v28  ;;  %v1278_v48 = vmul.f32 0.25, %v1267_v62  ;;  %vm1274_vm14 = vcmp.ge.f32.partialorder %v1267_v62, 0.0 }
 0x272   : > { %v6999_v14 = vpack.c.bf16 %v7849_v37, %v7847_v61  ;;  %v1434_v63 = vmul.f32 %v7849_v37, %v7629_v29  ;;  %v1269_v8 = vpop.f32.mrf.mxu1  ;;  %v1386_v9 = vmul.f32 %v7849_v37, %v7641_v35  ;;  %v6995_v7 = vpack.c.bf16 %v1433_v43, %v7639_v33 }
 0x273   : > { %v1279_v49 = vmul.f32 0.25, %v1269_v8  ;;  %vm1275_vm15 = vcmp.ge.f32.partialorder %v1269_v8, 0.0  ;;  %v7865_v55 = vsel %vm1274_vm14, %v1267_v62, %v1278_v48  ;;  %v6991_v4 = vpack.c.bf16 %v1385_v51, %v7656_v42 }
 0x274   : > { %1610 = vrot.lane.b32.xlu0 %v6999_v14, %s7460_s20  ;;  %v6996_v45 = vpack.c.bf16 %v1434_v63, %v1434_v63  ;;  %v6992_v54 = vpack.c.bf16 %v1386_v9, %v1386_v9  ;;  %v1547_v10 = vmul.f32 %v7849_v37, %v7665_v46  ;;  %v6988_v41 = vpack.c.bf16 %v7849_v37, %v7849_v37 }
 0x275   : > { %v7867_v50 = vsel %vm1275_vm15, %v1269_v8, %v1279_v49  ;;  %v7223_v3 = vpack.c.bf16 %v7865_v55, %v7847_v61  ;;  %v1499_v12 = vmul.f32 %v7849_v37, %v7680_v52  ;;  %v1296_v16 = vmul.f32 %v7849_v37, %v7687_v56 }
 0x276   : > { %1456 = vrot.lane.b32.xlu1 %v6996_v45, %s7454_s30  ;;  %v7224_v59 = vpack.c.bf16 %v7867_v50, %v7849_v37  ;;  %v7005_v38 = vpack.c.bf16 %v1547_v10, %v1546_v58  ;;  %v6990_v13 = vpack.c.bf16 %v7867_v50, %v7867_v50  ;;  %v1437_v60 = vmul.f32 %v7867_v50, %v7629_v29 }
 0x277   : > { %v7001_v17 = vpack.c.bf16 %v1499_v12, %v1498_v15  ;;  %v6984_v23 = vpack.c.bf16 %v1296_v16, %v1296_v16  ;;  %v7000_v18 = vpack.c.bf16 %v7867_v50, %v7865_v55  ;;  %v1436_v6 = vmul.f32 %v7865_v55, %v7635_v31  ;;  %v7343_v15 = vld [vmem:[%s9404_s4 + $0x4] ss:$8 sps:$4 sm:$0xff]  }
 0x278   : > { %1454 = vrot.lane.b32.xlu0 %v6995_v7, %s7454_s30  ;;  %v6998_v57 = vpack.c.bf16 %v1437_v60, %v1437_v60  ;;  %v1389_v22 = vmul.f32 %v7867_v50, %v7641_v35  ;;  %v1388_v5 = vmul.f32 %v7865_v55, %v7651_v39  ;;  %v1550_v14 = vmul.f32 %v7867_v50, %v7665_v46 }
 0x279   : > { %v6997_v25 = vpack.c.bf16 %v1436_v6, %v7639_v33  ;;  %v1549_v63 = vmul.f32 %v7865_v55, %v7613_v20  ;;  %v1299_v43 = vmul.f32 %v7867_v50, %v7687_v56  ;;  %v1502_v45 = vmul.f32 %v7867_v50, %v7680_v52  ;;  %6545 = vmatprep.mubr.msk.bf16.mxu0 %vm9438_vm9, %v7343_v15 }
 0x27a   : > { %1408 = vrot.lane.b32.xlu1 %v6992_v54, %s7453_s29  ;;  %v6994_v28 = vpack.c.bf16 %v1389_v22, %v1389_v22  ;;  %v6993_v62 = vpack.c.bf16 %v1388_v5, %v7656_v42  ;;  %v1501_v48 = vmul.f32 %v7865_v55, %v7615_v21  ;;  %v6987_v7 = vpack.c.bf16 %v7847_v61, %v9422_v26 }
 0x27b   : > { %v7007_v8 = vpack.c.bf16 %v1550_v14, %v1549_v63  ;;  %v6986_v9 = vpack.c.bf16 %v1299_v43, %v1299_v43  ;;  %v6989_v51 = vpack.c.bf16 %v7865_v55, %v9422_v26  ;;  %v1295_v54 = vmul.f32 %v7847_v61, %v7739_v34 }
 0x27c   : > { %1406 = vrot.lane.b32.xlu0 %v6991_v4, %s7453_s29  ;;  %v7003_v49 = vpack.c.bf16 %v1502_v45, %v1501_v48  ;;  %v1298_v10 = vmul.f32 %v7865_v55, %v7739_v34  ;;  %v1637_v58 = vmul.f32 %v7849_v37, %v7760_v44  ;;  %v1639_v16 = vmul.f32 %v7865_v55, %v7750_v40 }
 0x27d   : > { %v6983_v4 = vpack.c.bf16 %v1295_v54, %v7742_v36 }
 0x27e   : > { %1360 = vrot.lane.b32.xlu1 %v6988_v41, %s7461_s23  ;;  %v6985_v41 = vpack.c.bf16 %v1298_v10, %v7742_v36 }
 0x280   : > { %1568 = vrot.lane.b32.xlu0 %v7005_v38, %s7456_s17  ;;  %v1636_v38 = vmul.f32 %v7847_v61, %v7750_v40 }
 0x282   : > { %1364 = vrot.lane.b32.xlu1 %v6990_v13, %s7461_s23  ;;  %v7013_v12 = vpack.c.bf16 %v1637_v58, %v1636_v38  ;;  %v1640_v13 = vmul.f32 %v7867_v50, %v7760_v44 }
 0x284   : > { %1520 = vrot.lane.b32.xlu0 %v7001_v17, %s7455_s0  ;;  %v7015_v17 = vpack.c.bf16 %v1640_v13, %v1639_v16 }
 0x286   : > { %1318 = vrot.lane.b32.xlu1 %v6984_v23, %s7458_s19  ;;  %v1613_v23 = vpop.permute.xlu1 %1612 }
 0x287   : > { %v1619_v45 = vrot.slane %v1613_v23, 4 }
 0x288   : > { %1614 = vrot.lane.b32.xlu0 %v7000_v18, %s7460_s20 }
 0x28a   : > { %1460 = vrot.lane.b32.xlu1 %v6998_v57, %s7454_s30  ;;  %v1617_v60 = vpop.permute.xlu1 %1616 }
 0x28c   : > { %1458 = vrot.lane.b32.xlu0 %v6997_v25, %s7454_s30 }
 0x28e   : > { %1412 = vrot.lane.b32.xlu1 %v6994_v28, %s7453_s29  ;;  %v1571_v18 = vpop.permute.xlu1 %1570 }
 0x290   : > { %1410 = vrot.lane.b32.xlu0 %v6993_v62, %s7453_s29 }
 0x292   : > { %1660 = vrot.lane.b32.xlu1 %v7713_v11, %s9424_s18  ;;  %v1575_v6 = vpop.permute.xlu1 %1574 }
 0x294   : > { %1572 = vrot.lane.b32.xlu0 %v7007_v8, %s7456_s17 }
 0x296   : > { %1322 = vrot.lane.b32.xlu1 %v6986_v9, %s7458_s19  ;;  %v1523_v57 = vpop.permute.xlu1 %1522 }
 0x298   : > { %1524 = vrot.lane.b32.xlu0 %v7003_v49, %s7455_s0 }
 0x29a   : > { %1664 = vrot.lane.b32.xlu1 %v7713_v11, %s9424_s18  ;;  %v1527_v22 = vpop.permute.xlu1 %1526 }
 0x29c   : > { %1358 = vrot.lane.b32.xlu0 %v6987_v7, %s7461_s23  ;;  %v1621_v7 = vrot.slane %v1617_v60, 4 }
 0x2a0   : > { %1362 = vrot.lane.b32.xlu0 %v6989_v51, %s7461_s23 }
 0x2a4   : > { %1316 = vrot.lane.b32.xlu0 %v6983_v4, %s7458_s19 }
 0x2a8   : > { %1320 = vrot.lane.b32.xlu0 %v6985_v41, %s7458_s19 }
 0x2ac   : > { %1658 = vrot.lane.b32.xlu0 %v7013_v12, %s9424_s18 }
 0x2b0   : > { %1662 = vrot.lane.b32.xlu0 %v7015_v17, %s9424_s18  ;;  %v1577_v17 = vrot.slane %v1571_v18, 4 }
 0x2e6   : > { %v1611_v25 = vpop.permute.xlu0 %1610 }
 0x2e7   : > { %v1618_v9 = vrot.slane %v1611_v25, 4 }
 0x2e8   : > { %v1457_v5 = vpop.permute.xlu1 %1456 }
 0x2e9   : > { %v1622_v51 = vsel %vm9437_vm10, %v1618_v9, %v1619_v45  ;;  %v1579_v9 = vrot.slane %v1575_v6, 4 }
 0x2ea   : > { %v7957_v28 = vpop.permute.xlu0 %1454  ;;  %v1623_v10 = vsel %vm9436_vm11, %v1611_v25, %v1622_v51  ;;  %v1529_v25 = vrot.slane %v1523_v57, 4  ;;  %v1531_v51 = vrot.slane %v1527_v22, 4 }
 0x2eb   : > { %v1462_v6 = vrot.slane %v7957_v28, 4 }
 0x2ec   : > { %v7959_v62 = vpop.permute.xlu1 %1408 }
 0x2ee   : > { %v7961_v14 = vpop.permute.xlu0 %1406 }
 0x2f0   : > { %v7963_v43 = vpop.permute.xlu1 %1360 }
 0x2f2   : > { %v1569_v63 = vpop.permute.xlu0 %1568 }
 0x2f3   : > { %v1576_v16 = vrot.slane %v1569_v63, 4 }
 0x2f4   : > { %v7965_v48 = vpop.permute.xlu1 %1364 }
 0x2f6   : > { %v1521_v8 = vpop.permute.xlu0 %1520 }
 0x2f7   : > { %v1528_v23 = vrot.slane %v1521_v8, 4 }
 0x2f8   : > { %v7971_v13 = vpop.permute.xlu1 %1318 }
 0x2f9   : > { %v1325_v61 = vrot.slane %v7971_v13, 4 }
 0x2fa   : > { %v1615_v49 = vpop.permute.xlu0 %1614 }
 0x2fb   : > { %v1620_v54 = vrot.slane %v1615_v49, 4 }
 0x2fc   : > { %v1461_v60 = vpop.permute.xlu1 %1460 }
 0x2fd   : > { %v1624_v4 = vsel %vm9437_vm10, %v1620_v54, %v1621_v7  ;;  %v1580_v7 = vsel %vm9437_vm10, %v1576_v16, %v1577_v17  ;;  %v1465_v16 = vrot.slane %v1461_v60, 4  ;;  %v1463_v17 = vrot.slane %v1457_v5, 4 }
 0x2fe   : > { %v1625_v41 = vsel %vm9436_vm11, %v1615_v49, %v1624_v4  ;;  %v1459_v58 = vpop.permute.xlu0 %1458  ;;  %v1581_v4 = vsel %vm9435_vm4, %v1569_v63, %v1580_v7 }
 0x2ff   : > { %v6541_v38 = vcombine.low %v1623_v10, %v1625_v41  ;;  %v6542_v12 = vcombine.high %v1623_v10, %v1625_v41  ;;  %v1532_v10 = vsel %vm9437_vm10, %v1528_v23, %v1529_v25  ;;  %v1466_v25 = vsel %vm9437_vm10, %v1462_v6, %v1463_v17 }
 0x300   : > { %v1413_v19 = vpop.permute.xlu1 %1412  ;;  %v1533_v22 = vsel %vm9434_vm3, %v1521_v8, %v1532_v10  ;;  %v1415_v8 = vrot.slane %v7959_v62, 4  ;;  %v1467_v10 = vsel %vm9433_vm6, %v7957_v28, %v1466_v25 }
 0x301   : > { %1798 = vmatprep.subr.bf16.mxu0 %v6542_v12  ;;  %v1464_v12 = vrot.slane %v1459_v58, 4  ;;  %v1417_v60 = vrot.slane %v1413_v19, 4 }
 0x302   : > { %1799 = vmatpush1.bf16.msra.mxu0 %v6541_v38  ;;  %v1411_v15 = vpop.permute.xlu0 %1410 }
 0x306   : > { %v1573_v45 = vpop.permute.xlu0 %1572 }
 0x307   : > { %v1578_v54 = vrot.slane %v1573_v45, 4 }
 0x309   : > { %v1582_v49 = vsel %vm9437_vm10, %v1578_v54, %v1579_v9  ;;  %v1416_v9 = vrot.slane %v1411_v15, 4 }
 0x30a   : > { %v1583_v41 = vsel %vm9435_vm4, %v1573_v45, %v1582_v49  ;;  %v1525_v38 = vpop.permute.xlu0 %1524  ;;  %v1468_v45 = vsel %vm9437_vm10, %v1464_v12, %v1465_v16  ;;  %v1414_v49 = vrot.slane %v7961_v14, 4 }
 0x30b   : > { %v6539_v18 = vcombine.low %v1581_v4, %v1583_v41  ;;  %v1530_v0 = vrot.slane %v1525_v38, 4  ;;  %v6540_v1 = vcombine.high %v1581_v4, %v1583_v41  ;;  %v1369_v41 = vrot.slane %v7965_v48, 4 }
 0x30c   : > { %v1418_v19 = vsel %vm9437_vm10, %v1414_v49, %v1415_v8 }
 0x30d   : > { %v1534_v57 = vsel %vm9437_vm10, %v1530_v0, %v1531_v51  ;;  %1800 = vmatprep.subr.bf16.mxu0 %v6540_v1  ;;  %v1469_v0 = vsel %vm9433_vm6, %v1459_v58, %v1468_v45  ;;  %v1661_v1 = vpop.permute.xlu1 %1660  ;;  %v1420_v51 = vsel %vm9437_vm10, %v1416_v9, %v1417_v60  ;;  %v1419_v50 = vsel %vm9432_vm5, %v7961_v14, %v1418_v19 }
 0x30e   : > { %v1535_v63 = vsel %vm9434_vm3, %v1525_v38, %v1534_v57  ;;  %1801 = vmatpush1.bf16.msra.mxu0 %v6539_v18  ;;  %v1359_v23 = vpop.permute.xlu0 %1358  ;;  %v6534_v38 = vcombine.high %v1467_v10, %v1469_v0  ;;  %v1421_v12 = vsel %vm9432_vm5, %v1411_v15, %v1420_v51  ;;  %v1367_v18 = vrot.slane %v7963_v43, 4 }
 0x30f   : > { %v6537_v7 = vcombine.low %v1533_v22, %v1535_v63  ;;  %v6538_v54 = vcombine.high %v1533_v22, %v1535_v63  ;;  %v1366_v58 = vrot.slane %v1359_v23, 4  ;;  %v6532_v16 = vcombine.high %v1419_v50, %v1421_v12 }
 0x310   : > { %v6531_v43 = vcombine.low %v1419_v50, %v1421_v12  ;;  %v1667_v49 = vrot.slane %v1661_v1, 4  ;;  %v7345_v1 = vld [vmem:[%s9404_s4] ss:$8 sps:$4 sm:$0xff]  }
 0x311   : > { %1802 = vmatprep.subr.bf16.mxu0 %v6538_v54  ;;  %v1323_v28 = vpop.permute.xlu1 %1322  ;;  %v1370_v48 = vsel %vm9437_vm10, %v1366_v58, %v1367_v18 }
 0x312   : > { %1803 = vmatpush1.bf16.msra.mxu0 %v6537_v7  ;;  %v1363_v5 = vpop.permute.xlu0 %1362  ;;  %v1327_v55 = vrot.slane %v1323_v28, 4  ;;  %v1371_v17 = vsel %vm9438_vm9, %v1359_v23, %v1370_v48 }
 0x313   : > { %v1368_v4 = vrot.slane %v1363_v5, 4  ;;  %1804 = vmatprep.subr.bf16.mxu0 %v7224_v59  ;;  %v6533_v59 = vcombine.low %v1467_v10, %v1469_v0 }
 0x315   : > { %v1372_v37 = vsel %vm9437_vm10, %v1368_v4, %v1369_v41  ;;  %v1665_v54 = vpop.permute.xlu1 %1664 }
 0x316   : > { %1805 = vmatpush1.bf16.msra.mxu0 %v7223_v3  ;;  %v1317_v62 = vpop.permute.xlu0 %1316  ;;  %v1373_v15 = vsel %vm9438_vm9, %v1363_v5, %v1372_v37  ;;  %v1669_v23 = vrot.slane %v1665_v54, 4 }
 0x317   : > { %1806 = vmatprep.subr.bf16.mxu0 %v6534_v38  ;;  %v1324_v6 = vrot.slane %v1317_v62, 4  ;;  %v6530_v63 = vcombine.high %v1371_v17, %v1373_v15  ;;  %v6529_v25 = vcombine.low %v1371_v17, %v1373_v15  ;;  %v630_v15 = vld [vmem:[%s9405_s5] sm:$0x3] }
 0x319   : > { %v1328_v14 = vsel %vm9437_vm10, %v1324_v6, %v1325_v61 }
 0x31a   : > { %v1321_v57 = vpop.permute.xlu0 %1320  ;;  %1807 = vmatpush1.bf16.msra.mxu0 %v6533_v59  ;;  %v1329_v13 = vsel %vm9431_vm8, %v1317_v62, %v1328_v14  ;;  %v7346_v14 = vld [vmem:[%s9406_s6] sm:$0xff]  }
 0x31b   : > { %v1326_v3 = vrot.slane %v1321_v57, 4  ;;  %1808 = vmatprep.subr.bf16.mxu0 %v6532_v16 }
 0x31d   : > { %v1330_v22 = vsel %vm9437_vm10, %v1326_v3, %v1327_v55 }
 0x31e   : > { %v1331_v45 = vsel %vm9431_vm8, %v1321_v57, %v1330_v22  ;;  %v1659_v9 = vpop.permute.xlu0 %1658  ;;  %1809 = vmatpush1.bf16.msra.mxu0 %v6531_v43 }
 0x31f   : > { %v1666_v7 = vrot.slane %v1659_v9, 4  ;;  %1810 = vmatprep.subr.bf16.mxu0 %v6530_v63  ;;  %v6528_v60 = vcombine.high %v1329_v13, %v1331_v45  ;;  %v6527_v51 = vcombine.low %v1329_v13, %v1331_v45 }
 0x321   : > { %v1670_v5 = vsel %vm9437_vm10, %v1666_v7, %v1667_v49 }
 0x322   : > { %v1663_v0 = vpop.permute.xlu0 %1662  ;;  %1811 = vmatpush1.bf16.msra.mxu0 %v6529_v25  ;;  %v1671_v10 = vsel %vm9430_vm7, %v1659_v9, %v1670_v5 }
 0x323   : > { %v1668_v8 = vrot.slane %v1663_v0, 4  ;;  %1812 = vmatprep.subr.bf16.mxu0 %v6528_v60 }
 0x325   : > { %v1672_v4 = vsel %vm9437_vm10, %v1668_v8, %v1669_v23 }
 0x326   : > { %v1673_v19 = vsel %vm9430_vm7, %v1663_v0, %v1672_v4  ;;  %1813 = vmatpush1.bf16.msra.mxu0 %v6527_v51  ;;  %v9444_v4 = vmov 0.0|0.0  }
 0x327   : > { %v6543_v41 = vcombine.low %v1671_v10, %v1673_v19  ;;  %v6544_v58 = vcombine.high %v1671_v10, %v1673_v19 }
 0x329   : > { %1828 = vmatprep.subr.bf16.mxu0 %v6544_v58 }
 0x32a   : > { %1829 = vmatpush2.bf16.msra.mxu0 %v6543_v41 }
 0x32b   : > { %7259 = vmatprep.subr.bf16.mxu0 %v9422_v26 }
 0x32d   : > { %1831 = vmatmul.mubr.bf16.vlgmr.msra.gmra.mxu0 %v7345_v1 }
 0x32e   : > { %7261 = vmatprep.mubr.msk.bf16.mxu0 %vm9428_vm0, %v9422_v26 }
 0x3ed   : > { %v1832_v38 = vpop.f32.mrf.mxu0 }
 0x3ef   : > { %v1834_v12 = vpop.f32.mrf.mxu0 }
 0x3f0   : > { %v1841_v62 = vadd.f32 %v1834_v12, %v1832_v38 }
 0x3f1   : > { %v8019_v18 = vpop.f32.mrf.mxu0 }
 0x3f2   : > { %1842 = vadd.xlane.f32.xlu0 %v1841_v62 }
 0x3f3   : > { %v8021_v37 = vpop.f32.mrf.mxu0 }
 0x3f4   : > { %v1844_v50 = vadd.f32 %v8021_v37, %v8019_v18 }
 0x3f6   : > { %1845 = vadd.xlane.f32.xlu1 %v1844_v50 }
 0x47b   : > { %v1843_v59 = vpop.xlane.xlu0 %1842 }
 0x47c   : > { %v1847_v48 = vmul.f32 0.00390625, %v1843_v59 }
 0x47f   : > { %v1846_v28 = vpop.xlane.xlu1 %1845 }
 0x480   : > { %v1848_v6 = vmul.f32 0.00390625, %v1846_v28 }
 0x482   : > { %v1849_v16 = vpack.c.bf16 %v1848_v6, %v1847_v48 }
 0x484   : > { %7254 = vmatpush3.bf16.msra.mxu1 %v1849_v16 }
 0x487   : > { %7256 = vmatmul.mubr.msk.bf16.vlgmr.msra.gmra.mxu1 %vm9438_vm9, %v630_v15 }
 0x547   : > { %v1887_v57 = vpop.f32.mrf.mxu1 }
 0x548   : > { %v1893_v61 = vmax.f32 %v1887_v57, 0.0 }
 0x549   : > { %v7257_v55 = vpop.f32.mrf.mxu1 }
 0x54a   : > { %v1894_v3 = vpack.c.bf16 %v1893_v61, %v1893_v61 }
 0x54b   : > { %v1890_v43 = vpop.f32.mrf.mxu1 }
 0x54c   : > { %v1905_v17 = vsel %vm9427_vm1, %v1894_v3, 0 }
 0x54d   : > { %v7258_v22 = vpop.f32.mrf.mxu1  ;;  %7260 = vmatpush3.bf16.msra.mxu0 %v1905_v17 }
 0x550   : > { %7262 = vmatmul.mubr.msk.bf16.vlgmr.msra.gmra.mxu0 %vm9426_vm2, %v7346_v14 }
 0x610   : > { %v1941_v63 = vpop.f32.mrf.mxu0 }
 0x611   : > { %v1948_v45 = vsub.f32 0.0, %v1941_v63 }
 0x612   : > { %v7263_v9 = vpop.f32.mrf.mxu0 }
 0x613   : > { %v1950_v7 = vmul.f32 1.442695, %v1948_v45 }
 0x614   : > { %v1944_v54 = vpop.f32.mrf.mxu0 }
 0x615   : > { %7378 = vpow2.f32 %v1950_v7  ;;  %v1949_v25 = vsub.f32 0.0, %v1944_v54 }
 0x616   : > { %v7264_v13 = vpop.f32.mrf.mxu0 }
 0x617   : > { %v1952_v49 = vmul.f32 1.442695, %v1949_v25 }
 0x619   : > { %7380 = vpow2.f32 %v1952_v49 }
 0x622   : > { %v7379_v60 = vpop.eup %7378 }
 0x623   : > { %v1954_v0 = vadd.f32 1.0, %v7379_v60 }
 0x625   : > { %7382 = vrcp.f32 %v1954_v0 }
 0x626   : > { %v7381_v23 = vpop.eup %7380 }
 0x627   : > { %v1955_v5 = vadd.f32 1.0, %v7381_v23 }
 0x629   : > { %7384 = vrcp.f32 %v1955_v5 }
 0x632   : > { %v7383_v8 = vpop.eup %7382 }
 0x633   : > { %1960 = vperm.xlu0 %7337, %v7383_v8  }
 0x636   : > { %v7385_v51 = vpop.eup %7384 }
 0x637   : > { %1965 = vperm.xlu1 %7338, %v7385_v51  }
 0x63b   : > { %2315 = vrot.lane.b32.xlu1 %v9444_v4, %s7460_s20 }
 0x63f   : > { %2319 = vrot.lane.b32.xlu1 %v9444_v4, %s7460_s20 }
 0x643   : > { %2273 = vrot.lane.b32.xlu1 %v7617_v24, %s7456_s17 }
 0x647   : > { %2277 = vrot.lane.b32.xlu1 %v7617_v24, %s7456_s17 }
 0x64b   : > { %2225 = vrot.lane.b32.xlu1 %v7621_v27, %s7455_s0 }
 0x64f   : > { %2229 = vrot.lane.b32.xlu1 %v7621_v27, %s7455_s0 }
 0x6ae   : > { %v1961_v10 = vpop.permute.xlu0 %1960 }
 0x6af   : > { %v1968_v19 = vmul.f32 %v1961_v10, %v1832_v38  ;;  %v1969_v41 = vmul.f32 %v1961_v10, %v1834_v12 }
 0x6b1   : > { %v8051_v58 = vadd.f32 %v1968_v19, %v7631_v30  ;;  %v8054_v1 = vadd.f32 %v1969_v41, %v7637_v32 }
 0x6b2   : > { %v1966_v32 = vpop.permute.xlu1 %1965 }
 0x6b3   : > { %v7021_v62 = vpack.c.bf16 %v8051_v58, %v9422_v26  ;;  %v7033_v50 = vpack.c.bf16 %v8054_v1, %v8051_v58  ;;  %v2201_v59 = vmul.f32 %v8051_v58, %v7615_v21  ;;  %v2202_v28 = vmul.f32 %v8054_v1, %v7680_v52 }
 0x6b4   : > { %v2249_v38 = vmul.f32 %v8051_v58, %v7613_v20  ;;  %v2250_v30 = vmul.f32 %v8054_v1, %v7665_v46  ;;  %v2136_v6 = vmul.f32 %v8051_v58, %v7635_v31  ;;  %v2137_v16 = vmul.f32 %v8054_v1, %v7629_v29 }
 0x6b5   : > { %2061 = vrot.lane.b32.xlu0 %v7021_v62, %s7461_s23  ;;  %2313 = vrot.lane.b32.xlu1 %v7033_v50, %s7460_s20  ;;  %v7035_v12 = vpack.c.bf16 %v2202_v28, %v2201_v59  ;;  %v1970_v15 = vmul.f32 %v1966_v32, %v8019_v18  ;;  %v1971_v57 = vmul.f32 %v1966_v32, %v8021_v37 }
 0x6b6   : > { %v7039_v48 = vpack.c.bf16 %v2250_v30, %v2249_v38  ;;  %v7029_v61 = vpack.c.bf16 %v2136_v6, %v7639_v33  ;;  %v7030_v55 = vpack.c.bf16 %v2137_v16, %v2137_v16  ;;  %v2088_v3 = vmul.f32 %v8051_v58, %v7651_v39 }
 0x6b7   : > { %v2089_v43 = vmul.f32 %v8054_v1, %v7641_v35  ;;  %v8086_v17 = vadd.f32 %v1970_v15, %v7667_v47  ;;  %v8089_v18 = vadd.f32 %v1971_v57, %v7682_v53  ;;  %v7022_v45 = vpack.c.bf16 %v8054_v1, %v8054_v1  ;;  %v7347_v15 = vld [vmem:[%s9403_s3 + $0x14] ss:$8 sps:$4 sm:$0xff]  }
 0x6b8   : > { %v7025_v37 = vpack.c.bf16 %v2088_v3, %v7656_v42  ;;  %v1999_v49 = vmul.f32 %v8054_v1, %v7687_v56  ;;  %v1998_v60 = vmul.f32 %v8051_v58, %v7739_v34  ;;  %v2339_v59 = vmul.f32 %v8051_v58, %v7750_v40  ;;  %6610 = vmatprep.mubr.msk.bf16.mxu1 %vm9438_vm9, %v7347_v15 }
 0x6b9   : > { %2223 = vrot.lane.b32.xlu0 %v7035_v12, %s7455_s0  ;;  %2271 = vrot.lane.b32.xlu1 %v7039_v48, %s7456_s17  ;;  %v7026_v14 = vpack.c.bf16 %v2089_v43, %v2089_v43  ;;  %v7034_v22 = vpack.c.bf16 %v8089_v18, %v8086_v17  ;;  %v7023_v63 = vpack.c.bf16 %v8086_v17, %v9422_v26 }
 0x6ba   : > { %v2252_v47 = vmul.f32 %v8086_v17, %v7613_v20  ;;  %v2253_v53 = vmul.f32 %v8089_v18, %v7665_v46  ;;  %v2204_v7 = vmul.f32 %v8086_v17, %v7615_v21  ;;  %v2205_v54 = vmul.f32 %v8089_v18, %v7680_v52 }
 0x6bb   : > { %v7024_v25 = vpack.c.bf16 %v8089_v18, %v8089_v18  ;;  %v7018_v0 = vpack.c.bf16 %v1999_v49, %v1999_v49  ;;  %v7017_v23 = vpack.c.bf16 %v1998_v60, %v7742_v36  ;;  %v2140_v5 = vmul.f32 %v8089_v18, %v7629_v29 }
 0x6bc   : > { %v7041_v9 = vpack.c.bf16 %v2253_v53, %v2252_v47  ;;  %v7037_v13 = vpack.c.bf16 %v2205_v54, %v2204_v7  ;;  %v2139_v8 = vmul.f32 %v8086_v17, %v7635_v31  ;;  %v2092_v19 = vmul.f32 %v8089_v18, %v7641_v35 }
 0x6bd   : > { %2157 = vrot.lane.b32.xlu0 %v7029_v61, %s7454_s30  ;;  %2159 = vrot.lane.b32.xlu1 %v7030_v55, %s7454_s30  ;;  %v7032_v51 = vpack.c.bf16 %v2140_v5, %v2140_v5  ;;  %v2091_v41 = vmul.f32 %v8086_v17, %v7651_v39  ;;  %v2340_v28 = vmul.f32 %v8054_v1, %v7760_v44  ;;  %v2316_v61 = vpop.permute.xlu1 %2315 }
 0x6be   : > { %v7031_v10 = vpack.c.bf16 %v2139_v8, %v7639_v33  ;;  %v7028_v62 = vpack.c.bf16 %v2092_v19, %v2092_v19  ;;  %v2002_v30 = vmul.f32 %v8089_v18, %v7687_v56  ;;  %v2001_v32 = vmul.f32 %v8086_v17, %v7739_v34 }
 0x6bf   : > { %v7027_v50 = vpack.c.bf16 %v2091_v41, %v7656_v42  ;;  %v7047_v38 = vpack.c.bf16 %v2340_v28, %v2339_v59  ;;  %v2342_v6 = vmul.f32 %v8086_v17, %v7750_v40  ;;  %v2343_v16 = vmul.f32 %v8089_v18, %v7760_v44 }
 0x6c0   : > { %v7020_v12 = vpack.c.bf16 %v2002_v30, %v2002_v30  ;;  %v7019_v48 = vpack.c.bf16 %v2001_v32, %v7742_v36 }
 0x6c1   : > { %2109 = vrot.lane.b32.xlu0 %v7025_v37, %s7453_s29  ;;  %2111 = vrot.lane.b32.xlu1 %v7026_v14, %s7453_s29  ;;  %v7049_v57 = vpack.c.bf16 %v2343_v16, %v2342_v6  ;;  %v2320_v55 = vpop.permute.xlu1 %2319 }
 0x6c5   : > { %2317 = vrot.lane.b32.xlu1 %v7034_v22, %s7460_s20  ;;  %2065 = vrot.lane.b32.xlu0 %v7023_v63, %s7461_s23  ;;  %v2274_v3 = vpop.permute.xlu1 %2273 }
 0x6c9   : > { %2063 = vrot.lane.b32.xlu1 %v7022_v45, %s7461_s23  ;;  %2275 = vrot.lane.b32.xlu0 %v7041_v9, %s7456_s17  ;;  %v2278_v43 = vpop.permute.xlu1 %2277 }
 0x6ca   : > { %v2282_v19 = vrot.slane %v2278_v43, 4 }
 0x6cd   : > { %2067 = vrot.lane.b32.xlu1 %v7024_v25, %s7461_s23  ;;  %2227 = vrot.lane.b32.xlu0 %v7037_v13, %s7455_s0  ;;  %v2226_v37 = vpop.permute.xlu1 %2225  ;;  %v2322_v13 = vrot.slane %v2316_v61, 4 }
 0x6d1   : > { %2021 = vrot.lane.b32.xlu1 %v7018_v0, %s7458_s19  ;;  %2019 = vrot.lane.b32.xlu0 %v7017_v23, %s7458_s19  ;;  %v2230_v14 = vpop.permute.xlu1 %2229  ;;  %v2324_v0 = vrot.slane %v2320_v55, 4 }
 0x6d2   : > { %v2234_v16 = vrot.slane %v2230_v14, 4 }
 0x6d5   : > { %2163 = vrot.lane.b32.xlu1 %v7032_v51, %s7454_s30  ;;  %2161 = vrot.lane.b32.xlu0 %v7031_v10, %s7454_s30  ;;  %v2280_v51 = vrot.slane %v2274_v3, 4 }
 0x6d9   : > { %2115 = vrot.lane.b32.xlu1 %v7028_v62, %s7453_s29  ;;  %2113 = vrot.lane.b32.xlu0 %v7027_v50, %s7453_s29 }
 0x6dd   : > { %2363 = vrot.lane.b32.xlu1 %v7713_v11, %s9424_s18  ;;  %2361 = vrot.lane.b32.xlu0 %v7047_v38, %s9424_s18 }
 0x6e1   : > { %2025 = vrot.lane.b32.xlu1 %v7020_v12, %s7458_s19  ;;  %2023 = vrot.lane.b32.xlu0 %v7019_v48, %s7458_s19  ;;  %v2232_v48 = vrot.slane %v2226_v37, 4 }
 0x6e5   : > { %2367 = vrot.lane.b32.xlu1 %v7713_v11, %s9424_s18  ;;  %2365 = vrot.lane.b32.xlu0 %v7049_v57, %s9424_s18 }
 0x6e9   : > { %2884 = vrot.lane.b32.xlu1 %v9444_v4, %s7460_s20 }
 0x6ed   : > { %2888 = vrot.lane.b32.xlu1 %v9444_v4, %s7460_s20 }
 0x6f1   : > { %2842 = vrot.lane.b32.xlu1 %v7617_v24, %s7456_s17 }
 0x6f5   : > { %2846 = vrot.lane.b32.xlu1 %v7617_v24, %s7456_s17 }
 0x6f9   : > { %2794 = vrot.lane.b32.xlu1 %v7621_v27, %s7455_s0 }
 0x6fd   : > { %2798 = vrot.lane.b32.xlu1 %v7621_v27, %s7455_s0 }
 0x727   : > { %v8174_v22 = vpop.permute.xlu0 %2061  ;;  %v2314_v63 = vpop.permute.xlu1 %2313 }
 0x728   : > { %v2321_v25 = vrot.slane %v2314_v63, 4 }
 0x72a   : > { %v2325_v23 = vsel %vm9437_vm10, %v2321_v25, %v2322_v13 }
 0x72b   : > { %v2224_v47 = vpop.permute.xlu0 %2223  ;;  %v2272_v53 = vpop.permute.xlu1 %2271  ;;  %v2326_v41 = vsel %vm9436_vm11, %v2314_v63, %v2325_v23 }
 0x72c   : > { %v2279_v5 = vrot.slane %v2272_v53, 4  ;;  %v2231_v62 = vrot.slane %v2224_v47, 4 }
 0x72e   : > { %v2283_v38 = vsel %vm9437_vm10, %v2279_v5, %v2280_v51  ;;  %v2235_v3 = vsel %vm9437_vm10, %v2231_v62, %v2232_v48  ;;  %v7226_v51 = vpack.c.bf16 %v8089_v18, %v8054_v1 }
 0x72f   : > { %v8176_v45 = vpop.permute.xlu0 %2157  ;;  %v2160_v9 = vpop.permute.xlu1 %2159  ;;  %v2284_v15 = vsel %vm9435_vm4, %v2272_v53, %v2283_v38  ;;  %v2236_v37 = vsel %vm9434_vm3, %v2224_v47, %v2235_v3 }
 0x730   : > { %v2166_v23 = vrot.slane %v2160_v9, 4 }
 0x733   : > { %v8178_v7 = vpop.permute.xlu0 %2109  ;;  %v8180_v54 = vpop.permute.xlu1 %2111 }
 0x737   : > { %v8182_v49 = vpop.permute.xlu0 %2065  ;;  %v2318_v60 = vpop.permute.xlu1 %2317 }
 0x738   : > { %v2323_v8 = vrot.slane %v2318_v60, 4  ;;  %v2071_v9 = vrot.slane %v8182_v49, 4 }
 0x73a   : > { %v2327_v10 = vsel %vm9437_vm10, %v2323_v8, %v2324_v0  ;;  %v2165_v0 = vrot.slane %v8176_v45, 4 }
 0x73b   : > { %v2328_v50 = vsel %vm9436_vm11, %v2318_v60, %v2327_v10  ;;  %v2276_v59 = vpop.permute.xlu0 %2275  ;;  %v2064_v28 = vpop.permute.xlu1 %2063  ;;  %v2117_v10 = vrot.slane %v8178_v7, 4 }
 0x73c   : > { %v6606_v30 = vcombine.low %v2326_v41, %v2328_v50  ;;  %v2281_v32 = vrot.slane %v2276_v59, 4  ;;  %v6607_v12 = vcombine.high %v2326_v41, %v2328_v50  ;;  %v2169_v50 = vsel %vm9437_vm10, %v2165_v0, %v2166_v23 }
 0x73e   : > { %v2285_v6 = vsel %vm9437_vm10, %v2281_v32, %v2282_v19  ;;  %2501 = vmatprep.subr.bf16.mxu1 %v6607_v12  ;;  %v2118_v19 = vrot.slane %v8180_v54, 4  ;;  %v2069_v32 = vrot.slane %v8174_v22, 4  ;;  %v2070_v12 = vrot.slane %v2064_v28, 4 }
 0x73f   : > { %v2286_v57 = vsel %vm9435_vm4, %v2276_v59, %v2285_v6  ;;  %v2228_v61 = vpop.permute.xlu0 %2227  ;;  %2502 = vmatpush1.bf16.msra.mxu1 %v6606_v30  ;;  %v2068_v55 = vpop.permute.xlu1 %2067  ;;  %v7225_v30 = vpack.c.bf16 %v8086_v17, %v8051_v58 }
 0x740   : > { %v6604_v43 = vcombine.low %v2284_v15, %v2286_v57  ;;  %v2233_v63 = vrot.slane %v2228_v61, 4  ;;  %v6605_v25 = vcombine.high %v2284_v15, %v2286_v57  ;;  %v2072_v47 = vrot.slane %v2068_v55, 4 }
 0x741   : > { %v2121_v54 = vsel %vm9437_vm10, %v2117_v10, %v2118_v19  ;;  %v2170_v57 = vsel %vm9433_vm6, %v8176_v45, %v2169_v50  ;;  %v2073_v28 = vsel %vm9437_vm10, %v2069_v32, %v2070_v12 }
 0x742   : > { %v2237_v13 = vsel %vm9437_vm10, %v2233_v63, %v2234_v16  ;;  %2503 = vmatprep.subr.bf16.mxu1 %v6605_v25  ;;  %v2075_v6 = vsel %vm9437_vm10, %v2071_v9, %v2072_v47  ;;  %v2074_v10 = vsel %vm9438_vm9, %v8174_v22, %v2073_v28 }
 0x743   : > { %v2238_v60 = vsel %vm9434_vm3, %v2228_v61, %v2237_v13  ;;  %v8196_v14 = vpop.permute.xlu0 %2019  ;;  %2504 = vmatpush1.bf16.msra.mxu1 %v6604_v43  ;;  %v2022_v53 = vpop.permute.xlu1 %2021  ;;  %v2076_v45 = vsel %vm9438_vm9, %v8182_v49, %v2075_v6 }
 0x744   : > { %v6602_v5 = vcombine.low %v2236_v37, %v2238_v60  ;;  %v6603_v8 = vcombine.high %v2236_v37, %v2238_v60  ;;  %v2122_v60 = vsel %vm9432_vm5, %v8178_v7, %v2121_v54  ;;  %v2027_v23 = vrot.slane %v8196_v14, 4 }
 0x745   : > { %v6595_v19 = vcombine.high %v2074_v10, %v2076_v45  ;;  %v6594_v49 = vcombine.low %v2074_v10, %v2076_v45 }
 0x746   : > { %2505 = vmatprep.subr.bf16.mxu1 %v6603_v8 }
 0x747   : > { %v2162_v41 = vpop.permute.xlu0 %2161  ;;  %2506 = vmatpush1.bf16.msra.mxu1 %v6602_v5  ;;  %v2164_v62 = vpop.permute.xlu1 %2163  ;;  %v2028_v5 = vrot.slane %v2022_v53, 4 }
 0x748   : > { %v2167_v59 = vrot.slane %v2162_v41, 4  ;;  %v2168_v38 = vrot.slane %v2164_v62, 4  ;;  %2507 = vmatprep.subr.bf16.mxu1 %v7226_v51 }
 0x749   : > { %v2031_v50 = vsel %vm9437_vm10, %v2027_v23, %v2028_v5 }
 0x74a   : > { %v2171_v48 = vsel %vm9437_vm10, %v2167_v59, %v2168_v38  ;;  %v2032_v32 = vsel %vm9431_vm8, %v8196_v14, %v2031_v50  ;;  %v7349_v14 = vld [vmem:[%s9403_s3 + $0x10] ss:$8 sps:$4 sm:$0xff]  }
 0x74b   : > { %v2114_v16 = vpop.permute.xlu0 %2113  ;;  %2508 = vmatpush1.bf16.msra.mxu1 %v7225_v30  ;;  %v2116_v15 = vpop.permute.xlu1 %2115  ;;  %v2172_v61 = vsel %vm9433_vm6, %v2162_v41, %v2171_v48 }
 0x74c   : > { %v2119_v55 = vrot.slane %v2114_v16, 4  ;;  %v2120_v3 = vrot.slane %v2116_v15, 4  ;;  %v6598_v43 = vcombine.low %v2170_v57, %v2172_v61  ;;  %v6599_v63 = vcombine.high %v2170_v57, %v2172_v61 }
 0x74e   : > { %v2123_v25 = vsel %vm9437_vm10, %v2119_v55, %v2120_v3  ;;  %2509 = vmatprep.subr.bf16.mxu1 %v6599_v63 }
 0x74f   : > { %v2362_v13 = vpop.permute.xlu0 %2361  ;;  %2510 = vmatpush1.bf16.msra.mxu1 %v6598_v43  ;;  %v2364_v37 = vpop.permute.xlu1 %2363  ;;  %v2124_v0 = vsel %vm9432_vm5, %v2114_v16, %v2123_v25 }
 0x750   : > { %v6596_v8 = vcombine.low %v2122_v60, %v2124_v0  ;;  %v6597_v51 = vcombine.high %v2122_v60, %v2124_v0  ;;  %v2369_v47 = vrot.slane %v2362_v13, 4  ;;  %v2370_v41 = vrot.slane %v2364_v37, 4 }
 0x752   : > { %2511 = vmatprep.subr.bf16.mxu1 %v6597_v51  ;;  %v2373_v9 = vsel %vm9437_vm10, %v2369_v47, %v2370_v41 }
 0x753   : > { %v2024_v62 = vpop.permute.xlu0 %2023  ;;  %2512 = vmatpush1.bf16.msra.mxu1 %v6596_v8  ;;  %v2026_v7 = vpop.permute.xlu1 %2025  ;;  %v2374_v57 = vsel %vm9430_vm7, %v2362_v13, %v2373_v9 }
 0x754   : > { %v2029_v59 = vrot.slane %v2024_v62, 4  ;;  %v2030_v38 = vrot.slane %v2026_v7, 4  ;;  %2513 = vmatprep.subr.bf16.mxu1 %v6595_v19 }
 0x756   : > { %v2033_v53 = vsel %vm9437_vm10, %v2029_v59, %v2030_v38 }
 0x757   : > { %v2366_v30 = vpop.permute.xlu0 %2365  ;;  %2514 = vmatpush1.bf16.msra.mxu1 %v6594_v49  ;;  %v2368_v22 = vpop.permute.xlu1 %2367  ;;  %v2034_v12 = vsel %vm9431_vm8, %v2024_v62, %v2033_v53 }
 0x758   : > { %v2371_v48 = vrot.slane %v2366_v30, 4  ;;  %v2372_v54 = vrot.slane %v2368_v22, 4  ;;  %v6592_v6 = vcombine.low %v2032_v32, %v2034_v12  ;;  %v6593_v16 = vcombine.high %v2032_v32, %v2034_v12 }
 0x75a   : > { %v2375_v15 = vsel %vm9437_vm10, %v2371_v48, %v2372_v54  ;;  %2515 = vmatprep.subr.bf16.mxu1 %v6593_v16 }
 0x75b   : > { %2516 = vmatpush1.bf16.msra.mxu1 %v6592_v6  ;;  %v2376_v61 = vsel %vm9430_vm7, %v2366_v30, %v2375_v15 }
 0x75c   : > { %v6608_v55 = vcombine.low %v2374_v57, %v2376_v61  ;;  %v6609_v3 = vcombine.high %v2374_v57, %v2376_v61 }
 0x75e   : > { %2531 = vmatprep.subr.bf16.mxu1 %v6609_v3 }
 0x75f   : > { %2532 = vmatpush2.bf16.msra.mxu1 %v6608_v55 }
 0x760   : > { %7265 = vmatprep.subr.bf16.mxu1 %v9422_v26 }
 0x762   : > { %2534 = vmatmul.mubr.bf16.vlgmr.msra.gmra.mxu1 %v7349_v14 }
 0x763   : > { %7267 = vmatprep.mubr.msk.bf16.mxu1 %vm9428_vm0, %v9422_v26 }
 0x822   : > { %v2535_v43 = vpop.f32.mrf.mxu1 }
 0x823   : > { %vm2544_vm12 = vcmp.ge.f32.partialorder %v2535_v43, 0.0  ;;  %v2548_v63 = vmul.f32 0.25, %v2535_v43 }
 0x824   : > { %v2537_v28 = vpop.f32.mrf.mxu1 }
 0x825   : > { %v8239_v25 = vsel %vm2544_vm12, %v2535_v43, %v2548_v63  ;;  %vm2545_vm13 = vcmp.ge.f32.partialorder %v2537_v28, 0.0  ;;  %v2549_v13 = vmul.f32 0.25, %v2537_v28 }
 0x826   : > { %v2539_v37 = vpop.f32.mrf.mxu1  ;;  %v2705_v23 = vmul.f32 %v8239_v25, %v7635_v31  ;;  %v2657_v41 = vmul.f32 %v8239_v25, %v7651_v39  ;;  %v2818_v53 = vmul.f32 %v8239_v25, %v7613_v20  ;;  %v2770_v48 = vmul.f32 %v8239_v25, %v7615_v21 }
 0x827   : > { %v8241_v60 = vsel %vm2545_vm13, %v2537_v28, %v2549_v13  ;;  %v2550_v10 = vmul.f32 0.25, %v2539_v37  ;;  %vm2546_vm14 = vcmp.ge.f32.partialorder %v2539_v37, 0.0 }
 0x828   : > { %v7067_v0 = vpack.c.bf16 %v8241_v60, %v8239_v25  ;;  %v2706_v45 = vmul.f32 %v8241_v60, %v7629_v29  ;;  %v2541_v5 = vpop.f32.mrf.mxu1  ;;  %v2658_v51 = vmul.f32 %v8241_v60, %v7641_v35  ;;  %v7063_v47 = vpack.c.bf16 %v2705_v23, %v7639_v33 }
 0x829   : > { %v2551_v19 = vmul.f32 0.25, %v2541_v5  ;;  %vm2547_vm15 = vcmp.ge.f32.partialorder %v2541_v5, 0.0  ;;  %v8257_v7 = vsel %vm2546_vm14, %v2539_v37, %v2550_v10  ;;  %v7059_v59 = vpack.c.bf16 %v2657_v41, %v7656_v42 }
 0x82a   : > { %2882 = vrot.lane.b32.xlu0 %v7067_v0, %s7460_s20  ;;  %v7064_v8 = vpack.c.bf16 %v2706_v45, %v2706_v45  ;;  %v7060_v62 = vpack.c.bf16 %v2658_v51, %v2658_v51  ;;  %v2819_v38 = vmul.f32 %v8241_v60, %v7665_v46  ;;  %v7056_v49 = vpack.c.bf16 %v8241_v60, %v8241_v60 }
 0x82b   : > { %v8259_v50 = vsel %vm2547_vm15, %v2541_v5, %v2551_v19  ;;  %v7227_v30 = vpack.c.bf16 %v8257_v7, %v8239_v25  ;;  %v2771_v32 = vmul.f32 %v8241_v60, %v7680_v52  ;;  %v2568_v54 = vmul.f32 %v8241_v60, %v7687_v56 }
 0x82c   : > { %2728 = vrot.lane.b32.xlu1 %v7064_v8, %s7454_s30  ;;  %v7228_v9 = vpack.c.bf16 %v8259_v50, %v8241_v60  ;;  %v7073_v22 = vpack.c.bf16 %v2819_v38, %v2818_v53  ;;  %v7058_v12 = vpack.c.bf16 %v8259_v50, %v8259_v50  ;;  %v2709_v15 = vmul.f32 %v8259_v50, %v7629_v29 }
 0x82d   : > { %v7069_v6 = vpack.c.bf16 %v2771_v32, %v2770_v48  ;;  %v7052_v16 = vpack.c.bf16 %v2568_v54, %v2568_v54  ;;  %v7068_v57 = vpack.c.bf16 %v8259_v50, %v8257_v7  ;;  %v2708_v61 = vmul.f32 %v8257_v7, %v7635_v31  ;;  %v7350_v32 = vld [vmem:[%s9404_s4 + $0x14] ss:$8 sps:$4 sm:$0xff]   ;;  %v2885_v54 = vpop.permute.xlu1 %2884 }
 0x82e   : > { %2726 = vrot.lane.b32.xlu0 %v7063_v47, %s7454_s30  ;;  %v7066_v55 = vpack.c.bf16 %v2709_v15, %v2709_v15  ;;  %v2661_v3 = vmul.f32 %v8259_v50, %v7641_v35  ;;  %v2660_v43 = vmul.f32 %v8257_v7, %v7651_v39  ;;  %v2822_v13 = vmul.f32 %v8259_v50, %v7665_v46 }
 0x82f   : > { %v7065_v14 = vpack.c.bf16 %v2708_v61, %v7639_v33  ;;  %v2821_v37 = vmul.f32 %v8257_v7, %v7613_v20  ;;  %v2571_v0 = vmul.f32 %v8259_v50, %v7687_v56  ;;  %v2774_v23 = vmul.f32 %v8259_v50, %v7680_v52  ;;  %6665 = vmatprep.mubr.msk.bf16.mxu0 %vm9438_vm9, %v7350_v32 }
 0x830   : > { %2680 = vrot.lane.b32.xlu1 %v7060_v62, %s7453_s29  ;;  %v7062_v63 = vpack.c.bf16 %v2661_v3, %v2661_v3  ;;  %v7061_v28 = vpack.c.bf16 %v2660_v43, %v7656_v42  ;;  %v2773_v8 = vmul.f32 %v8257_v7, %v7615_v21  ;;  %v7055_v10 = vpack.c.bf16 %v8239_v25, %v9422_v26 }
 0x831   : > { %v7075_v45 = vpack.c.bf16 %v2822_v13, %v2821_v37  ;;  %v7054_v5 = vpack.c.bf16 %v2571_v0, %v2571_v0  ;;  %v7057_v19 = vpack.c.bf16 %v8257_v7, %v9422_v26  ;;  %v2567_v47 = vmul.f32 %v8239_v25, %v7739_v34 }
 0x832   : > { %2678 = vrot.lane.b32.xlu0 %v7059_v59, %s7453_s29  ;;  %v7071_v51 = vpack.c.bf16 %v2774_v23, %v2773_v8  ;;  %v2570_v62 = vmul.f32 %v8257_v7, %v7739_v34  ;;  %v2909_v38 = vmul.f32 %v8241_v60, %v7760_v44  ;;  %v2891_v0 = vrot.slane %v2885_v54, 4 }
 0x833   : > { %v7051_v41 = vpack.c.bf16 %v2567_v47, %v7742_v36 }
 0x834   : > { %2632 = vrot.lane.b32.xlu1 %v7056_v49, %s7461_s23  ;;  %v7053_v59 = vpack.c.bf16 %v2570_v62, %v7742_v36  ;;  %v2908_v49 = vmul.f32 %v8239_v25, %v7750_v40 }
 0x836   : > { %2840 = vrot.lane.b32.xlu0 %v7073_v22, %s7456_s17  ;;  %v7081_v53 = vpack.c.bf16 %v2909_v38, %v2908_v49  ;;  %v2912_v22 = vmul.f32 %v8259_v50, %v7760_v44 }
 0x838   : > { %2636 = vrot.lane.b32.xlu1 %v7058_v12, %s7461_s23  ;;  %v2911_v12 = vmul.f32 %v8257_v7, %v7750_v40 }
 0x83a   : > { %2792 = vrot.lane.b32.xlu0 %v7069_v6, %s7455_s0  ;;  %v7083_v48 = vpack.c.bf16 %v2912_v22, %v2911_v12  ;;  %v2889_v6 = vpop.permute.xlu1 %2888 }
 0x83b   : > { %v2893_v8 = vrot.slane %v2889_v6, 4 }
 0x83c   : > { %2590 = vrot.lane.b32.xlu1 %v7052_v16, %s7458_s19 }
 0x83e   : > { %2886 = vrot.lane.b32.xlu0 %v7068_v57, %s7460_s20  ;;  %v2843_v16 = vpop.permute.xlu1 %2842 }
 0x83f   : > { %v2849_v32 = vrot.slane %v2843_v16, 4 }
 0x840   : > { %2732 = vrot.lane.b32.xlu1 %v7066_v55, %s7454_s30 }
 0x842   : > { %2730 = vrot.lane.b32.xlu0 %v7065_v14, %s7454_s30  ;;  %v2847_v15 = vpop.permute.xlu1 %2846 }
 0x843   : > { %v2851_v6 = vrot.slane %v2847_v15, 4 }
 0x844   : > { %2684 = vrot.lane.b32.xlu1 %v7062_v63, %s7453_s29 }
 0x846   : > { %2682 = vrot.lane.b32.xlu0 %v7061_v28, %s7453_s29  ;;  %v2795_v57 = vpop.permute.xlu1 %2794 }
 0x848   : > { %2932 = vrot.lane.b32.xlu1 %v7713_v11, %s9424_s18 }
 0x84a   : > { %2844 = vrot.lane.b32.xlu0 %v7075_v45, %s7456_s17  ;;  %v2799_v61 = vpop.permute.xlu1 %2798 }
 0x84c   : > { %2594 = vrot.lane.b32.xlu1 %v7054_v5, %s7458_s19 }
 0x84e   : > { %2796 = vrot.lane.b32.xlu0 %v7071_v51, %s7455_s0 }
 0x850   : > { %2936 = vrot.lane.b32.xlu1 %v7713_v11, %s9424_s18 }
 0x852   : > { %2630 = vrot.lane.b32.xlu0 %v7055_v10, %s7461_s23 }
 0x856   : > { %2634 = vrot.lane.b32.xlu0 %v7057_v19, %s7461_s23 }
 0x85a   : > { %2588 = vrot.lane.b32.xlu0 %v7051_v41, %s7458_s19 }
 0x85e   : > { %2592 = vrot.lane.b32.xlu0 %v7053_v59, %s7458_s19 }
 0x862   : > { %2930 = vrot.lane.b32.xlu0 %v7081_v53, %s9424_s18 }
 0x866   : > { %2934 = vrot.lane.b32.xlu0 %v7083_v48, %s9424_s18  ;;  %s9447_s18 = smov 111  }
 0x89c   : > { %v2883_v55 = vpop.permute.xlu0 %2882 }
 0x89d   : > { %v2890_v45 = vrot.slane %v2883_v55, 4 }
 0x89e   : > { %v2729_v3 = vpop.permute.xlu1 %2728 }
 0x89f   : > { %v2894_v51 = vsel %vm9437_vm10, %v2890_v45, %v2891_v0 }
 0x8a0   : > { %v8349_v14 = vpop.permute.xlu0 %2726  ;;  %v2895_v47 = vsel %vm9436_vm11, %v2883_v55, %v2894_v51  ;;  %v2801_v55 = vrot.slane %v2795_v57, 4 }
 0x8a1   : > { %v2734_v15 = vrot.slane %v8349_v14, 4 }
 0x8a2   : > { %v8351_v43 = vpop.permute.xlu1 %2680 }
 0x8a4   : > { %v8353_v63 = vpop.permute.xlu0 %2678 }
 0x8a6   : > { %v8355_v13 = vpop.permute.xlu1 %2632 }
 0x8a8   : > { %v2841_v28 = vpop.permute.xlu0 %2840 }
 0x8a9   : > { %v2848_v22 = vrot.slane %v2841_v28, 4 }
 0x8aa   : > { %v8357_v23 = vpop.permute.xlu1 %2636 }
 0x8ab   : > { %v2852_v0 = vsel %vm9437_vm10, %v2848_v22, %v2849_v32  ;;  %v2735_v32 = vrot.slane %v2729_v3, 4 }
 0x8ac   : > { %v2793_v37 = vpop.permute.xlu0 %2792  ;;  %v2853_v51 = vsel %vm9435_vm4, %v2841_v28, %v2852_v0 }
 0x8ad   : > { %v2800_v12 = vrot.slane %v2793_v37, 4 }
 0x8ae   : > { %v8363_v49 = vpop.permute.xlu1 %2590 }
 0x8af   : > { %v2597_v25 = vrot.slane %v8363_v49, 4 }
 0x8b0   : > { %v2887_v5 = vpop.permute.xlu0 %2886 }
 0x8b1   : > { %v2892_v10 = vrot.slane %v2887_v5, 4 }
 0x8b2   : > { %v2733_v48 = vpop.permute.xlu1 %2732 }
 0x8b3   : > { %v2896_v19 = vsel %vm9437_vm10, %v2892_v10, %v2893_v8  ;;  %v2803_v8 = vrot.slane %v2799_v61, 4  ;;  %v2804_v10 = vsel %vm9437_vm10, %v2800_v12, %v2801_v55  ;;  %v2737_v22 = vrot.slane %v2733_v48, 4 }
 0x8b4   : > { %v2897_v41 = vsel %vm9436_vm11, %v2887_v5, %v2896_v19  ;;  %v2731_v62 = vpop.permute.xlu0 %2730  ;;  %v2805_v61 = vsel %vm9434_vm3, %v2793_v37, %v2804_v10  ;;  %v2738_v55 = vsel %vm9437_vm10, %v2734_v15, %v2735_v32 }
 0x8b5   : > { %v6661_v59 = vcombine.low %v2895_v47, %v2897_v41  ;;  %v6662_v38 = vcombine.high %v2895_v47, %v2897_v41  ;;  %v2736_v41 = vrot.slane %v2731_v62, 4 }
 0x8b6   : > { %v2685_v26 = vpop.permute.xlu1 %2684 }
 0x8b7   : > { %3070 = vmatprep.subr.bf16.mxu0 %v6662_v38  ;;  %v2689_v48 = vrot.slane %v2685_v26, 4 }
 0x8b8   : > { %3071 = vmatpush1.bf16.msra.mxu0 %v6661_v59  ;;  %v2683_v53 = vpop.permute.xlu0 %2682 }
 0x8ba   : > { %v2933_v3 = vpop.permute.xlu1 %2932 }
 0x8bc   : > { %v2845_v54 = vpop.permute.xlu0 %2844 }
 0x8bd   : > { %v2850_v45 = vrot.slane %v2845_v54, 4 }
 0x8bf   : > { %v2854_v5 = vsel %vm9437_vm10, %v2850_v45, %v2851_v6  ;;  %v2688_v6 = vrot.slane %v2683_v53, 4 }
 0x8c0   : > { %v2855_v19 = vsel %vm9435_vm4, %v2845_v54, %v2854_v5  ;;  %v2797_v47 = vpop.permute.xlu0 %2796  ;;  %v2740_v54 = vsel %vm9437_vm10, %v2736_v41, %v2737_v22  ;;  %v2686_v5 = vrot.slane %v8353_v63, 4  ;;  %v2641_v41 = vrot.slane %v8357_v23, 4 }
 0x8c1   : > { %v6659_v16 = vcombine.low %v2853_v51, %v2855_v19  ;;  %v2802_v59 = vrot.slane %v2797_v47, 4  ;;  %v6660_v38 = vcombine.high %v2853_v51, %v2855_v19  ;;  %v2687_v51 = vrot.slane %v8351_v43, 4 }
 0x8c2   : > { %v2692_v10 = vsel %vm9437_vm10, %v2688_v6, %v2689_v48 }
 0x8c3   : > { %v2806_v57 = vsel %vm9437_vm10, %v2802_v59, %v2803_v8  ;;  %3072 = vmatprep.subr.bf16.mxu0 %v6660_v38  ;;  %v2741_v8 = vsel %vm9433_vm6, %v2731_v62, %v2740_v54  ;;  %v2690_v26 = vsel %vm9437_vm10, %v2686_v5, %v2687_v51  ;;  %v2693_v59 = vsel %vm9432_vm5, %v2683_v53, %v2692_v10 }
 0x8c4   : > { %v2807_v28 = vsel %vm9434_vm3, %v2797_v47, %v2806_v57  ;;  %3073 = vmatpush1.bf16.msra.mxu0 %v6659_v16  ;;  %v2631_v12 = vpop.permute.xlu0 %2630  ;;  %v2739_v47 = vsel %vm9433_vm6, %v8349_v14, %v2738_v55  ;;  %v2639_v38 = vrot.slane %v8355_v13, 4  ;;  %v2691_v50 = vsel %vm9432_vm5, %v8353_v63, %v2690_v26  ;;  %v2595_v14 = vpop.permute.xlu1 %2594 }
 0x8c5   : > { %v6657_v0 = vcombine.low %v2805_v61, %v2807_v28  ;;  %v6658_v45 = vcombine.high %v2805_v61, %v2807_v28  ;;  %v2638_v62 = vrot.slane %v2631_v12, 4  ;;  %v6654_v16 = vcombine.high %v2739_v47, %v2741_v8 }
 0x8c6   : > { %v6652_v22 = vcombine.high %v2691_v50, %v2693_v59  ;;  %v2599_v7 = vrot.slane %v2595_v14, 4  ;;  %v6651_v13 = vcombine.low %v2691_v50, %v2693_v59  ;;  %v2939_v5 = vrot.slane %v2933_v3, 4  ;;  %v7352_v3 = vld [vmem:[%s9404_s4 + $0x10] ss:$8 sps:$4 sm:$0xff]  }
 0x8c7   : > { %3074 = vmatprep.subr.bf16.mxu0 %v6658_v45  ;;  %v2642_v23 = vsel %vm9437_vm10, %v2638_v62, %v2639_v38 }
 0x8c8   : > { %3075 = vmatpush1.bf16.msra.mxu0 %v6657_v0  ;;  %v2635_v37 = vpop.permute.xlu0 %2634  ;;  %v2643_v32 = vsel %vm9438_vm9, %v2631_v12, %v2642_v23  ;;  %v2937_v45 = vpop.permute.xlu1 %2936 }
 0x8c9   : > { %v2640_v19 = vrot.slane %v2635_v37, 4  ;;  %3076 = vmatprep.subr.bf16.mxu0 %v7228_v9  ;;  %v6653_v9 = vcombine.low %v2739_v47, %v2741_v8  ;;  %v2941_v12 = vrot.slane %v2937_v45, 4 }
 0x8cb   : > { %v2644_v60 = vsel %vm9437_vm10, %v2640_v19, %v2641_v41 }
 0x8cc   : > { %3077 = vmatpush1.bf16.msra.mxu0 %v7227_v30  ;;  %v2589_v43 = vpop.permute.xlu0 %2588  ;;  %v2645_v53 = vsel %vm9438_vm9, %v2635_v37, %v2644_v60 }
 0x8cd   : > { %3078 = vmatprep.subr.bf16.mxu0 %v6654_v16  ;;  %v2596_v15 = vrot.slane %v2589_v43, 4  ;;  %v6650_v28 = vcombine.high %v2643_v32, %v2645_v53  ;;  %v6649_v55 = vcombine.low %v2643_v32, %v2645_v53  ;;  %v9445_v16 = vmov 0.0  }
 0x8cf   : > { %v2600_v63 = vsel %vm9437_vm10, %v2596_v15, %v2597_v25  ;;  %v9446_v25 = vmov 0  }
 0x8d0   : > { %v2593_v57 = vpop.permute.xlu0 %2592  ;;  %3079 = vmatpush1.bf16.msra.mxu0 %v6653_v9  ;;  %v2601_v49 = vsel %vm9431_vm8, %v2589_v43, %v2600_v63 }
 0x8d1   : > { %v2598_v30 = vrot.slane %v2593_v57, 4  ;;  %3080 = vmatprep.subr.bf16.mxu0 %v6652_v22 }
 0x8d3   : > { %v2602_v61 = vsel %vm9437_vm10, %v2598_v30, %v2599_v7 }
 0x8d4   : > { %v2603_v54 = vsel %vm9431_vm8, %v2593_v57, %v2602_v61  ;;  %v2931_v6 = vpop.permute.xlu0 %2930  ;;  %3081 = vmatpush1.bf16.msra.mxu0 %v6651_v13  ;;  %v6553_v57 = vld [vmem:[%s9405_s5 + $0x2] sm:$0x3] }
 0x8d5   : > { %v2938_v0 = vrot.slane %v2931_v6, 4  ;;  %3082 = vmatprep.subr.bf16.mxu0 %v6650_v28  ;;  %v6648_v48 = vcombine.high %v2601_v49, %v2603_v54  ;;  %v6647_v10 = vcombine.low %v2601_v49, %v2603_v54  ;;  %v7353_v28 = vld [vmem:[%s9406_s6 + $0x8] sm:$0xff]  }
 0x8d7   : > { %v2942_v37 = vsel %vm9437_vm10, %v2938_v0, %v2939_v5 }
 0x8d8   : > { %v2935_v8 = vpop.permute.xlu0 %2934  ;;  %3083 = vmatpush1.bf16.msra.mxu0 %v6649_v55  ;;  %v2943_v47 = vsel %vm9430_vm7, %v2931_v6, %v2942_v37 }
 0x8d9   : > { %v2940_v51 = vrot.slane %v2935_v8, 4  ;;  %3084 = vmatprep.subr.bf16.mxu0 %v6648_v48 }
 0x8db   : > { %v2944_v19 = vsel %vm9437_vm10, %v2940_v51, %v2941_v12 }
 0x8dc   : > { %v2945_v26 = vsel %vm9430_vm7, %v2935_v8, %v2944_v19  ;;  %3085 = vmatpush1.bf16.msra.mxu0 %v6647_v10 }
 0x8dd   : > { %v6663_v41 = vcombine.low %v2943_v47, %v2945_v26  ;;  %v6664_v62 = vcombine.high %v2943_v47, %v2945_v26  ;;  %v8439_v26 = vld [vmem:[%s9408_s8] sm:$0xff]  }
 0x8df   : > { %3100 = vmatprep.subr.bf16.mxu0 %v6664_v62  ;;  %v8445_v62 = vld [vmem:[%s9408_s8 + $0x10] sm:$0xff]  }
 0x8e0   : > { %3101 = vmatpush2.bf16.msra.mxu0 %v6663_v41  ;;  %v3311_v41 = vunpack.c.h.bf16 %v8439_v26 }
 0x8e1   : > { %7271 = vmatprep.subr.bf16.mxu0 %v9445_v16 }
 0x8e3   : > { %3103 = vmatmul.mubr.bf16.vlgmr.msra.gmra.mxu0 %v7352_v3  ;;  %v3426_v3 = vmul.f32 %v3311_v41, %v3311_v41 }
 0x8e4   : > { %7273 = vmatprep.mubr.msk.bf16.mxu0 %vm9428_vm0, %v9445_v16 }
 0x9a3   : > { %v8413_v59 = vpop.f32.mrf.mxu0 }
 0x9a5   : > { %v8415_v43 = vpop.f32.mrf.mxu0 }
 0x9a6   : > { %v3113_v38 = vadd.f32 %v8415_v43, %v8413_v59 }
 0x9a7   : > { %v8419_v60 = vpop.f32.mrf.mxu0 }
 0x9a8   : > { %3114 = vadd.xlane.f32.xlu0 %v3113_v38  ;;  %v3314_v38 = vunpack.c.l.bf16 %v8445_v62 }
 0x9a9   : > { %v8421_v50 = vpop.f32.mrf.mxu0 }
 0x9aa   : > { %v3116_v9 = vadd.f32 %v8421_v50, %v8419_v60 }
 0x9ac   : > { %3117 = vadd.xlane.f32.xlu1 %v3116_v9  ;;  %v8451_v9 = vld [vmem:[%s9408_s8 + $0x18] sm:$0xff]  }
 0xa31   : > { %v3115_v14 = vpop.xlane.xlu0 %3114 }
 0xa32   : > { %v3119_v15 = vmul.f32 0.00390625, %v3115_v14  ;;  %v3436_v14 = vsel %vm9438_vm9, %v3426_v3, 0.0 }
 0xa35   : > { %v3118_v23 = vpop.xlane.xlu1 %3117 }
 0xa36   : > { %v3120_v22 = vmul.f32 0.00390625, %v3118_v23  ;;  %v3429_v23 = vmul.f32 %v3314_v38, %v3314_v38 }
 0xa38   : > { %v3121_v53 = vpack.c.bf16 %v3120_v22, %v3119_v15  ;;  %v3316_v15 = vunpack.c.l.bf16 %v8451_v9  ;;  %v3445_v22 = vsel %vm9438_vm9, %v3429_v23, 0.0 }
 0xa3a   : > { %7266 = vmatpush3.bf16.msra.mxu1 %v3121_v53  ;;  %v3431_v53 = vmul.f32 %v3316_v15, %v3316_v15 }
 0xa3d   : > { %7268 = vmatmul.mubr.msk.bf16.vlgmr.msra.gmra.mxu1 %vm9438_vm9, %v6553_v57  ;;  %v3451_v57 = vsel %vm9438_vm9, %v3431_v53, 0.0 }
 0xa3e   : > { %3291 = vmatprep.mubr.bf16.mxu1 %v9446_v25 }
 0xafd   : > { %v3159_v7 = vpop.f32.mrf.mxu1 }
 0xafe   : > { %v3165_v30 = vmax.f32 %v3159_v7, 0.0 }
 0xaff   : > { %v7269_v13 = vpop.f32.mrf.mxu1 }
 0xb00   : > { %v3166_v32 = vpack.c.bf16 %v3165_v30, %v3165_v30 }
 0xb01   : > { %v3162_v63 = vpop.f32.mrf.mxu1 }
 0xb02   : > { %v3176_v61 = vsel %vm9427_vm1, %v3166_v32, 0 }
 0xb03   : > { %v7270_v54 = vpop.f32.mrf.mxu1  ;;  %7272 = vmatpush3.bf16.msra.mxu0 %v3176_v61 }
 0xb06   : > { %7274 = vmatmul.mubr.msk.bf16.vlgmr.msra.gmra.mxu0 %vm9426_vm2, %v7353_v28 }
 0xb07   : > { %3384 = vmatprep.mubr.bf16.mxu0 %v9446_v25 }
 0xbc6   : > { %v3212_v6 = vpop.f32.mrf.mxu0 }
 0xbc7   : > { %v3219_v0 = vsub.f32 0.0, %v3212_v6 }
 0xbc8   : > { %v7275_v45 = vpop.f32.mrf.mxu0 }
 0xbc9   : > { %v3221_v55 = vmul.f32 1.442695, %v3219_v0 }
 0xbca   : > { %v3215_v49 = vpop.f32.mrf.mxu0 }
 0xbcb   : > { %7386 = vpow2.f32 %v3221_v55  ;;  %v3220_v5 = vsub.f32 0.0, %v3215_v49 }
 0xbcc   : > { %v7276_v48 = vpop.f32.mrf.mxu0 }
 0xbcd   : > { %v3223_v8 = vmul.f32 1.442695, %v3220_v5  ;;  %v3315_v48 = vunpack.c.h.bf16 %v8445_v62 }
 0xbcf   : > { %7388 = vpow2.f32 %v3223_v8 }
 0xbd8   : > { %v7387_v12 = vpop.eup %7386 }
 0xbd9   : > { %v3225_v37 = vadd.f32 1.0, %v7387_v12  ;;  %v3430_v12 = vmul.f32 %v3315_v48, %v3315_v48 }
 0xbdb   : > { %7390 = vrcp.f32 %v3225_v37  ;;  %v3317_v37 = vunpack.c.h.bf16 %v8451_v9 }
 0xbdc   : > { %v7389_v51 = vpop.eup %7388 }
 0xbdd   : > { %v3226_v10 = vadd.f32 1.0, %v7389_v51  ;;  %v3448_v51 = vsel %vm9438_vm9, %v3430_v12, 0.0 }
 0xbdf   : > { %7392 = vrcp.f32 %v3226_v10  ;;  %v3432_v10 = vmul.f32 %v3317_v37, %v3317_v37 }
 0xbe8   : > { %v7391_v19 = vpop.eup %7390 }
 0xbe9   : > { %3231 = vperm.xlu0 %7337, %v7391_v19   ;;  %v3454_v19 = vsel %vm9438_vm9, %v3432_v10, 0.0 }
 0xbec   : > { %v7393_v47 = vpop.eup %7392 }
 0xbed   : > { %3236 = vperm.xlu1 %7338, %v7393_v47  }
 0xc11   : > { %3437 = vadd.xlane.f32.xlu1 %v3436_v14 }
 0xc15   : > { %3446 = vadd.xlane.f32.xlu1 %v3445_v22 }
 0xc19   : > { %3452 = vadd.xlane.f32.xlu1 %v3451_v57 }
 0xc2a   : > { %4063 = vrot.lane.b32.xlu1 %v9444_v4, %s7460_s20 }
 0xc2e   : > { %4017 = vrot.lane.b32.xlu1 %v7617_v24, %s7456_s17 }
 0xc32   : > { %4021 = vrot.lane.b32.xlu1 %v7617_v24, %s7456_s17 }
 0xc36   : > { %3969 = vrot.lane.b32.xlu1 %v7621_v27, %s7455_s0 }
 0xc3a   : > { %3973 = vrot.lane.b32.xlu1 %v7621_v27, %s7455_s0 }
 0xc64   : > { %v3232_v7 = vpop.permute.xlu0 %3231 }
 0xc65   : > { %v3239_v30 = vmul.f32 %v3232_v7, %v8413_v59  ;;  %v3240_v13 = vmul.f32 %v3232_v7, %v8415_v43  ;;  %v7357_v59 = vld [vmem:[%s9407_s7] sm:$0xff]  }
 0xc67   : > { %v3243_v28 = vadd.f32 %v3239_v30, %v8051_v58  ;;  %v3244_v54 = vadd.f32 %v3240_v13, %v8054_v1  ;;  %v3304_v58 = vld [vmem:[%s9408_s8 + $0x8] sm:$0xff]   ;;  %v3310_v1 = vunpack.c.l.bf16 %v8439_v26 }
 0xc68   : > { %v3237_v32 = vpop.permute.xlu1 %3236 }
 0xc69   : > { %v3241_v63 = vmul.f32 %v3237_v32, %v8419_v60  ;;  %v3242_v61 = vmul.f32 %v3237_v32, %v8421_v50  ;;  %v3313_v60 = vunpack.c.h.bf16 %v3304_v58 }
 0xc6b   : > { %v3245_v6 = vadd.f32 %v3241_v63, %v8086_v17  ;;  %v3246_v0 = vadd.f32 %v3242_v61, %v8089_v18  ;;  %v3312_v17 = vunpack.c.l.bf16 %v3304_v58  ;;  %v3425_v18 = vmul.f32 %v3310_v1, %v3310_v1 }
 0xc6c   : > { %v3428_v5 = vmul.f32 %v3313_v60, %v3313_v60 }
 0xc6d   : > { %v3250_v45 = vpack.c.bf16 %v3246_v0, %v3244_v54  ;;  %v3249_v55 = vpack.c.bf16 %v3245_v6, %v3243_v28  ;;  %v3427_v43 = vmul.f32 %v3312_v17, %v3312_v17  ;;  %v3433_v50 = vsel %vm9438_vm9, %v3425_v18, 0.0 }
 0xc6e   : > { %3434 = vadd.xlane.f32.xlu0 %v3433_v50  ;;  %v3442_v8 = vsel %vm9438_vm9, %v3428_v5, 0.0 }
 0xc6f   : > { %3273 = vmatprep.subr.bf16.mxu1 %v3250_v45  ;;  %v3439_v49 = vsel %vm9438_vm9, %v3427_v43, 0.0 }
 0xc70   : > { %3274 = vmatpush1.bf16.msra.mxu1 %v3249_v55 }
 0xc72   : > { %3440 = vadd.xlane.f32.xlu0 %v3439_v49 }
 0xc73   : > { %6670 = vmatmul.mubr.msk.bf16.vlgmr.msra.gmra.mxu1 %vm9438_vm9, %v7357_v59 }
 0xc74   : > { %3713 = vmatprep.mubr.bf16.mxu1 %v9446_v25 }
 0xc76   : > { %3443 = vadd.xlane.f32.xlu0 %v3442_v8 }
 0xc7a   : > { %3449 = vadd.xlane.f32.xlu0 %v3448_v51 }
 0xc7e   : > { %3455 = vadd.xlane.f32.xlu0 %v3454_v19 }
 0xc94   : > { %4059 = vrot.lane.b32.xlu0 %v9444_v4, %s7460_s20 }
 0xc9a   : > { %v3438_v6 = vpop.xlane.xlu1 %3437 }
 0xd33   : > { %v3293_v47 = vpop.f32.mrf.mxu1 }
 0xd34   : > { %v3646_v38 = vmul.f32 %v3293_v47, %v3293_v47 }
 0xd35   : > { %v3295_v41 = vpop.f32.mrf.mxu1 }
 0xd36   : > { %v3647_v49 = vmul.f32 %v3295_v41, %v3295_v41 }
 0xd37   : > { %v3297_v3 = vpop.f32.mrf.mxu1 }
 0xd38   : > { %v3648_v14 = vmul.f32 %v3297_v3, %v3297_v3  ;;  %v3318_v53 = vpack.c.bf16 %v3297_v3, %v3293_v47 }
 0xd39   : > { %v3299_v23 = vpop.f32.mrf.mxu1 }
 0xd3a   : > { %v8493_v15 = vadd.f32 %v3648_v14, %v3646_v38  ;;  %v3319_v22 = vpack.c.bf16 %v3299_v23, %v3295_v41  ;;  %v3649_v1 = vmul.f32 %v3299_v23, %v3299_v23 }
 0xd3c   : > { %3366 = vmatprep.subr.bf16.mxu0 %v3319_v22  ;;  %v3657_v47 = vadd.f32 %v3649_v1, %v3647_v49 }
 0xd3d   : > { %3367 = vmatpush1.bf16.msra.mxu0 %v3318_v53 }
 0xd40   : > { %6675 = vmatmul.mubr.msk.bf16.vlgmr.msra.gmra.mxu0 %vm9438_vm9, %v8439_v26  ;;  %v3435_v26 = vpop.xlane.xlu0 %3434 }
 0xd41   : > { %3394 = vmatprep.mubr.bf16.mxu0 %v9446_v25 }
 0xd44   : > { %v3441_v28 = vpop.xlane.xlu0 %3440 }
 0xd48   : > { %6676 = vmatmul.mubr.msk.bf16.gmra.mxu0 %vm9438_vm9, %v3304_v58  ;;  %v3447_v58 = vpop.xlane.xlu1 %3446 }
 0xd49   : > { %3404 = vmatprep.mubr.bf16.mxu0 %v9446_v25 }
 0xd50   : > { %6677 = vmatmul.mubr.msk.bf16.gmra.mxu0 %vm9438_vm9, %v8445_v62  ;;  %v3444_v62 = vpop.xlane.xlu0 %3443 }
 0xd51   : > { %3414 = vmatprep.mubr.bf16.mxu0 %v9446_v25 }
 0xd54   : > { %v3450_v10 = vpop.xlane.xlu0 %3449 }
 0xd58   : > { %6678 = vmatmul.mubr.msk.bf16.gmra.mxu0 %vm9438_vm9, %v8451_v9 }
 0xe00   : > { %v3386_v57 = vpop.f32.mrf.mxu0 }
 0xe01   : > { %v3457_v9 = vmul.f32 2.0, %v3386_v57 }
 0xe02   : > { %v3388_v7 = vpop.f32.mrf.mxu0 }
 0xe03   : > { %v3458_v8 = vmul.f32 2.0, %v3388_v7  ;;  %v8509_v23 = vsub.f32 %v3435_v26, %v3457_v9  ;;  %v3453_v7 = vpop.xlane.xlu1 %3452  ;;  %v3658_v9 = vrot.slane %v3657_v47, 4 }
 0xe04   : > { %v3390_v30 = vpop.f32.mrf.mxu0 }
 0xe05   : > { %v3459_v5 = vmul.f32 2.0, %v3390_v30  ;;  %v3651_v30 = vrot.slane %v8493_v15, 4 }
 0xe06   : > { %v3392_v13 = vpop.f32.mrf.mxu0 }
 0xe07   : > { %v3460_v12 = vmul.f32 2.0, %v3392_v13  ;;  %v8518_v13 = vsub.f32 %v3438_v6, %v3459_v5  ;;  %v3652_v5 = vadd.f32 %v3651_v30, %v8493_v15 }
 0xe08   : > { %v3396_v32 = vpop.f32.mrf.mxu0 }
 0xe09   : > { %v3461_v55 = vmul.f32 2.0, %v3396_v32 }
 0xe0a   : > { %v3398_v63 = vpop.f32.mrf.mxu0 }
 0xe0b   : > { %v3462_v18 = vmul.f32 2.0, %v3398_v63  ;;  %v8505_v37 = vsub.f32 %v3441_v28, %v3461_v55  ;;  %v3456_v55 = vpop.xlane.xlu0 %3455 }
 0xe0c   : > { %v3400_v61 = vpop.f32.mrf.mxu0 }
 0xe0d   : > { %v3463_v17 = vmul.f32 2.0, %v3400_v61  ;;  %v8511_v22 = vsub.f32 %v3441_v28, %v3462_v18  ;;  %v8522_v61 = vsub.f32 %v3435_v26, %v3458_v8  ;;  %v3489_v28 = vmin.f32 %v8509_v23, %v8505_v37 }
 0xe0e   : > { %v3402_v54 = vpop.f32.mrf.mxu0 }
 0xe0f   : > { %v3464_v43 = vmul.f32 2.0, %v3402_v54  ;;  %v8507_v3 = vsub.f32 %v3444_v62, %v3463_v17  ;;  %v8524_v54 = vsub.f32 %v3438_v6, %v3460_v12  ;;  %v3502_v26 = vmin.f32 %v8522_v61, %v8511_v22 }
 0xe10   : > { %v3406_v0 = vpop.f32.mrf.mxu0 }
 0xe11   : > { %v3465_v60 = vmul.f32 2.0, %v3406_v0  ;;  %v8513_v53 = vsub.f32 %v3444_v62, %v3464_v43  ;;  %v3490_v62 = vmin.f32 %v8518_v13, %v8507_v3 }
 0xe12   : > { %v3408_v45 = vpop.f32.mrf.mxu0 }
 0xe13   : > { %v3466_v51 = vmul.f32 2.0, %v3408_v45  ;;  %v8515_v41 = vsub.f32 %v3447_v58, %v3465_v60  ;;  %v3503_v6 = vmin.f32 %v8524_v54, %v8513_v53 }
 0xe14   : > { %v3410_v59 = vpop.f32.mrf.mxu0 }
 0xe15   : > { %v3467_v48 = vmul.f32 2.0, %v3410_v59  ;;  %v8528_v0 = vsub.f32 %v3447_v58, %v3466_v51  ;;  %v3491_v58 = vmin.f32 %v3489_v28, %v8515_v41 }
 0xe16   : > { %v3412_v50 = vpop.f32.mrf.mxu0 }
 0xe17   : > { %v3468_v38 = vmul.f32 2.0, %v3412_v50  ;;  %v8520_v32 = vsub.f32 %v3450_v10, %v3467_v48  ;;  %v3504_v48 = vmin.f32 %v3502_v26, %v8528_v0 }
 0xe18   : > { %v3416_v19 = vpop.f32.mrf.mxu0 }
 0xe19   : > { %v3469_v14 = vmul.f32 2.0, %v3416_v19  ;;  %v8532_v59 = vsub.f32 %v3450_v10, %v3468_v38  ;;  %v3492_v43 = vmin.f32 %v3490_v62, %v8520_v32  ;;  %v3659_v19 = vadd.f32 %v3658_v9, %v3657_v47 }
 0xe1a   : > { %v3418_v57 = vpop.f32.mrf.mxu0  ;;  %v3519_v47 = vadd.s32 24, %v7577_v2 }
 0xe1b   : > { %v3470_v63 = vmul.f32 2.0, %v3418_v57  ;;  %v8534_v1 = vsub.f32 %v3453_v7, %v3469_v14  ;;  %v3505_v8 = vmin.f32 %v3503_v6, %v8532_v59  ;;  %v3660_v15 = vrot.slane %v3659_v19, 2 }
 0xe1c   : > { %v3420_v45 = vpop.f32.mrf.mxu0 }
 0xe1d   : > { %v3471_v17 = vmul.f32 2.0, %v3420_v45  ;;  %v8542_v60 = vsub.f32 %v3453_v7, %v3470_v63  ;;  %v3493_v12 = vmin.f32 %v3491_v58, %v8534_v1  ;;  %v3653_v7 = vrot.slane %v3652_v5, 2 }
 0xe1e   : > { %v3422_v18 = vpop.f32.mrf.mxu0  ;;  %v3661_v6 = vadd.f32 %v3660_v15, %v3659_v19  ;;  %v3517_v58 = vadd.s32 8, %v7577_v2 }
 0xe1f   : > { %v8544_v50 = vsub.f32 %v3456_v55, %v3471_v17  ;;  %v3472_v49 = vmul.f32 2.0, %v3422_v18  ;;  %v3506_v38 = vmin.f32 %v3504_v48, %v8542_v60  ;;  %v3654_v62 = vadd.f32 %v3653_v7, %v3652_v5 }
 0xe20   : > { %v8561_v5 = vcvt.s32.f32 %v7577_v2  ;;  %v8563_v19 = vcvt.s32.f32 %v3517_v58  ;;  %v3522_v7 = vadd.s32 48, %v7577_v2 }
 0xe21   : > { %v3494_v51 = vmin.f32 %v3492_v43, %v8544_v50  ;;  %v8551_v10 = vsub.f32 %v3456_v55, %v3472_v49  ;;  %v3518_v55 = vadd.s32 16, %v7577_v2  ;;  %v3655_v43 = vrot.slane %v3654_v62, 1 }
 0xe23   : > { %v3495_v14 = vmin.f32 %v3493_v12, %v3494_v51  ;;  %v3507_v57 = vmin.f32 %v3505_v8, %v8551_v10  ;;  %v3662_v8 = vrot.slane %v3661_v6, 1  ;;  %v3520_v12 = vadd.s32 32, %v7577_v2 }
 0xe24   : > { %v3521_v51 = vadd.s32 40, %v7577_v2  ;;  %v3656_v15 = vadd.f32 %v3655_v43, %v3654_v62 }
 0xe25   : > { %v3496_v63 = vrot.slane %v3495_v14, 4  ;;  %v3508_v28 = vmin.f32 %v3506_v38, %v3507_v57  ;;  %v8565_v38 = vcvt.s32.f32 %v3518_v55 }
 0xe27   : > { %v3497_v30 = vmin.f32 %v3495_v14, %v3496_v63  ;;  %v3509_v45 = vrot.slane %v3508_v28, 4  ;;  %v8567_v14 = vcvt.s32.f32 %v3519_v47  ;;  %v3523_v63 = vadd.s32 56, %v7577_v2 }
 0xe29   : > { %v3498_v17 = vrot.slane %v3497_v30, 2  ;;  %v3510_v26 = vmin.f32 %v3508_v28, %v3509_v45  ;;  %v8577_v45 = vcvt.s32.f32 %v3521_v51 }
 0xe2b   : > { %v3499_v9 = vmin.f32 %v3497_v30, %v3498_v17  ;;  %v3511_v18 = vrot.slane %v3510_v26, 2  ;;  %v8575_v30 = vcvt.s32.f32 %v3520_v12 }
 0xe2d   : > { %v3500_v49 = vrot.slane %v3499_v9, 1  ;;  %v3512_v48 = vmin.f32 %v3510_v26, %v3511_v18  ;;  %v8585_v26 = vcvt.s32.f32 %v3522_v7 }
 0xe2f   : > { %v3501_v57 = vmin.f32 %v3499_v9, %v3500_v49  ;;  %v3513_v28 = vrot.slane %v3512_v48, 1  ;;  %v3663_v9 = vadd.f32 %v3662_v8, %v3661_v6 }
 0xe31   : > { %vm3532_vm12 = vcmp.le.f32.partialorder %v8509_v23, %v3501_v57  ;;  %vm3534_vm13 = vcmp.le.f32.partialorder %v8518_v13, %v3501_v57  ;;  %vm3536_vm14 = vcmp.le.f32.partialorder %v8505_v37, %v3501_v57  ;;  %vm3538_vm15 = vcmp.le.f32.partialorder %v8507_v3, %v3501_v57 }
 0xe32   : > { %vm3540_vm2 = vcmp.le.f32.partialorder %v8515_v41, %v3501_v57  ;;  %vm3542_vm1 = vcmp.le.f32.partialorder %v8520_v32, %v3501_v57  ;;  %v3548_v17 = vsel %vm3532_vm12, %v8561_v5, 64.0  ;;  %v3550_v62 = vsel %vm3534_vm13, %v8563_v19, 64.0 }
 0xe33   : > { %v3552_v23 = vsel %vm3536_vm14, %v8565_v38, 64.0  ;;  %v3554_v13 = vsel %vm3538_vm15, %v8567_v14, 64.0  ;;  %v8587_v37 = vcvt.s32.f32 %v3523_v63  ;;  %vm3544_vm0 = vcmp.le.f32.partialorder %v8534_v1, %v3501_v57 }
 0xe34   : > { %vm3546_vm7 = vcmp.le.f32.partialorder %v8544_v50, %v3501_v57  ;;  %v3564_v3 = vmin.f32 %v3548_v17, %v3552_v23  ;;  %v3565_v41 = vmin.f32 %v3550_v62, %v3554_v13  ;;  %v3514_v58 = vmin.f32 %v3512_v48, %v3513_v28 }
 0xe35   : > { %v3664_v32 = vadd.f32 %v3656_v15, %v3501_v57  ;;  %v3556_v55 = vsel %vm3540_vm2, %v8575_v30, 64.0  ;;  %v3558_v47 = vsel %vm3542_vm1, %v8577_v45, 64.0  ;;  %v3560_v49 = vsel %vm3544_vm0, %v8585_v26, 64.0 }
 0xe36   : > { %v3566_v18 = vmin.f32 %v3564_v3, %v3556_v55  ;;  %v3567_v43 = vmin.f32 %v3565_v41, %v3558_v47  ;;  %vm3533_vm12 = vcmp.le.f32.partialorder %v8522_v61, %v3514_v58  ;;  %vm3535_vm13 = vcmp.le.f32.partialorder %v8524_v54, %v3514_v58 }
 0xe37   : > { %v3562_v1 = vsel %vm3546_vm7, %v8587_v37, 64.0  ;;  %vm3537_vm14 = vcmp.le.f32.partialorder %v8511_v22, %v3514_v58  ;;  %vm3539_vm15 = vcmp.le.f32.partialorder %v8513_v53, %v3514_v58  ;;  %vm3541_vm2 = vcmp.le.f32.partialorder %v8528_v0, %v3514_v58 }
 0xe38   : > { %v3568_v50 = vmin.f32 %v3566_v18, %v3560_v49  ;;  %v3569_v48 = vmin.f32 %v3567_v43, %v3562_v1  ;;  %vm3543_vm1 = vcmp.le.f32.partialorder %v8532_v59, %v3514_v58  ;;  %v3549_v6 = vsel %vm3533_vm12, %v8561_v5, 64.0 }
 0xe39   : > { %v3551_v61 = vsel %vm3535_vm13, %v8563_v19, 64.0  ;;  %v3553_v54 = vsel %vm3537_vm14, %v8565_v38, 64.0  ;;  %v3555_v8 = vsel %vm3539_vm15, %v8567_v14, 64.0  ;;  %vm3545_vm7 = vcmp.le.f32.partialorder %v8542_v60, %v3514_v58 }
 0xe3a   : > { %v3570_v12 = vmin.f32 %v3568_v50, %v3569_v48  ;;  %vm3547_vm0 = vcmp.le.f32.partialorder %v8551_v10, %v3514_v58  ;;  %v3577_v22 = vmin.f32 %v3549_v6, %v3553_v54  ;;  %v3578_v53 = vmin.f32 %v3551_v61, %v3555_v8 }
 0xe3b   : > { %v3665_v51 = vadd.f32 %v3663_v9, %v3514_v58  ;;  %v3557_v0 = vsel %vm3541_vm2, %v8575_v30, 64.0  ;;  %v3559_v59 = vsel %vm3543_vm1, %v8577_v45, 64.0  ;;  %v3561_v17 = vsel %vm3545_vm7, %v8585_v26, 64.0 }
 0xe3c   : > { %v3571_v57 = vrot.slane %v3570_v12, 4  ;;  %v3579_v7 = vmin.f32 %v3577_v22, %v3557_v0  ;;  %v3580_v63 = vmin.f32 %v3578_v53, %v3559_v59  ;;  %v3563_v62 = vsel %vm3547_vm0, %v8587_v37, 64.0 }
 0xe3d   : > { %v8609_v28 = vadd.f32 %v3665_v51, %v3664_v32  ;;  %v7464_v32 = vmov 1.0|1.0  }
 0xe3e   : > { %v3572_v15 = vmin.f32 %v3570_v12, %v3571_v57  ;;  %v3581_v60 = vmin.f32 %v3579_v7, %v3561_v17  ;;  %v3582_v23 = vmin.f32 %v3580_v63, %v3563_v62 }
 0xe40   : > { %v3573_v10 = vrot.slane %v3572_v15, 2  ;;  %v3583_v13 = vmin.f32 %v3581_v60, %v3582_v23 }
 0xe42   : > { %v3574_v3 = vmin.f32 %v3572_v15, %v3573_v10  ;;  %v3584_v41 = vrot.slane %v3583_v13, 4 }
 0xe44   : > { %v3585_v58 = vmin.f32 %v3583_v13, %v3584_v41  ;;  %v3575_v55 = vrot.slane %v3574_v3, 1 }
 0xe46   : > { %v3586_v47 = vrot.slane %v3585_v58, 2  ;;  %v3576_v18 = vmin.f32 %v3574_v3, %v3575_v55 }
 0xe48   : > { %v3587_v9 = vmin.f32 %v3585_v58, %v3586_v47  ;;  %vm3602_vm12 = vcmp.eq.f32.partialorder %v8585_v26, %v3576_v18  ;;  %vm3604_vm13 = vcmp.eq.f32.partialorder %v8587_v37, %v3576_v18  ;;  %vm3598_vm5 = vcmp.eq.f32.partialorder %v8575_v30, %v3576_v18 }
 0xe49   : > { %vm6698_vm0 = vmpackc.low %vm3604_vm13, %vm3602_vm12  ;;  %vm3600_vm6 = vcmp.eq.f32.partialorder %v8577_v45, %v3576_v18  ;;  %vm3594_vm9 = vcmp.eq.f32.partialorder %v8565_v38, %v3576_v18 }
 0xe4a   : > { %v3588_v43 = vrot.slane %v3587_v9, 1  ;;  %vm6702_vm11 = vmpackc.low %vm3600_vm6, %vm3598_vm5  ;;  %vm9449_vm6 = vcmask 1043456  }
 0xe4c   : > { %v3589_v49 = vmin.f32 %v3587_v9, %v3588_v43 }
 0xe4e   : > { %vm3603_vm14 = vcmp.eq.f32.partialorder %v8585_v26, %v3589_v49  ;;  %vm3605_vm15 = vcmp.eq.f32.partialorder %v8587_v37, %v3589_v49  ;;  %vm3599_vm2 = vcmp.eq.f32.partialorder %v8575_v30, %v3589_v49  ;;  %vm3601_vm1 = vcmp.eq.f32.partialorder %v8577_v45, %v3589_v49 }
 0xe4f   : > { %vm6696_vm7 = vmpackc.low %vm3605_vm15, %vm3603_vm14  ;;  %vm3595_vm3 = vcmp.eq.f32.partialorder %v8565_v38, %v3589_v49  ;;  %vm3597_vm4 = vcmp.eq.f32.partialorder %v8567_v14, %v3589_v49  ;;  %vm3596_vm14 = vcmp.eq.f32.partialorder %v8567_v14, %v3576_v18  ;;  %vm3591_vm12 = vcmp.eq.f32.partialorder %v8561_v5, %v3589_v49  ;;  %v7359_v38 = vld [vmem:[%s9409_s9] sm:$0xff]  }
 0xe50   : > { %6697 = vmatprep.subr.msk.bf16.mxu1 %vm6696_vm7, %v7464_v32  ;;  %vm6700_vm8 = vmpackc.low %vm3601_vm1, %vm3599_vm2  ;;  %vm3593_vm13 = vcmp.eq.f32.partialorder %v8563_v19, %v3589_v49  ;;  %vm3592_vm1 = vcmp.eq.f32.partialorder %v8563_v19, %v3576_v18 }
 0xe51   : > { %6699 = vmatpush1.bf16.msk.msra.mxu1 %vm6698_vm0, %v7464_v32  ;;  %vm6704_vm10 = vmpackc.low %vm3597_vm4, %vm3595_vm3  ;;  %vm3677_vm3 = vcmask 523264   ;;  %vm9448_vm4 = vcmask 130048  }
 0xe52   : > { %6701 = vmatprep.subr.msk.bf16.mxu1 %vm6700_vm8, %v7464_v32  ;;  %vm6706_vm15 = vmpackc.low %vm3596_vm14, %vm3594_vm9  ;;  %vm3590_vm8 = vcmp.eq.f32.partialorder %v8561_v5, %v3576_v18  ;;  %vm9455_vm14 = vcmask 924672  }
 0xe53   : > { %vm6708_vm2 = vmpackc.low %vm3593_vm13, %vm3591_vm12 }
 0xe54   : > { %vm6710_vm5 = vmpackc.low %vm3592_vm1, %vm3590_vm8 }
 0xe55   : > { %6703 = vmatpush1.bf16.msk.msra.mxu1 %vm6702_vm11, %v7464_v32  ;;  %vm9450_vm9 = vmmov %vm9449_vm6 }
 0xe56   : > { %6705 = vmatprep.subr.msk.bf16.mxu1 %vm6704_vm10, %v7464_v32  ;;  %vm9451_vm10 = vcmask 916480   ;;  %vm9453_vm7 = vmmov %vm9449_vm6 }
 0xe57   : > { %vm9452_vm11 = vmmov %vm9451_vm10 }
 0xe58   : > { %vm9454_vm0 = vmmov %vm9449_vm6 }
 0xe59   : > { %6707 = vmatpush1.bf16.msk.msra.mxu1 %vm6706_vm15, %v7464_v32  ;;  %vm9456_vm12 = vmmov %vm9454_vm0 }
 0xe5a   : > { %6709 = vmatprep.subr.msk.bf16.mxu1 %vm6708_vm2, %v7464_v32  ;;  %vm9457_vm13 = vmmov %vm9455_vm14  ;;  %vm9459_vm2 = vcmask 1039360  }
 0xe5b   : > { %vm9458_vm15 = vmmov %vm9454_vm0 }
 0xe5c   : > { %vm9460_vm8 = vmmov %vm9459_vm2 }
 0xe5d   : > { %6711 = vmatpush1.bf16.msk.msra.mxu1 %vm6710_vm5, %v7464_v32  ;;  %vm9461_vm1 = vmmov %vm9454_vm0 }
 0xe5e   : > { %vm9462_vm5 = vmmov %vm9454_vm0 }
 0xe60   : > { %6712 = vmatmul.mubr.msk.bf16.vlgmr.msra.gmra.mxu1 %vm3677_vm3, %v7359_v38  ;;  %vm9463_vm3 = vcmask 7168  }
 0xf20   : > { %v8632_v14 = vpop.f32.mrf.mxu1 }
 0xf21   : > { %v3880_v30 = vmul.f32 %v8632_v14, %v7635_v31  ;;  %v3832_v26 = vmul.f32 %v8632_v14, %v7651_v39  ;;  %v3993_v54 = vmul.f32 %v8632_v14, %v7613_v20  ;;  %v3945_v51 = vmul.f32 %v8632_v14, %v7615_v21 }
 0xf22   : > { %v8636_v45 = vpop.f32.mrf.mxu1  ;;  %v7089_v43 = vpack.c.bf16 %v8632_v14, %v9445_v16  ;;  %v3742_v38 = vmul.f32 %v8632_v14, %v7739_v34 }
 0xf23   : > { %v7097_v5 = vpack.c.bf16 %v3880_v30, %v7639_v33  ;;  %v7101_v19 = vpack.c.bf16 %v8636_v45, %v8632_v14  ;;  %v3881_v37 = vmul.f32 %v8636_v45, %v7629_v29  ;;  %v7093_v1 = vpack.c.bf16 %v3832_v26, %v7656_v42 }
 0xf24   : > { %v3994_v48 = vmul.f32 %v8636_v45, %v7665_v46  ;;  %v3833_v6 = vmul.f32 %v8636_v45, %v7641_v35  ;;  %v8652_v61 = vpop.f32.mrf.mxu1  ;;  %v3946_v22 = vmul.f32 %v8636_v45, %v7680_v52  ;;  %v7090_v63 = vpack.c.bf16 %v8636_v45, %v8636_v45 }
 0xf25   : > { %3901 = vrot.lane.b32.xlu0 %v7097_v5, %s7454_s30  ;;  %4057 = vrot.lane.b32.xlu1 %v7101_v19, %s7460_s20  ;;  %v7098_v50 = vpack.c.bf16 %v3881_v37, %v3881_v37  ;;  %v3883_v59 = vmul.f32 %v8652_v61, %v7635_v31  ;;  %v3835_v15 = vmul.f32 %v8652_v61, %v7651_v39 }
 0xf26   : > { %v7107_v8 = vpack.c.bf16 %v3994_v48, %v3993_v54  ;;  %v7094_v12 = vpack.c.bf16 %v3833_v6, %v3833_v6  ;;  %v8660_v53 = vpop.f32.mrf.mxu1  ;;  %v7103_v57 = vpack.c.bf16 %v3946_v22, %v3945_v51  ;;  %v3743_v23 = vmul.f32 %v8636_v45, %v7687_v56  ;;  %v7362_v54 = vld [vmem:[%s9410_s10 + $0x4] ss:$8 sps:$4 sm:$0xff]   ;;  %v4064_v22 = vpop.permute.xlu1 %4063 }
 0xf27   : > { %v7102_v0 = vpack.c.bf16 %v8660_v53, %v8652_v61  ;;  %v7099_v7 = vpack.c.bf16 %v3883_v59, %v7639_v33  ;;  %v7095_v17 = vpack.c.bf16 %v3835_v15, %v7656_v42  ;;  %v7092_v62 = vpack.c.bf16 %v8660_v53, %v8660_v53  ;;  %6767 = vmatprep.mubr.msk.bf16.mxu0 %vm9448_vm4, %v7362_v54  ;;  %v4060_v59 = vpop.permute.xlu0 %4059  ;;  %vm9464_vm4 = vmmov %vm9454_vm0 }
 0xf28   : > { %v3997_v60 = vmul.f32 %v8660_v53, %v7665_v46  ;;  %v3996_v10 = vmul.f32 %v8652_v61, %v7613_v20  ;;  %v7086_v3 = vpack.c.bf16 %v3743_v23, %v3743_v23  ;;  %v3949_v41 = vmul.f32 %v8660_v53, %v7680_v52 }
 0xf29   : > { %3853 = vrot.lane.b32.xlu0 %v7093_v1, %s7453_s29  ;;  %3903 = vrot.lane.b32.xlu1 %v7098_v50, %s7454_s30  ;;  %v3884_v58 = vmul.f32 %v8660_v53, %v7629_v29  ;;  %v3948_v55 = vmul.f32 %v8652_v61, %v7615_v21  ;;  %v3836_v18 = vmul.f32 %v8660_v53, %v7641_v35 }
 0xf2a   : > { %v7109_v13 = vpack.c.bf16 %v3997_v60, %v3996_v10  ;;  %v7091_v32 = vpack.c.bf16 %v8652_v61, %v9445_v16  ;;  %v3746_v30 = vmul.f32 %v8660_v53, %v7687_v56  ;;  %v7085_v5 = vpack.c.bf16 %v3742_v38, %v7742_v36  ;;  %v4018_v51 = vpop.permute.xlu1 %4017 }
 0xf2b   : > { %v7105_v47 = vpack.c.bf16 %v3949_v41, %v3948_v55  ;;  %v7100_v9 = vpack.c.bf16 %v3884_v58, %v3884_v58  ;;  %v7096_v49 = vpack.c.bf16 %v3836_v18, %v3836_v18  ;;  %v3745_v26 = vmul.f32 %v8652_v61, %v7739_v34 }
 0xf2c   : > { %v7088_v19 = vpack.c.bf16 %v3746_v30, %v3746_v30  ;;  %v4084_v1 = vmul.f32 %v8636_v45, %v7760_v44  ;;  %v4083_v50 = vmul.f32 %v8632_v14, %v7750_v40  ;;  %v4087_v6 = vmul.f32 %v8660_v53, %v7760_v44 }
 0xf2d   : > { %4015 = vrot.lane.b32.xlu0 %v7107_v8, %s7456_s17  ;;  %3855 = vrot.lane.b32.xlu1 %v7094_v12, %s7453_s29  ;;  %v7087_v37 = vpack.c.bf16 %v3745_v26, %v7742_v36  ;;  %v4086_v8 = vmul.f32 %v8652_v61, %v7750_v40  ;;  %v4068_v58 = vrot.slane %v4064_v22, 4 }
 0xf2e   : > { %v7115_v48 = vpack.c.bf16 %v4084_v1, %v4083_v50 }
 0xf2f   : > { %v7117_v12 = vpack.c.bf16 %v4087_v6, %v4086_v8 }
 0xf31   : > { %3967 = vrot.lane.b32.xlu0 %v7103_v57, %s7455_s0  ;;  %4061 = vrot.lane.b32.xlu1 %v7102_v0, %s7460_s20  ;;  %v4022_v57 = vpop.permute.xlu1 %4021 }
 0xf32   : > { %v4026_v6 = vrot.slane %v4022_v57, 4 }
 0xf35   : > { %3905 = vrot.lane.b32.xlu0 %v7099_v7, %s7454_s30  ;;  %3807 = vrot.lane.b32.xlu1 %v7090_v63, %s7461_s23  ;;  %v3970_v0 = vpop.permute.xlu1 %3969 }
 0xf39   : > { %3857 = vrot.lane.b32.xlu0 %v7095_v17, %s7453_s29  ;;  %3811 = vrot.lane.b32.xlu1 %v7092_v62, %s7461_s23  ;;  %v3974_v7 = vpop.permute.xlu1 %3973 }
 0xf3d   : > { %4019 = vrot.lane.b32.xlu0 %v7109_v13, %s7456_s17  ;;  %3765 = vrot.lane.b32.xlu1 %v7086_v3, %s7458_s19  ;;  %v4066_v13 = vrot.slane %v4060_v59, 4  ;;  %v3978_v59 = vrot.slane %v3974_v7, 4 }
 0xf41   : > { %3971 = vrot.lane.b32.xlu0 %v7105_v47, %s7455_s0  ;;  %3907 = vrot.lane.b32.xlu1 %v7100_v9, %s7454_s30 }
 0xf45   : > { %3805 = vrot.lane.b32.xlu0 %v7089_v43, %s7461_s23  ;;  %3859 = vrot.lane.b32.xlu1 %v7096_v49, %s7453_s29 }
 0xf49   : > { %3809 = vrot.lane.b32.xlu0 %v7091_v32, %s7461_s23  ;;  %4107 = vrot.lane.b32.xlu1 %v7713_v11, %s9447_s18 }
 0xf4d   : > { %3763 = vrot.lane.b32.xlu0 %v7085_v5, %s7458_s19  ;;  %3769 = vrot.lane.b32.xlu1 %v7088_v19, %s7458_s19 }
 0xf51   : > { %3767 = vrot.lane.b32.xlu0 %v7087_v37, %s7458_s19  ;;  %4111 = vrot.lane.b32.xlu1 %v7713_v11, %s9447_s18  ;;  %v4024_v37 = vrot.slane %v4018_v51, 4 }
 0xf55   : > { %4105 = vrot.lane.b32.xlu0 %v7115_v48, %s9447_s18  ;;  %4628 = vrot.lane.b32.xlu1 %v9444_v4, %s7460_s20 }
 0xf59   : > { %4109 = vrot.lane.b32.xlu0 %v7117_v12, %s9447_s18  ;;  %4632 = vrot.lane.b32.xlu1 %v9444_v4, %s7460_s20  ;;  %v3976_v12 = vrot.slane %v3970_v0, 4 }
 0xf5d   : > { %4586 = vrot.lane.b32.xlu1 %v7617_v24, %s7456_s17 }
 0xf61   : > { %4590 = vrot.lane.b32.xlu1 %v7617_v24, %s7456_s17 }
 0xf65   : > { %4538 = vrot.lane.b32.xlu1 %v7621_v27, %s7455_s0 }
 0xf69   : > { %4542 = vrot.lane.b32.xlu1 %v7621_v27, %s7455_s0 }
 0xf97   : > { %v8750_v63 = vpop.permute.xlu0 %3901  ;;  %v4058_v15 = vpop.permute.xlu1 %4057 }
 0xf98   : > { %v4065_v10 = vrot.slane %v4058_v15, 4  ;;  %v3909_v0 = vrot.slane %v8750_v63, 4 }
 0xf9a   : > { %v4069_v55 = vsel %vm9449_vm6, %v4065_v10, %v4066_v13  ;;  %vm9465_vm6 = vmmov %vm9463_vm3 }
 0xf9b   : > { %v8752_v17 = vpop.permute.xlu0 %3853  ;;  %v3904_v62 = vpop.permute.xlu1 %3903  ;;  %v4070_v18 = vsel %vm9451_vm10, %v4058_v15, %v4069_v55  ;;  %vm9467_vm10 = vcmask 121856  }
 0xf9c   : > { %v3910_v57 = vrot.slane %v3904_v62, 4 }
 0xf9e   : > { %v3913_v62 = vsel %vm9462_vm5, %v3909_v0, %v3910_v57  ;;  %vm9477_vm5 = vmmov %vm9454_vm0 }
 0xf9f   : > { %v4016_v60 = vpop.permute.xlu0 %4015  ;;  %v8754_v23 = vpop.permute.xlu1 %3855 }
 0xfa0   : > { %v4023_v26 = vrot.slane %v4016_v60, 4 }
 0xfa2   : > { %v4027_v54 = vsel %vm9453_vm7, %v4023_v26, %v4024_v37  ;;  %vm9469_vm7 = vmmov %vm9467_vm10 }
 0xfa3   : > { %v3968_v3 = vpop.permute.xlu0 %3967  ;;  %v4062_v41 = vpop.permute.xlu1 %4061  ;;  %v4028_v15 = vsel %vm9455_vm14, %v4016_v60, %v4027_v54  ;;  %vm9470_vm14 = vcmask 130048  }
 0xfa4   : > { %v4067_v47 = vrot.slane %v4062_v41, 4  ;;  %v3975_v1 = vrot.slane %v3968_v3, 4 }
 0xfa6   : > { %v4071_v9 = vsel %vm9450_vm9, %v4067_v47, %v4068_v58  ;;  %v3979_v10 = vsel %vm9456_vm12, %v3975_v1, %v3976_v12  ;;  %vm9466_vm9 = vmmov %vm9454_vm0 }
 0xfa7   : > { %v4072_v43 = vsel %vm9452_vm11, %v4062_v41, %v4071_v9  ;;  %v3906_v49 = vpop.permute.xlu0 %3905  ;;  %v8760_v32 = vpop.permute.xlu1 %3807  ;;  %v3980_v7 = vsel %vm9459_vm2, %v3968_v3, %v3979_v10  ;;  %vm9468_vm11 = vmmov %vm9454_vm0  ;;  %vm9474_vm2 = vcmask 138240  }
 0xfa8   : > { %v6763_v38 = vcombine.low %v4070_v18, %v4072_v43  ;;  %v6764_v30 = vcombine.high %v4070_v18, %v4072_v43  ;;  %v3911_v18 = vrot.slane %v3906_v49, 4  ;;  %vm9471_vm12 = vmmov %vm9470_vm14 }
 0xfaa   : > { %4245 = vmatprep.subr.bf16.mxu0 %v6764_v30 }
 0xfab   : > { %v3858_v5 = vpop.permute.xlu0 %3857  ;;  %4246 = vmatpush1.bf16.msra.mxu0 %v6763_v38  ;;  %v3812_v19 = vpop.permute.xlu1 %3811 }
 0xfac   : > { %v3863_v54 = vrot.slane %v3858_v5, 4 }
 0xfaf   : > { %v4020_v50 = vpop.permute.xlu0 %4019  ;;  %v8762_v48 = vpop.permute.xlu1 %3765 }
 0xfb0   : > { %v4025_v8 = vrot.slane %v4020_v50, 4 }
 0xfb2   : > { %v4029_v22 = vsel %vm9454_vm0, %v4025_v8, %v4026_v6  ;;  %v3862_v6 = vrot.slane %v8754_v23, 4  ;;  %v7230_v8 = vpack.c.bf16 %v8660_v53, %v8636_v45  ;;  %v3914_v23 = vsel %vm9465_vm6, %v8750_v63, %v3913_v62 }
 0xfb3   : > { %v4030_v13 = vsel %vm9457_vm13, %v4020_v50, %v4029_v22  ;;  %v3972_v41 = vpop.permute.xlu0 %3971  ;;  %v3908_v51 = vpop.permute.xlu1 %3907  ;;  %vm9472_vm13 = vmmov %vm9454_vm0  ;;  %vm9480_vm6 = vmmov 0  }
 0xfb4   : > { %v6761_v58 = vcombine.low %v4028_v15, %v4030_v13  ;;  %v3977_v55 = vrot.slane %v3972_v41, 4  ;;  %v3912_v47 = vrot.slane %v3908_v51, 4  ;;  %v6762_v9 = vcombine.high %v4028_v15, %v4030_v13 }
 0xfb5   : > { %v7229_v13 = vpack.c.bf16 %v8652_v61, %v8632_v14  ;;  %v3816_v51 = vrot.slane %v3812_v19, 4 }
 0xfb6   : > { %v3981_v43 = vsel %vm9458_vm15, %v3977_v55, %v3978_v59  ;;  %4247 = vmatprep.subr.bf16.mxu0 %v6762_v9  ;;  %v3915_v37 = vsel %vm9461_vm1, %v3911_v18, %v3912_v47  ;;  %v3861_v59 = vrot.slane %v8752_v17, 4  ;;  %v3814_v9 = vrot.slane %v8760_v32, 4  ;;  %vm9473_vm15 = vmmov %vm9454_vm0 }
 0xfb7   : > { %v3982_v60 = vsel %vm9460_vm8, %v3972_v41, %v3981_v43  ;;  %v3806_v38 = vpop.permute.xlu0 %3805  ;;  %4248 = vmatpush1.bf16.msra.mxu0 %v6761_v58  ;;  %v3860_v30 = vpop.permute.xlu1 %3859  ;;  %v3916_v22 = vsel %vm9463_vm3, %v3906_v49, %v3915_v37  ;;  %vm9475_vm8 = vmmov %vm9474_vm2  ;;  %vm9478_vm3 = vcmask 908288  }
 0xfb8   : > { %v6759_v26 = vcombine.low %v3980_v7, %v3982_v60  ;;  %v3864_v1 = vrot.slane %v3860_v30, 4  ;;  %v6760_v50 = vcombine.high %v3980_v7, %v3982_v60  ;;  %v3865_v41 = vsel %vm9466_vm9, %v3861_v59, %v3862_v6  ;;  %vm9476_vm1 = vmmov %vm9454_vm0 }
 0xfb9   : > { %v3813_v58 = vrot.slane %v3806_v38, 4  ;;  %v6756_v55 = vcombine.high %v3914_v23, %v3916_v22  ;;  %v6755_v43 = vcombine.low %v3914_v23, %v3916_v22  ;;  %v3866_v0 = vsel %vm9469_vm7, %v8752_v17, %v3865_v41 }
 0xfba   : > { %4249 = vmatprep.subr.bf16.mxu0 %v6760_v50  ;;  %v3867_v15 = vsel %vm9464_vm4, %v3863_v54, %v3864_v1  ;;  %vm9479_vm4 = vmmov %vm9478_vm3 }
 0xfbb   : > { %v3810_v3 = vpop.permute.xlu0 %3809  ;;  %4250 = vmatpush1.bf16.msra.mxu0 %v6759_v26  ;;  %v4108_v12 = vpop.permute.xlu1 %4107  ;;  %v3868_v49 = vsel %vm9467_vm10, %v3858_v5, %v3867_v15  ;;  %v3817_v63 = vsel %vm9454_vm0, %v3813_v58, %v3814_v9  ;;  %v3772_v5 = vrot.slane %v8762_v48, 4  ;;  %vm9481_vm0 = vmmov %vm9471_vm12 }
 0xfbc   : > { %v3815_v10 = vrot.slane %v3810_v3, 4  ;;  %4251 = vmatprep.subr.bf16.mxu0 %v7230_v8  ;;  %v6754_v19 = vcombine.high %v3866_v0, %v3868_v49  ;;  %v3818_v37 = vsel %vm9471_vm12, %v3806_v38, %v3817_v63  ;;  %v6753_v1 = vcombine.low %v3866_v0, %v3868_v49  ;;  %vm9483_vm12 = vmmov %vm9476_vm1 }
 0xfbd   : > { %v4114_v59 = vrot.slane %v4108_v12, 4  ;;  %v7360_v12 = vld [vmem:[%s9410_s10] ss:$8 sps:$4 sm:$0xff]  }
 0xfbe   : > { %v3819_v57 = vsel %vm9468_vm11, %v3815_v10, %v3816_v51 }
 0xfbf   : > { %v3764_v47 = vpop.permute.xlu0 %3763  ;;  %4252 = vmatpush1.bf16.msra.mxu0 %v7229_v13  ;;  %v3770_v18 = vpop.permute.xlu1 %3769  ;;  %v3820_v60 = vsel %vm9470_vm14, %v3810_v3, %v3819_v57  ;;  %vm9482_vm14 = vmmov %vm9476_vm1 }
 0xfc0   : > { %4253 = vmatprep.subr.bf16.mxu0 %v6756_v55  ;;  %v3771_v7 = vrot.slane %v3764_v47, 4  ;;  %v3774_v26 = vrot.slane %v3770_v18, 4  ;;  %v6752_v62 = vcombine.high %v3818_v37, %v3820_v60  ;;  %v6751_v3 = vcombine.low %v3818_v37, %v3820_v60 }
 0xfc2   : > { %v3775_v50 = vsel %vm9472_vm13, %v3771_v7, %v3772_v5  ;;  %vm9484_vm13 = vcmask 916480  }
 0xfc3   : > { %v3768_v30 = vpop.permute.xlu0 %3767  ;;  %4254 = vmatpush1.bf16.msra.mxu0 %v6755_v43  ;;  %v3776_v48 = vsel %vm9475_vm8, %v3764_v47, %v3775_v50  ;;  %v4112_v22 = vpop.permute.xlu1 %4111  ;;  %vm9487_vm8 = vmmov %vm9476_vm1 }
 0xfc4   : > { %v3773_v32 = vrot.slane %v3768_v30, 4  ;;  %4255 = vmatprep.subr.bf16.mxu0 %v6754_v19  ;;  %v4116_v38 = vrot.slane %v4112_v22, 4 }
 0xfc6   : > { %v3777_v17 = vsel %vm9473_vm15, %v3773_v32, %v3774_v26  ;;  %vm9485_vm15 = vmmov %vm9484_vm13 }
 0xfc7   : > { %v3778_v6 = vsel %vm9474_vm2, %v3768_v30, %v3777_v17  ;;  %v4106_v54 = vpop.permute.xlu0 %4105  ;;  %4256 = vmatpush1.bf16.msra.mxu0 %v6753_v1  ;;  %vm9486_vm2 = vmmov %vm9476_vm1 }
 0xfc8   : > { %v4113_v8 = vrot.slane %v4106_v54, 4  ;;  %4257 = vmatprep.subr.bf16.mxu0 %v6752_v62  ;;  %v6750_v15 = vcombine.high %v3776_v48, %v3778_v6  ;;  %v6749_v41 = vcombine.low %v3776_v48, %v3778_v6 }
 0xfca   : > { %v4117_v13 = vsel %vm9476_vm1, %v4113_v8, %v4114_v59  ;;  %vm9488_vm1 = vcmask 924672  }
 0xfcb   : > { %v4110_v10 = vpop.permute.xlu0 %4109  ;;  %4258 = vmatpush1.bf16.msra.mxu0 %v6751_v3  ;;  %v4118_v58 = vsel %vm9478_vm3, %v4106_v54, %v4117_v13  ;;  %vm9490_vm3 = vmmov %vm9488_vm1 }
 0xfcc   : > { %v4115_v23 = vrot.slane %v4110_v10, 4  ;;  %4259 = vmatprep.subr.bf16.mxu0 %v6750_v15 }
 0xfce   : > { %v4119_v51 = vsel %vm9477_vm5, %v4115_v23, %v4116_v38  ;;  %vm9489_vm5 = vmmov %vm9486_vm2 }
 0xfcf   : > { %v4120_v55 = vsel %vm9479_vm4, %v4110_v10, %v4119_v51  ;;  %4260 = vmatpush1.bf16.msra.mxu0 %v6749_v41  ;;  %vm9491_vm4 = vmmov %vm9486_vm2 }
 0xfd0   : > { %v6765_v49 = vcombine.low %v4118_v58, %v4120_v55  ;;  %v6766_v47 = vcombine.high %v4118_v58, %v4120_v55 }
 0xfd2   : > { %4275 = vmatprep.subr.bf16.mxu0 %v6766_v47 }
 0xfd3   : > { %4276 = vmatpush2.bf16.msra.mxu0 %v6765_v49 }
 0xfd4   : > { %7277 = vmatprep.subr.bf16.mxu0 %v9445_v16 }
 0xfd6   : > { %4278 = vmatmul.mubr.bf16.vlgmr.msra.gmra.mxu0 %v7360_v12 }
 0xfd7   : > { %7279 = vmatprep.mubr.msk.bf16.mxu0 %vm9480_vm6, %v9445_v16 }
0x1096   : > { %v4279_v9 = vpop.f32.mrf.mxu0 }
0x1097   : > { %vm4288_vm9 = vcmp.ge.f32.partialorder %v4279_v9, 0.0  ;;  %v4292_v57 = vmul.f32 0.25, %v4279_v9 }
0x1098   : > { %v4281_v18 = vpop.f32.mrf.mxu0 }
0x1099   : > { %v8809_v43 = vsel %vm4288_vm9, %v4279_v9, %v4292_v57  ;;  %vm4289_vm10 = vcmp.ge.f32.partialorder %v4281_v18, 0.0  ;;  %v4293_v0 = vmul.f32 0.25, %v4281_v18  ;;  %vm9492_vm9 = vcmask 1039360  }
0x109a   : > { %v4283_v63 = vpop.f32.mrf.mxu0  ;;  %v4449_v30 = vmul.f32 %v8809_v43, %v7635_v31  ;;  %v4401_v17 = vmul.f32 %v8809_v43, %v7651_v39  ;;  %v4562_v22 = vmul.f32 %v8809_v43, %v7613_v20  ;;  %v4514_v23 = vmul.f32 %v8809_v43, %v7615_v21 }
0x109b   : > { %v8811_v7 = vsel %vm4289_vm10, %v4281_v18, %v4293_v0  ;;  %v4294_v37 = vmul.f32 0.25, %v4283_v63  ;;  %vm4290_vm11 = vcmp.ge.f32.partialorder %v4283_v63, 0.0  ;;  %vm9493_vm10 = vmmov %vm9492_vm9 }
0x109c   : > { %v7135_v19 = vpack.c.bf16 %v8811_v7, %v8809_v43  ;;  %v4450_v60 = vmul.f32 %v8811_v7, %v7629_v29  ;;  %v4285_v5 = vpop.f32.mrf.mxu0  ;;  %v4402_v32 = vmul.f32 %v8811_v7, %v7641_v35  ;;  %v7131_v50 = vpack.c.bf16 %v4449_v30, %v7639_v33 }
0x109d   : > { %v4295_v1 = vmul.f32 0.25, %v4285_v5  ;;  %vm4291_vm7 = vcmp.ge.f32.partialorder %v4285_v5, 0.0  ;;  %v8827_v6 = vsel %vm4290_vm11, %v4283_v63, %v4294_v37  ;;  %v7127_v8 = vpack.c.bf16 %v4401_v17, %v7656_v42  ;;  %vm9494_vm11 = vmmov %vm9486_vm2 }
0x109e   : > { %4626 = vrot.lane.b32.xlu0 %v7135_v19, %s7460_s20  ;;  %v7132_v26 = vpack.c.bf16 %v4450_v60, %v4450_v60  ;;  %v7128_v62 = vpack.c.bf16 %v4402_v32, %v4402_v32  ;;  %v4563_v3 = vmul.f32 %v8811_v7, %v7665_v46  ;;  %v7124_v48 = vpack.c.bf16 %v8811_v7, %v8811_v7 }
0x109f   : > { %v8829_v54 = vsel %vm4291_vm7, %v4285_v5, %v4295_v1  ;;  %v4515_v38 = vmul.f32 %v8811_v7, %v7680_v52  ;;  %v4312_v41 = vmul.f32 %v8811_v7, %v7687_v56  ;;  %v4452_v47 = vmul.f32 %v8827_v6, %v7635_v31  ;;  %vm9495_vm7 = vmmov %vm9486_vm2 }
0x10a0   : > { %4472 = vrot.lane.b32.xlu1 %v7132_v26, %s7454_s30  ;;  %v7141_v10 = vpack.c.bf16 %v4563_v3, %v4562_v22  ;;  %v7126_v13 = vpack.c.bf16 %v8829_v54, %v8829_v54  ;;  %v4453_v55 = vmul.f32 %v8829_v54, %v7629_v29  ;;  %v7136_v49 = vpack.c.bf16 %v8829_v54, %v8827_v6 }
0x10a1   : > { %v7137_v51 = vpack.c.bf16 %v4515_v38, %v4514_v23  ;;  %v7120_v58 = vpack.c.bf16 %v4312_v41, %v4312_v41  ;;  %v4405_v9 = vmul.f32 %v8829_v54, %v7641_v35  ;;  %v7133_v57 = vpack.c.bf16 %v4452_v47, %v7639_v33  ;;  %v7363_v23 = vld [vmem:[%s9411_s11 + $0x4] ss:$8 sps:$4 sm:$0xff]  }
0x10a2   : > { %4470 = vrot.lane.b32.xlu0 %v7131_v50, %s7454_s30  ;;  %v7134_v12 = vpack.c.bf16 %v4453_v55, %v4453_v55  ;;  %v4404_v18 = vmul.f32 %v8827_v6, %v7651_v39  ;;  %v4566_v19 = vmul.f32 %v8829_v54, %v7665_v46  ;;  %v4565_v60 = vmul.f32 %v8827_v6, %v7613_v20 }
0x10a3   : > { %v7130_v0 = vpack.c.bf16 %v4405_v9, %v4405_v9  ;;  %v4315_v30 = vmul.f32 %v8829_v54, %v7687_v56  ;;  %v4518_v26 = vmul.f32 %v8829_v54, %v7680_v52  ;;  %v4517_v37 = vmul.f32 %v8827_v6, %v7615_v21  ;;  %6822 = vmatprep.mubr.msk.bf16.mxu1 %vm9481_vm0, %v7363_v23 }
0x10a4   : > { %4424 = vrot.lane.b32.xlu1 %v7128_v62, %s7453_s29  ;;  %v7129_v63 = vpack.c.bf16 %v4404_v18, %v7656_v42  ;;  %v7143_v5 = vpack.c.bf16 %v4566_v19, %v4565_v60  ;;  %v7123_v50 = vpack.c.bf16 %v8809_v43, %v9445_v16  ;;  %v7125_v17 = vpack.c.bf16 %v8827_v6, %v9445_v16 }
0x10a5   : > { %v7122_v32 = vpack.c.bf16 %v4315_v30, %v4315_v30  ;;  %v7139_v1 = vpack.c.bf16 %v4518_v26, %v4517_v37  ;;  %v4311_v62 = vmul.f32 %v8809_v43, %v7739_v34  ;;  %v4314_v3 = vmul.f32 %v8827_v6, %v7739_v34 }
0x10a6   : > { %4422 = vrot.lane.b32.xlu0 %v7127_v8, %s7453_s29  ;;  %v4653_v22 = vmul.f32 %v8811_v7, %v7760_v44  ;;  %v4655_v41 = vmul.f32 %v8827_v6, %v7750_v40  ;;  %vm9496_vm0 = vcmask 7168  }
0x10a7   : > { %v7119_v8 = vpack.c.bf16 %v4311_v62, %v7742_v36 }
0x10a8   : > { %4376 = vrot.lane.b32.xlu1 %v7124_v48, %s7461_s23  ;;  %v7121_v48 = vpack.c.bf16 %v4314_v3, %v7742_v36 }
0x10aa   : > { %4584 = vrot.lane.b32.xlu0 %v7141_v10, %s7456_s17  ;;  %v4652_v10 = vmul.f32 %v8809_v43, %v7750_v40 }
0x10ac   : > { %4380 = vrot.lane.b32.xlu1 %v7126_v13, %s7461_s23  ;;  %v7149_v38 = vpack.c.bf16 %v4653_v22, %v4652_v10  ;;  %v4656_v13 = vmul.f32 %v8829_v54, %v7760_v44 }
0x10ae   : > { %4536 = vrot.lane.b32.xlu0 %v7137_v51, %s7455_s0  ;;  %v7151_v51 = vpack.c.bf16 %v4656_v13, %v4655_v41 }
0x10b0   : > { %4334 = vrot.lane.b32.xlu1 %v7120_v58, %s7458_s19  ;;  %v4629_v58 = vpop.permute.xlu1 %4628 }
0x10b1   : > { %v4635_v26 = vrot.slane %v4629_v58, 4 }
0x10b2   : > { %4630 = vrot.lane.b32.xlu0 %v7136_v49, %s7460_s20 }
0x10b4   : > { %4476 = vrot.lane.b32.xlu1 %v7134_v12, %s7454_s30  ;;  %v4633_v55 = vpop.permute.xlu1 %4632 }
0x10b6   : > { %4474 = vrot.lane.b32.xlu0 %v7133_v57, %s7454_s30 }
0x10b8   : > { %4428 = vrot.lane.b32.xlu1 %v7130_v0, %s7453_s29  ;;  %v4587_v49 = vpop.permute.xlu1 %4586 }
0x10ba   : > { %4426 = vrot.lane.b32.xlu0 %v7129_v63, %s7453_s29 }
0x10bc   : > { %4676 = vrot.lane.b32.xlu1 %v7713_v11, %s9447_s18  ;;  %v4591_v47 = vpop.permute.xlu1 %4590 }
0x10be   : > { %4588 = vrot.lane.b32.xlu0 %v7143_v5, %s7456_s17 }
0x10c0   : > { %4338 = vrot.lane.b32.xlu1 %v7122_v32, %s7458_s19  ;;  %v4539_v12 = vpop.permute.xlu1 %4538 }
0x10c2   : > { %4540 = vrot.lane.b32.xlu0 %v7139_v1, %s7455_s0 }
0x10c4   : > { %4680 = vrot.lane.b32.xlu1 %v7713_v11, %s9447_s18  ;;  %v4543_v9 = vpop.permute.xlu1 %4542 }
0x10c6   : > { %4374 = vrot.lane.b32.xlu0 %v7123_v50, %s7461_s23  ;;  %v4637_v50 = vrot.slane %v4633_v55, 4 }
0x10ca   : > { %4378 = vrot.lane.b32.xlu0 %v7125_v17, %s7461_s23 }
0x10ce   : > { %4332 = vrot.lane.b32.xlu0 %v7119_v8, %s7458_s19 }
0x10d2   : > { %4336 = vrot.lane.b32.xlu0 %v7121_v48, %s7458_s19 }
0x10d6   : > { %4674 = vrot.lane.b32.xlu0 %v7149_v38, %s9447_s18 }
0x10da   : > { %4678 = vrot.lane.b32.xlu0 %v7151_v51, %s9447_s18  ;;  %v4593_v51 = vrot.slane %v4587_v49, 4 }
0x1110   : > { %v4627_v57 = vpop.permute.xlu0 %4626 }
0x1111   : > { %v4634_v32 = vrot.slane %v4627_v57, 4 }
0x1112   : > { %v4473_v18 = vpop.permute.xlu1 %4472 }
0x1113   : > { %v4638_v17 = vsel %vm9482_vm14, %v4634_v32, %v4635_v26  ;;  %v4595_v32 = vrot.slane %v4591_v47, 4  ;;  %vm9497_vm14 = vmmov %vm9486_vm2 }
0x1114   : > { %v8919_v0 = vpop.permute.xlu0 %4470  ;;  %v4639_v3 = vsel %vm9484_vm13, %v4627_v57, %v4638_v17  ;;  %v4545_v57 = vrot.slane %v4539_v12, 4  ;;  %v4547_v17 = vrot.slane %v4543_v9, 4  ;;  %vm9500_vm13 = vmmov %vm9486_vm2 }
0x1115   : > { %v4478_v47 = vrot.slane %v8919_v0, 4 }
0x1116   : > { %v8921_v63 = vpop.permute.xlu1 %4424 }
0x1118   : > { %v8923_v19 = vpop.permute.xlu0 %4422 }
0x111a   : > { %v8925_v30 = vpop.permute.xlu1 %4376 }
0x111c   : > { %v4585_v60 = vpop.permute.xlu0 %4584 }
0x111d   : > { %v4592_v41 = vrot.slane %v4585_v60, 4 }
0x111e   : > { %v8927_v37 = vpop.permute.xlu1 %4380 }
0x1120   : > { %v4537_v5 = vpop.permute.xlu0 %4536 }
0x1121   : > { %v4544_v58 = vrot.slane %v4537_v5, 4 }
0x1122   : > { %v8933_v13 = vpop.permute.xlu1 %4334 }
0x1124   : > { %v4631_v1 = vpop.permute.xlu0 %4630 }
0x1125   : > { %v4636_v62 = vrot.slane %v4631_v1, 4 }
0x1126   : > { %v4477_v55 = vpop.permute.xlu1 %4476 }
0x1127   : > { %v4640_v8 = vsel %vm9483_vm12, %v4636_v62, %v4637_v50  ;;  %v4596_v50 = vsel %vm9486_vm2, %v4592_v41, %v4593_v51  ;;  %v4481_v41 = vrot.slane %v4477_v55, 4  ;;  %v4479_v51 = vrot.slane %v4473_v18, 4  ;;  %vm9499_vm12 = vmmov %vm9496_vm0 }
0x1128   : > { %v4641_v48 = vsel %vm9485_vm15, %v4631_v1, %v4640_v8  ;;  %v4475_v22 = vpop.permute.xlu0 %4474  ;;  %v4597_v8 = vsel %vm9488_vm1, %v4585_v60, %v4596_v50  ;;  %vm9501_vm15 = vcmask 121856   ;;  %vm9504_vm1 = vmmov %vm9486_vm2 }
0x1129   : > { %v6818_v10 = vcombine.low %v4639_v3, %v4641_v48  ;;  %v6819_v38 = vcombine.high %v4639_v3, %v4641_v48  ;;  %v4548_v3 = vsel %vm9489_vm5, %v4544_v58, %v4545_v57  ;;  %v4482_v57 = vsel %vm9495_vm7, %v4478_v47, %v4479_v51  ;;  %vm9511_vm7 = vmmov %vm9504_vm1 }
0x112a   : > { %v4429_v2 = vpop.permute.xlu1 %4428  ;;  %v4549_v9 = vsel %vm9492_vm9, %v4537_v5, %v4548_v3  ;;  %v4431_v5 = vrot.slane %v8921_v63, 4  ;;  %v9498_v3 = vpack.c.bf16 %v8829_v54, %v8811_v7  ;;  %v9502_v63 = vpack.c.bf16 %v8827_v6, %v8809_v43  ;;  %vm9508_vm9 = vmmov %vm9504_vm1 }
0x112b   : > { %4814 = vmatprep.subr.bf16.mxu1 %v6819_v38  ;;  %v4480_v38 = vrot.slane %v4475_v22, 4  ;;  %v4433_v55 = vrot.slane %v4429_v2, 4  ;;  %vm9505_vm5 = vcmask 130048   ;;  %v4341_v43 = vrot.slane %v8933_v13, 4 }
0x112c   : > { %v4427_v23 = vpop.permute.xlu0 %4426  ;;  %4815 = vmatpush1.bf16.msra.mxu1 %v6818_v10 }
0x1130   : > { %v4589_v26 = vpop.permute.xlu0 %4588 }
0x1131   : > { %v4594_v62 = vrot.slane %v4589_v26, 4 }
0x1133   : > { %v4598_v1 = vsel %vm9487_vm8, %v4594_v62, %v4595_v32  ;;  %v4432_v32 = vrot.slane %v4427_v23, 4  ;;  %vm9503_vm8 = vmmov %vm9501_vm15 }
0x1134   : > { %v4599_v48 = vsel %vm9490_vm3, %v4589_v26, %v4598_v1  ;;  %v4541_v10 = vpop.permute.xlu0 %4540  ;;  %v4484_v26 = vsel %vm9494_vm11, %v4480_v38, %v4481_v41  ;;  %v4430_v1 = vrot.slane %v8923_v19, 4  ;;  %v4383_v41 = vrot.slane %v8925_v30, 4  ;;  %vm9506_vm3 = vmmov %vm9505_vm5 }
0x1135   : > { %v6816_v49 = vcombine.low %v4597_v8, %v4599_v48  ;;  %v6817_v15 = vcombine.high %v4597_v8, %v4599_v48  ;;  %v4546_v59 = vrot.slane %v4541_v10, 4  ;;  %v4483_v48 = vsel %vm9499_vm12, %v8919_v0, %v4482_v57 }
0x1136   : > { %v4434_v2 = vsel %vm9500_vm13, %v4430_v1, %v4431_v5  ;;  %vm9515_vm13 = vmmov %vm9506_vm3 }
0x1137   : > { %v4550_v12 = vsel %vm9491_vm4, %v4546_v59, %v4547_v17  ;;  %4816 = vmatprep.subr.bf16.mxu1 %v6817_v15  ;;  %v4485_v59 = vsel %vm9496_vm0, %v4475_v22, %v4484_v26  ;;  %v4677_v15 = vpop.permute.xlu1 %4676  ;;  %v4436_v17 = vsel %vm9497_vm14, %v4432_v32, %v4433_v55  ;;  %v4435_v54 = vsel %vm9503_vm8, %v8923_v19, %v4434_v2  ;;  %vm9507_vm4 = vmmov %vm9504_vm1 }
0x1138   : > { %v4551_v60 = vsel %vm9493_vm10, %v4541_v10, %v4550_v12  ;;  %v4375_v58 = vpop.permute.xlu0 %4374  ;;  %4817 = vmatpush1.bf16.msra.mxu1 %v6816_v49  ;;  %v4385_v10 = vrot.slane %v8927_v37, 4  ;;  %v6811_v22 = vcombine.high %v4483_v48, %v4485_v59  ;;  %v4437_v49 = vsel %vm9501_vm15, %v4427_v23, %v4436_v17  ;;  %vm9512_vm0 = vmmov %vm9504_vm1 }
0x1139   : > { %v6814_v50 = vcombine.low %v4549_v9, %v4551_v60  ;;  %v6815_v62 = vcombine.high %v4549_v9, %v4551_v60  ;;  %v4382_v38 = vrot.slane %v4375_v58, 4  ;;  %v6810_v0 = vcombine.low %v4483_v48, %v4485_v59  ;;  %vm9518_vm8 = vmmov %vm9506_vm3 }
0x113a   : > { %v6809_v37 = vcombine.high %v4435_v54, %v4437_v49  ;;  %v6808_v26 = vcombine.low %v4435_v54, %v4437_v49  ;;  %vm9509_vm10 = vcmask 138240   ;;  %v4683_v5 = vrot.slane %v4677_v15, 4  ;;  %v7365_v15 = vld [vmem:[%s9411_s11] ss:$8 sps:$4 sm:$0xff]  }
0x113b   : > { %4818 = vmatprep.subr.bf16.mxu1 %v6815_v62  ;;  %v4339_v12 = vpop.permute.xlu1 %4338  ;;  %v4386_v51 = vsel %vm9504_vm1, %v4382_v38, %v4383_v41  ;;  %vm9510_vm11 = vmmov %vm9509_vm10  ;;  %vm9513_vm14 = vcmask 908288   ;;  %vm9516_vm15 = vcmask 1041408  }
0x113c   : > { %v4379_v18 = vpop.permute.xlu0 %4378  ;;  %4819 = vmatpush1.bf16.msra.mxu1 %v6814_v50  ;;  %v4343_v6 = vrot.slane %v4339_v12, 4  ;;  %v4387_v32 = vsel %vm9506_vm3, %v4375_v58, %v4386_v51  ;;  %vm9514_vm12 = vmmov %vm9513_vm14  ;;  %vm9521_vm3 = vcmask 916480  }
0x113d   : > { %v4384_v8 = vrot.slane %v4379_v18, 4  ;;  %4820 = vmatprep.subr.bf16.mxu1 %v9498_v3  ;;  %vm9519_vm1 = vmmov %vm9512_vm0 }
0x113f   : > { %v4388_v7 = vsel %vm9486_vm2, %v4384_v8, %v4385_v10  ;;  %v4681_v59 = vpop.permute.xlu1 %4680  ;;  %vm9517_vm2 = vcmask 31744  }
0x1140   : > { %v4333_v47 = vpop.permute.xlu0 %4332  ;;  %4821 = vmatpush1.bf16.msra.mxu1 %v9502_v63  ;;  %v4389_v23 = vsel %vm9505_vm5, %v4379_v18, %v4388_v7  ;;  %v4685_v58 = vrot.slane %v4681_v59, 4  ;;  %vm9520_vm5 = vmmov %vm9512_vm0 }
0x1141   : > { %4822 = vmatprep.subr.bf16.mxu1 %v6811_v22  ;;  %v4340_v9 = vrot.slane %v4333_v47, 4  ;;  %v6807_v50 = vcombine.high %v4387_v32, %v4389_v23  ;;  %v6806_v18 = vcombine.low %v4387_v32, %v4389_v23 }
0x1143   : > { %v4344_v19 = vsel %vm9507_vm4, %v4340_v9, %v4341_v43  ;;  %v3728_v43 = vld [vmem:[#allocation4] sm:$0x3]  ;;  %vm9522_vm4 = vmmov %vm9521_vm3 }
0x1144   : > { %v4337_v60 = vpop.permute.xlu0 %4336  ;;  %4823 = vmatpush1.bf16.msra.mxu1 %v6810_v0  ;;  %v4345_v13 = vsel %vm9510_vm11, %v4333_v47, %v4344_v19  ;;  %vm9525_vm11 = vcmask 924672  }
0x1145   : > { %v4342_v30 = vrot.slane %v4337_v60, 4  ;;  %4824 = vmatprep.subr.bf16.mxu1 %v6809_v37 }
0x1147   : > { %v4346_v62 = vsel %vm9508_vm9, %v4342_v30, %v4343_v6  ;;  %vm9523_vm9 = vmmov %vm9512_vm0 }
0x1148   : > { %v4347_v57 = vsel %vm9509_vm10, %v4337_v60, %v4346_v62  ;;  %v4675_v1 = vpop.permute.xlu0 %4674  ;;  %4825 = vmatpush1.bf16.msra.mxu1 %v6808_v26  ;;  %v7366_v62 = vld [vmem:[%s9413_s13] sm:$0xff]   ;;  %vm9524_vm10 = vmmov %vm9512_vm0 }
0x1149   : > { %v4682_v55 = vrot.slane %v4675_v1, 4  ;;  %4826 = vmatprep.subr.bf16.mxu1 %v6807_v50  ;;  %v6805_v17 = vcombine.high %v4345_v13, %v4347_v57  ;;  %v6804_v2 = vcombine.low %v4345_v13, %v4347_v57 }
0x114b   : > { %v4686_v3 = vsel %vm9511_vm7, %v4682_v55, %v4683_v5  ;;  %vm9526_vm7 = vmmov %vm9525_vm11 }
0x114c   : > { %v4679_v8 = vpop.permute.xlu0 %4678  ;;  %4827 = vmatpush1.bf16.msra.mxu1 %v6806_v18  ;;  %v4687_v22 = vsel %vm9513_vm14, %v4675_v1, %v4686_v3  ;;  %vm9527_vm14 = vmmov %vm9512_vm0 }
0x114d   : > { %v4684_v48 = vrot.slane %v4679_v8, 4  ;;  %4828 = vmatprep.subr.bf16.mxu1 %v6805_v17 }
0x114f   : > { %v4688_v10 = vsel %vm9512_vm0, %v4684_v48, %v4685_v58 }
0x1150   : > { %v4689_v38 = vsel %vm9514_vm12, %v4679_v8, %v4688_v10  ;;  %4829 = vmatpush1.bf16.msra.mxu1 %v6804_v2  ;;  %vm9528_vm12 = vcmask 1039360  }
0x1151   : > { %v6820_v49 = vcombine.low %v4687_v22, %v4689_v38  ;;  %v6821_v63 = vcombine.high %v4687_v22, %v4689_v38 }
0x1153   : > { %4844 = vmatprep.subr.bf16.mxu1 %v6821_v63 }
0x1154   : > { %4845 = vmatpush2.bf16.msra.mxu1 %v6820_v49 }
0x1157   : > { %4847 = vmatmul.mubr.bf16.vlgmr.msra.gmra.mxu1 %v7365_v15 }
0x1217   : > { %v4848_v47 = vpop.f32.mrf.mxu1 }
0x1219   : > { %v4850_v41 = vpop.f32.mrf.mxu1 }
0x121a   : > { %v4857_v7 = vadd.f32 %v4850_v41, %v4848_v47 }
0x121b   : > { %v8980_v54 = vpop.f32.mrf.mxu1 }
0x121c   : > { %4858 = vadd.xlane.f32.xlu0 %v4857_v7 }
0x121d   : > { %v4854_v0 = vpop.f32.mrf.mxu1 }
0x121e   : > { %v4860_v12 = vadd.f32 %v4854_v0, %v8980_v54 }
0x1220   : > { %4861 = vadd.xlane.f32.xlu1 %v4860_v12 }
0x12a5   : > { %v4859_v37 = vpop.xlane.xlu0 %4858 }
0x12a6   : > { %v4863_v9 = vmul.f32 0.00390625, %v4859_v37 }
0x12a9   : > { %v4862_v51 = vpop.xlane.xlu1 %4861 }
0x12aa   : > { %v4864_v23 = vmul.f32 0.00390625, %v4862_v51 }
0x12ac   : > { %v4865_v60 = vpack.c.bf16 %v4864_v23, %v4863_v9 }
0x12ae   : > { %7278 = vmatpush3.bf16.msra.mxu0 %v4865_v60 }
0x12af   : > { %7283 = vmatprep.subr.bf16.mxu0 %v9445_v16 }
0x12b1   : > { %7280 = vmatmul.mubr.msk.bf16.vlgmr.msra.gmra.mxu0 %vm9515_vm13, %v3728_v43  ;;  %vm9529_vm13 = vmmov %vm9528_vm12 }
0x12b2   : > { %7285 = vmatprep.mubr.msk.bf16.mxu0 %vm9480_vm6, %v9445_v16 }
0x1371   : > { %v4903_v6 = vpop.f32.mrf.mxu0 }
0x1372   : > { %v4909_v30 = vmax.f32 %v4903_v6, 0.0 }
0x1373   : > { %v7281_v26 = vpop.f32.mrf.mxu0 }
0x1374   : > { %v4910_v32 = vpack.c.bf16 %v4909_v30, %v4909_v30 }
0x1375   : > { %v4906_v50 = vpop.f32.mrf.mxu0 }
0x1376   : > { %v4920_v19 = vsel %vm9516_vm15, %v4910_v32, 0  ;;  %vm9530_vm15 = vmmov %vm9512_vm0 }
0x1377   : > { %v7282_v57 = vpop.f32.mrf.mxu0  ;;  %7284 = vmatpush3.bf16.msra.mxu0 %v4920_v19 }
0x137a   : > { %7286 = vmatmul.mubr.msk.bf16.vlgmr.msra.gmra.mxu0 %vm9517_vm2, %v7366_v62  ;;  %vm9531_vm2 = vmmov %vm9512_vm0 }
0x143a   : > { %v4956_v1 = vpop.f32.mrf.mxu0 }
0x143b   : > { %v4963_v55 = vsub.f32 0.0, %v4956_v1 }
0x143c   : > { %v7287_v59 = vpop.f32.mrf.mxu0 }
0x143d   : > { %v4965_v18 = vmul.f32 1.442695, %v4963_v55 }
0x143e   : > { %v4959_v13 = vpop.f32.mrf.mxu0 }
0x143f   : > { %7394 = vpow2.f32 %v4965_v18  ;;  %v4964_v5 = vsub.f32 0.0, %v4959_v13 }
0x1440   : > { %v7288_v17 = vpop.f32.mrf.mxu0 }
0x1441   : > { %v4967_v8 = vmul.f32 1.442695, %v4964_v5 }
0x1443   : > { %7396 = vpow2.f32 %v4967_v8 }
0x144c   : > { %v7395_v58 = vpop.eup %7394 }
0x144d   : > { %v4969_v3 = vadd.f32 1.0, %v7395_v58 }
0x144f   : > { %7398 = vrcp.f32 %v4969_v3 }
0x1450   : > { %v7397_v48 = vpop.eup %7396 }
0x1451   : > { %v4970_v2 = vadd.f32 1.0, %v7397_v48 }
0x1453   : > { %7400 = vrcp.f32 %v4970_v2 }
0x145c   : > { %v7399_v10 = vpop.eup %7398 }
0x145d   : > { %4975 = vperm.xlu0 %7337, %v7399_v10  }
0x1460   : > { %v7401_v22 = vpop.eup %7400 }
0x1461   : > { %4980 = vperm.xlu1 %7338, %v7401_v22  }
0x1465   : > { %5330 = vrot.lane.b32.xlu1 %v9444_v4, %s7460_s20 }
0x1469   : > { %5334 = vrot.lane.b32.xlu1 %v9444_v4, %s7460_s20 }
0x146d   : > { %5288 = vrot.lane.b32.xlu1 %v7617_v24, %s7456_s17 }
0x1471   : > { %5292 = vrot.lane.b32.xlu1 %v7617_v24, %s7456_s17 }
0x1475   : > { %5240 = vrot.lane.b32.xlu1 %v7621_v27, %s7455_s0 }
0x1479   : > { %5244 = vrot.lane.b32.xlu1 %v7621_v27, %s7455_s0 }
0x14d8   : > { %v4976_v38 = vpop.permute.xlu0 %4975 }
0x14d9   : > { %v4983_v49 = vmul.f32 %v4976_v38, %v4848_v47  ;;  %v4984_v63 = vmul.f32 %v4976_v38, %v4850_v41 }
0x14db   : > { %v9005_v15 = vadd.f32 %v4983_v49, %v8632_v14  ;;  %v9008_v7 = vadd.f32 %v4984_v63, %v8636_v45 }
0x14dc   : > { %v4981_v12 = vpop.permute.xlu1 %4980 }
0x14dd   : > { %v7169_v37 = vpack.c.bf16 %v9008_v7, %v9005_v15  ;;  %v7158_v51 = vpack.c.bf16 %v9008_v7, %v9008_v7  ;;  %v5152_v9 = vmul.f32 %v9008_v7, %v7629_v29  ;;  %v4986_v47 = vmul.f32 %v4981_v12, %v4854_v0 }
0x14de   : > { %v7157_v14 = vpack.c.bf16 %v9005_v15, %v9445_v16  ;;  %v5264_v41 = vmul.f32 %v9005_v15, %v7613_v20  ;;  %v5265_v23 = vmul.f32 %v9008_v7, %v7665_v46  ;;  %v5104_v60 = vmul.f32 %v9008_v7, %v7641_v35 }
0x14df   : > { %5328 = vrot.lane.b32.xlu0 %v7169_v37, %s7460_s20  ;;  %5078 = vrot.lane.b32.xlu1 %v7158_v51, %s7461_s23  ;;  %v7166_v45 = vpack.c.bf16 %v5152_v9, %v5152_v9  ;;  %v9029_v43 = vadd.f32 %v4986_v47, %v8660_v53  ;;  %v5216_v30 = vmul.f32 %v9005_v15, %v7615_v21 }
0x14e0   : > { %v7175_v0 = vpack.c.bf16 %v5265_v23, %v5264_v41  ;;  %v7162_v6 = vpack.c.bf16 %v5104_v60, %v5104_v60  ;;  %v5217_v26 = vmul.f32 %v9008_v7, %v7680_v52  ;;  %v5151_v53 = vmul.f32 %v9005_v15, %v7635_v31 }
0x14e1   : > { %v7160_v50 = vpack.c.bf16 %v9029_v43, %v9029_v43  ;;  %v5014_v19 = vmul.f32 %v9008_v7, %v7687_v56  ;;  %v4985_v62 = vmul.f32 %v4981_v12, %v8980_v54  ;;  %v5103_v55 = vmul.f32 %v9005_v15, %v7651_v39 }
0x14e2   : > { %v7171_v32 = vpack.c.bf16 %v5217_v26, %v5216_v30  ;;  %v7165_v57 = vpack.c.bf16 %v5151_v53, %v7639_v33  ;;  %v5155_v59 = vmul.f32 %v9029_v43, %v7629_v29  ;;  %v5107_v54 = vmul.f32 %v9029_v43, %v7641_v35  ;;  %v5331_v30 = vpop.permute.xlu1 %5330 }
0x14e3   : > { %5076 = vrot.lane.b32.xlu0 %v7157_v14, %s7461_s23  ;;  %5174 = vrot.lane.b32.xlu1 %v7166_v45, %s7454_s30  ;;  %v7154_v1 = vpack.c.bf16 %v5014_v19, %v5014_v19  ;;  %v9054_v18 = vadd.f32 %v4985_v62, %v8652_v61  ;;  %v7161_v13 = vpack.c.bf16 %v5103_v55, %v7656_v42 }
0x14e4   : > { %v7168_v5 = vpack.c.bf16 %v5155_v59, %v5155_v59  ;;  %v7164_v17 = vpack.c.bf16 %v5107_v54, %v5107_v54  ;;  %v5017_v58 = vmul.f32 %v9029_v43, %v7687_v56  ;;  %v5268_v48 = vmul.f32 %v9029_v43, %v7665_v46 }
0x14e5   : > { %v7170_v8 = vpack.c.bf16 %v9029_v43, %v9054_v18  ;;  %v7159_v61 = vpack.c.bf16 %v9054_v18, %v9445_v16  ;;  %v5267_v3 = vmul.f32 %v9054_v18, %v7613_v20  ;;  %v5219_v22 = vmul.f32 %v9054_v18, %v7615_v21 }
0x14e6   : > { %v7156_v2 = vpack.c.bf16 %v5017_v58, %v5017_v58  ;;  %v5220_v38 = vmul.f32 %v9029_v43, %v7680_v52  ;;  %v5013_v63 = vmul.f32 %v9005_v15, %v7739_v34  ;;  %v5154_v37 = vmul.f32 %v9054_v18, %v7635_v31  ;;  %v5335_v26 = vpop.permute.xlu1 %5334 }
0x14e7   : > { %5286 = vrot.lane.b32.xlu0 %v7175_v0, %s7456_s17  ;;  %5126 = vrot.lane.b32.xlu1 %v7162_v6, %s7453_s29  ;;  %v7177_v10 = vpack.c.bf16 %v5268_v48, %v5267_v3  ;;  %v5106_v9 = vmul.f32 %v9054_v18, %v7651_v39  ;;  %v5354_v14 = vmul.f32 %v9005_v15, %v7750_v40  ;;  %v7367_v6 = vld [vmem:[%s9410_s10 + $0x14] ss:$8 sps:$4 sm:$0xff]   ;;  %v5339_v3 = vrot.slane %v5335_v26, 4 }
0x14e8   : > { %v7173_v49 = vpack.c.bf16 %v5220_v38, %v5219_v22  ;;  %v7153_v12 = vpack.c.bf16 %v5013_v63, %v7742_v36  ;;  %v7167_v51 = vpack.c.bf16 %v5154_v37, %v7639_v33  ;;  %v5355_v45 = vmul.f32 %v9008_v7, %v7760_v44  ;;  %6886 = vmatprep.mubr.msk.bf16.mxu1 %vm9518_vm8, %v7367_v6 }
0x14e9   : > { %v7163_v47 = vpack.c.bf16 %v5106_v9, %v7656_v42  ;;  %v5016_v23 = vmul.f32 %v9054_v18, %v7739_v34  ;;  %v5357_v60 = vmul.f32 %v9054_v18, %v7750_v40  ;;  %v5358_v0 = vmul.f32 %v9029_v43, %v7760_v44 }
0x14ea   : > { %v7183_v41 = vpack.c.bf16 %v5355_v45, %v5354_v14  ;;  %vm9532_vm8 = vcmask 7168  }
0x14eb   : > { %5238 = vrot.lane.b32.xlu0 %v7171_v32, %s7455_s0  ;;  %5082 = vrot.lane.b32.xlu1 %v7160_v50, %s7461_s23  ;;  %v5289_v32 = vpop.permute.xlu1 %5288 }
0x14ec   : > { %v5295_v9 = vrot.slane %v5289_v32, 4 }
0x14ef   : > { %5172 = vrot.lane.b32.xlu0 %v7165_v57, %s7454_s30  ;;  %5036 = vrot.lane.b32.xlu1 %v7154_v1, %s7458_s19  ;;  %v5293_v50 = vpop.permute.xlu1 %5292 }
0x14f0   : > { %v5297_v14 = vrot.slane %v5293_v50, 4 }
0x14f3   : > { %5124 = vrot.lane.b32.xlu0 %v7161_v13, %s7453_s29  ;;  %5178 = vrot.lane.b32.xlu1 %v7168_v5, %s7454_s30  ;;  %v5241_v53 = vpop.permute.xlu1 %5240 }
0x14f7   : > { %5130 = vrot.lane.b32.xlu1 %v7164_v17, %s7453_s29  ;;  %5332 = vrot.lane.b32.xlu0 %v7170_v8, %s7460_s20  ;;  %v5245_v19 = vpop.permute.xlu1 %5244  ;;  %v5337_v17 = vrot.slane %v5331_v30, 4 }
0x14f8   : > { %v5249_v6 = vrot.slane %v5245_v19, 4 }
0x14fb   : > { %5378 = vrot.lane.b32.xlu1 %v7713_v11, %s9447_s18  ;;  %5080 = vrot.lane.b32.xlu0 %v7159_v61, %s7461_s23 }
0x14ff   : > { %5040 = vrot.lane.b32.xlu1 %v7156_v2, %s7458_s19  ;;  %5290 = vrot.lane.b32.xlu0 %v7177_v10, %s7456_s17 }
0x1503   : > { %5382 = vrot.lane.b32.xlu1 %v7713_v11, %s9447_s18  ;;  %5242 = vrot.lane.b32.xlu0 %v7173_v49, %s7455_s0 }
0x1507   : > { %5899 = vrot.lane.b32.xlu1 %v9444_v4, %s7460_s20  ;;  %5034 = vrot.lane.b32.xlu0 %v7153_v12, %s7458_s19 }
0x150b   : > { %5903 = vrot.lane.b32.xlu1 %v9444_v4, %s7460_s20  ;;  %5176 = vrot.lane.b32.xlu0 %v7167_v51, %s7454_s30  ;;  %v7155_v4 = vpack.c.bf16 %v5016_v23, %v7742_v36 }
0x150f   : > { %5857 = vrot.lane.b32.xlu1 %v7617_v24, %s7456_s17  ;;  %5128 = vrot.lane.b32.xlu0 %v7163_v47, %s7453_s29 }
0x1513   : > { %5861 = vrot.lane.b32.xlu1 %v7617_v24, %s7456_s17  ;;  %5376 = vrot.lane.b32.xlu0 %v7183_v41, %s9447_s18  ;;  %v7185_v24 = vpack.c.bf16 %v5358_v0, %v5357_v60  ;;  %v5247_v60 = vrot.slane %v5241_v53, 4 }
0x1517   : > { %5809 = vrot.lane.b32.xlu1 %v7621_v27, %s7455_s0  ;;  %5038 = vrot.lane.b32.xlu0 %v7155_v4, %s7458_s19 }
0x151b   : > { %5813 = vrot.lane.b32.xlu1 %v7621_v27, %s7455_s0  ;;  %5380 = vrot.lane.b32.xlu0 %v7185_v24, %s9447_s18 }
0x1551   : > { %v5329_v62 = vpop.permute.xlu0 %5328  ;;  %v9127_v57 = vpop.permute.xlu1 %5078 }
0x1552   : > { %v5336_v8 = vrot.slane %v5329_v62, 4 }
0x1554   : > { %v5340_v48 = vsel %vm9519_vm1, %v5336_v8, %v5337_v17  ;;  %vm9533_vm1 = vmmov %vm9512_vm0 }
0x1555   : > { %v9129_v1 = vpop.permute.xlu0 %5076  ;;  %v5175_v59 = vpop.permute.xlu1 %5174  ;;  %v5341_v38 = vsel %vm9521_vm3, %v5329_v62, %v5340_v48  ;;  %vm9535_vm3 = vmmov %vm9512_vm0 }
0x1559   : > { %v5287_v55 = vpop.permute.xlu0 %5286  ;;  %v9131_v5 = vpop.permute.xlu1 %5126 }
0x155a   : > { %v5294_v12 = vrot.slane %v5287_v55, 4 }
0x155c   : > { %v5298_v45 = vsel %vm9523_vm9, %v5294_v12, %v5295_v9  ;;  %vm9537_vm9 = vmmov %vm9512_vm0 }
0x155d   : > { %v5239_v13 = vpop.permute.xlu0 %5238  ;;  %v9137_v61 = vpop.permute.xlu1 %5082  ;;  %v5299_v24 = vsel %vm9525_vm11, %v5287_v55, %v5298_v45  ;;  %v5085_v45 = vrot.slane %v9127_v57, 4  ;;  %vm9539_vm11 = vcmask 130048  }
0x155e   : > { %v5246_v41 = vrot.slane %v5239_v13, 4 }
0x1560   : > { %v5250_v32 = vsel %vm9512_vm0, %v5246_v41, %v5247_v60  ;;  %v5084_v41 = vrot.slane %v9129_v1, 4 }
0x1561   : > { %v9133_v54 = vpop.permute.xlu0 %5172  ;;  %v9140_v10 = vpop.permute.xlu1 %5036 }
0x1562   : > { %v5180_v19 = vrot.slane %v9133_v54, 4 }
0x1565   : > { %v9135_v27 = vpop.permute.xlu0 %5124  ;;  %v5179_v23 = vpop.permute.xlu1 %5178 }
0x1569   : > { %v5333_v58 = vpop.permute.xlu0 %5332  ;;  %v5131_v50 = vpop.permute.xlu1 %5130 }
0x156a   : > { %v5338_v2 = vrot.slane %v5333_v58, 4 }
0x156c   : > { %v5342_v22 = vsel %vm9520_vm5, %v5338_v2, %v5339_v3  ;;  %v5251_v3 = vsel %vm9528_vm12, %v5239_v13, %v5250_v32  ;;  %v5183_v13 = vrot.slane %v5179_v23, 4  ;;  %vm9534_vm5 = vmmov %vm9532_vm8 }
0x156d   : > { %v5343_v49 = vsel %vm9522_vm4, %v5333_v58, %v5342_v22  ;;  %v9145_v63 = vpop.permute.xlu0 %5080  ;;  %v5181_v22 = vrot.slane %v5175_v59, 4  ;;  %v5379_v9 = vpop.permute.xlu1 %5378  ;;  %v7233_v59 = vpack.c.bf16 %v9054_v18, %v9005_v15  ;;  %vm9536_vm4 = vmmov %vm9512_vm0 }
0x156e   : > { %v6882_v37 = vcombine.low %v5341_v38, %v5343_v49  ;;  %v6883_v51 = vcombine.high %v5341_v38, %v5343_v49  ;;  %v7234_v38 = vpack.c.bf16 %v9029_v43, %v9008_v7  ;;  %v5132_v49 = vrot.slane %v9135_v27, 4  ;;  %vm9541_vm0 = vmmov %vm9539_vm11 }
0x156f   : > { %vm9543_vm12 = vmmov %vm9533_vm1 }
0x1570   : > { %5516 = vmatprep.subr.bf16.mxu1 %v6883_v51  ;;  %v5086_v51 = vrot.slane %v9145_v63, 4 }
0x1571   : > { %v5291_v47 = vpop.permute.xlu0 %5290  ;;  %5517 = vmatpush1.bf16.msra.mxu1 %v6882_v37  ;;  %v5184_v37 = vsel %vm9530_vm15, %v5180_v19, %v5181_v22 }
0x1572   : > { %v5296_v4 = vrot.slane %v5291_v47, 4  ;;  %v5185_v23 = vsel %vm9532_vm8, %v9133_v54, %v5184_v37  ;;  %vm9547_vm8 = vmmov %vm9533_vm1 }
0x1574   : > { %v5300_v0 = vsel %vm9524_vm10, %v5296_v4, %v5297_v14  ;;  %v5133_v14 = vrot.slane %v9131_v5, 4  ;;  %v5087_v4 = vrot.slane %v9137_v61, 4  ;;  %v5041_v61 = vpop.permute.xlu1 %5040  ;;  %vm9538_vm10 = vcmask 121856  }
0x1575   : > { %v5301_v30 = vsel %vm9526_vm7, %v5291_v47, %v5300_v0  ;;  %v5243_v26 = vpop.permute.xlu0 %5242  ;;  %vm9540_vm7 = vmmov %vm9538_vm10 }
0x1576   : > { %v6880_v62 = vcombine.low %v5299_v24, %v5301_v30  ;;  %v6881_v17 = vcombine.high %v5299_v24, %v5301_v30  ;;  %v5248_v8 = vrot.slane %v5243_v26, 4  ;;  %v5136_v0 = vsel %vm9533_vm1, %v5132_v49, %v5133_v14 }
0x1577   : > { %v5090_v30 = vsel %vm9535_vm3, %v5086_v51, %v5087_v4  ;;  %v5137_v54 = vsel %vm9538_vm10, %v9135_v27, %v5136_v0  ;;  %v5045_v27 = vrot.slane %v5041_v61, 4  ;;  %v5385_v51 = vrot.slane %v5379_v9, 4 }
0x1578   : > { %v5252_v58 = vsel %vm9527_vm14, %v5248_v8, %v5249_v6  ;;  %5518 = vmatprep.subr.bf16.mxu1 %v6881_v17  ;;  %v5135_v6 = vrot.slane %v5131_v50, 4  ;;  %v5091_v8 = vsel %vm9539_vm11, %v9145_v63, %v5090_v30  ;;  %v5383_v49 = vpop.permute.xlu1 %5382  ;;  %vm9542_vm14 = vmmov %vm9533_vm1 }
0x1579   : > { %v5253_v53 = vsel %vm9529_vm13, %v5243_v26, %v5252_v58  ;;  %v5035_v48 = vpop.permute.xlu0 %5034  ;;  %5519 = vmatpush1.bf16.msra.mxu1 %v6880_v62  ;;  %v5088_v62 = vsel %vm9536_vm4, %v5084_v41, %v5085_v45  ;;  %v5387_v14 = vrot.slane %v5383_v49, 4  ;;  %vm9544_vm13 = vcmask 138240   ;;  %vm9550_vm11 = vmmov %vm9541_vm0 }
0x157a   : > { %v6878_v55 = vcombine.low %v5251_v3, %v5253_v53  ;;  %v6879_v2 = vcombine.high %v5251_v3, %v5253_v53  ;;  %v5042_v3 = vrot.slane %v5035_v48, 4  ;;  %vm9545_vm15 = vmmov %vm9544_vm13 }
0x157c   : > { %5520 = vmatprep.subr.bf16.mxu1 %v6879_v2  ;;  %v5043_v2 = vrot.slane %v9140_v10, 4 }
0x157d   : > { %v5177_v12 = vpop.permute.xlu0 %5176  ;;  %5521 = vmatpush1.bf16.msra.mxu1 %v6878_v55  ;;  %v5089_v55 = vsel %vm9541_vm0, %v9129_v1, %v5088_v62 }
0x157e   : > { %v5182_v47 = vrot.slane %v5177_v12, 4  ;;  %5522 = vmatprep.subr.bf16.mxu1 %v7234_v38  ;;  %v6871_v22 = vcombine.high %v5089_v55, %v5091_v8  ;;  %v5046_v63 = vsel %vm9542_vm14, %v5042_v3, %v5043_v2  ;;  %vm9553_vm14 = vcmask 916480  }
0x157f   : > { %v5047_v1 = vsel %vm9544_vm13, %v5035_v48, %v5046_v63  ;;  %v7369_v48 = vld [vmem:[%s9410_s10 + $0x10] ss:$8 sps:$4 sm:$0xff]  }
0x1580   : > { %v5186_v60 = vsel %vm9531_vm2, %v5182_v47, %v5183_v13  ;;  %v6870_v13 = vcombine.low %v5089_v55, %v5091_v8  ;;  %vm9546_vm2 = vmmov %vm9533_vm1  ;;  %vm9548_vm1 = vcmask 908288  }
0x1581   : > { %v5187_v24 = vsel %vm9534_vm5, %v5177_v12, %v5186_v60  ;;  %v5129_v5 = vpop.permute.xlu0 %5128  ;;  %5523 = vmatpush1.bf16.msra.mxu1 %v7233_v59  ;;  %vm9549_vm5 = vmmov %vm9548_vm1 }
0x1582   : > { %v6874_v26 = vcombine.low %v5185_v23, %v5187_v24  ;;  %v6875_v57 = vcombine.high %v5185_v23, %v5187_v24  ;;  %v5134_v32 = vrot.slane %v5129_v5, 4  ;;  %vm9552_vm0 = vmmov %vm9546_vm2 }
0x1583   : > { %vm9555_vm13 = vmmov %vm9552_vm0 }
0x1584   : > { %v5138_v17 = vsel %vm9537_vm9, %v5134_v32, %v5135_v6  ;;  %5524 = vmatprep.subr.bf16.mxu1 %v6875_v57 }
0x1585   : > { %v5139_v50 = vsel %vm9540_vm7, %v5129_v5, %v5138_v17  ;;  %v5377_v58 = vpop.permute.xlu0 %5376  ;;  %5525 = vmatpush1.bf16.msra.mxu1 %v6874_v26  ;;  %vm9551_vm7 = vmmov %vm9546_vm2 }
0x1586   : > { %v6872_v53 = vcombine.low %v5137_v54, %v5139_v50  ;;  %v6873_v19 = vcombine.high %v5137_v54, %v5139_v50  ;;  %v5384_v12 = vrot.slane %v5377_v58, 4 }
0x1588   : > { %5526 = vmatprep.subr.bf16.mxu1 %v6873_v19  ;;  %v5388_v45 = vsel %vm9546_vm2, %v5384_v12, %v5385_v51  ;;  %vm9557_vm2 = vcmask 924672  }
0x1589   : > { %v5039_v38 = vpop.permute.xlu0 %5038  ;;  %5527 = vmatpush1.bf16.msra.mxu1 %v6872_v53  ;;  %v5389_v0 = vsel %vm9548_vm1, %v5377_v58, %v5388_v45  ;;  %vm9559_vm1 = vmmov %vm9557_vm2 }
0x158a   : > { %v5044_v37 = vrot.slane %v5039_v38, 4  ;;  %5528 = vmatprep.subr.bf16.mxu1 %v6871_v22 }
0x158c   : > { %v5048_v47 = vsel %vm9543_vm12, %v5044_v37, %v5045_v27  ;;  %vm9554_vm12 = vmmov %vm9553_vm14 }
0x158d   : > { %v5049_v10 = vsel %vm9545_vm15, %v5039_v38, %v5048_v47  ;;  %v5381_v59 = vpop.permute.xlu0 %5380  ;;  %5529 = vmatpush1.bf16.msra.mxu1 %v6870_v13  ;;  %vm9556_vm15 = vmmov %vm9552_vm0 }
0x158e   : > { %v6868_v41 = vcombine.low %v5047_v1, %v5049_v10  ;;  %v6869_v4 = vcombine.high %v5047_v1, %v5049_v10  ;;  %v5386_v60 = vrot.slane %v5381_v59, 4 }
0x1590   : > { %v5390_v23 = vsel %vm9547_vm8, %v5386_v60, %v5387_v14  ;;  %5530 = vmatprep.subr.bf16.mxu1 %v6869_v4  ;;  %vm9558_vm8 = vmmov %vm9552_vm0 }
0x1591   : > { %v5391_v9 = vsel %vm9549_vm5, %v5381_v59, %v5390_v23  ;;  %5531 = vmatpush1.bf16.msra.mxu1 %v6868_v41  ;;  %vm9560_vm5 = vmmov %vm9552_vm0 }
0x1592   : > { %v6884_v6 = vcombine.low %v5389_v0, %v5391_v9  ;;  %v6885_v24 = vcombine.high %v5389_v0, %v5391_v9 }
0x1594   : > { %5546 = vmatprep.subr.bf16.mxu1 %v6885_v24 }
0x1595   : > { %5547 = vmatpush2.bf16.msra.mxu1 %v6884_v6 }
0x1596   : > { %7289 = vmatprep.subr.bf16.mxu1 %v9445_v16 }
0x1598   : > { %5549 = vmatmul.mubr.bf16.vlgmr.msra.gmra.mxu1 %v7369_v48 }
0x1599   : > { %7291 = vmatprep.mubr.msk.bf16.mxu1 %vm9480_vm6, %v9445_v16 }
0x1658   : > { %v5550_v5 = vpop.f32.mrf.mxu1 }
0x1659   : > { %vm5559_vm3 = vcmp.ge.f32.partialorder %v5550_v5, 0.0  ;;  %v5563_v30 = vmul.f32 0.25, %v5550_v5 }
0x165a   : > { %v5552_v26 = vpop.f32.mrf.mxu1 }
0x165b   : > { %v9197_v57 = vsel %vm5559_vm3, %v5550_v5, %v5563_v30  ;;  %vm5560_vm4 = vcmp.ge.f32.partialorder %v5552_v26, 0.0  ;;  %v5564_v32 = vmul.f32 0.25, %v5552_v26  ;;  %vm9561_vm3 = vcmask 1039360  }
0x165c   : > { %v5554_v62 = vpop.f32.mrf.mxu1  ;;  %v5720_v8 = vmul.f32 %v9197_v57, %v7635_v31  ;;  %v5672_v2 = vmul.f32 %v9197_v57, %v7651_v39  ;;  %v5833_v37 = vmul.f32 %v9197_v57, %v7613_v20  ;;  %v5785_v10 = vmul.f32 %v9197_v57, %v7615_v21 }
0x165d   : > { %v9199_v61 = vsel %vm5560_vm4, %v5552_v26, %v5564_v32  ;;  %v5565_v53 = vmul.f32 0.25, %v5554_v62  ;;  %vm5561_vm9 = vcmp.ge.f32.partialorder %v5554_v62, 0.0  ;;  %vm9562_vm4 = vmmov %vm9561_vm3 }
0x165e   : > { %v7203_v17 = vpack.c.bf16 %v9199_v61, %v9197_v57  ;;  %v5721_v54 = vmul.f32 %v9199_v61, %v7629_v29  ;;  %v5556_v50 = vpop.f32.mrf.mxu1  ;;  %v5673_v3 = vmul.f32 %v9199_v61, %v7641_v35  ;;  %v7199_v55 = vpack.c.bf16 %v5720_v8, %v7639_v33 }
0x165f   : > { %v5566_v19 = vmul.f32 0.25, %v5556_v50  ;;  %vm5562_vm10 = vcmp.ge.f32.partialorder %v5556_v50, 0.0  ;;  %v9215_v38 = vsel %vm5561_vm9, %v5554_v62, %v5565_v53  ;;  %v7195_v49 = vpack.c.bf16 %v5672_v2, %v7656_v42  ;;  %vm9563_vm9 = vmmov %vm9552_vm0 }
0x1660   : > { %5897 = vrot.lane.b32.xlu0 %v7203_v17, %s7460_s20  ;;  %v7200_v58 = vpack.c.bf16 %v5721_v54, %v5721_v54  ;;  %v7196_v22 = vpack.c.bf16 %v5673_v3, %v5673_v3  ;;  %v5834_v63 = vmul.f32 %v9199_v61, %v7665_v46  ;;  %v7192_v12 = vpack.c.bf16 %v9199_v61, %v9199_v61 }
0x1661   : > { %v9217_v27 = vsel %vm5562_vm10, %v5556_v50, %v5566_v19  ;;  %v7235_v51 = vpack.c.bf16 %v9215_v38, %v9197_v57  ;;  %v5786_v14 = vmul.f32 %v9199_v61, %v7680_v52  ;;  %v5583_v59 = vmul.f32 %v9199_v61, %v7687_v56  ;;  %v5900_v50 = vpop.permute.xlu1 %5899  ;;  %vm9564_vm10 = vmmov %vm9552_vm0 }
0x1662   : > { %5743 = vrot.lane.b32.xlu1 %v7200_v58, %s7454_s30  ;;  %v7236_v13 = vpack.c.bf16 %v9217_v27, %v9199_v61  ;;  %v7209_v47 = vpack.c.bf16 %v5834_v63, %v5833_v37  ;;  %v7194_v1 = vpack.c.bf16 %v9217_v27, %v9217_v27  ;;  %v5724_v4 = vmul.f32 %v9217_v27, %v7629_v29 }
0x1663   : > { %v7205_v45 = vpack.c.bf16 %v5786_v14, %v5785_v10  ;;  %v7188_v41 = vpack.c.bf16 %v5583_v59, %v5583_v59  ;;  %v7204_v60 = vpack.c.bf16 %v9217_v27, %v9215_v38  ;;  %v5723_v23 = vmul.f32 %v9215_v38, %v7635_v31 }
0x1664   : > { %5741 = vrot.lane.b32.xlu0 %v7199_v55, %s7454_s30  ;;  %v7202_v0 = vpack.c.bf16 %v5724_v4, %v5724_v4  ;;  %v5676_v9 = vmul.f32 %v9217_v27, %v7641_v35  ;;  %v5675_v29 = vmul.f32 %v9215_v38, %v7651_v39  ;;  %v5837_v48 = vmul.f32 %v9217_v27, %v7665_v46 }
0x1665   : > { %v7201_v6 = vpack.c.bf16 %v5723_v23, %v7639_v33  ;;  %v5836_v35 = vmul.f32 %v9215_v38, %v7613_v20  ;;  %v5586_v33 = vmul.f32 %v9217_v27, %v7687_v56  ;;  %v5789_v5 = vmul.f32 %v9217_v27, %v7680_v52  ;;  %v5904_v58 = vpop.permute.xlu1 %5903 }
0x1666   : > { %5695 = vrot.lane.b32.xlu1 %v7196_v22, %s7453_s29  ;;  %v7198_v24 = vpack.c.bf16 %v5676_v9, %v5676_v9  ;;  %v7197_v31 = vpack.c.bf16 %v5675_v29, %v7656_v42  ;;  %v5788_v46 = vmul.f32 %v9215_v38, %v7615_v21  ;;  %v7191_v20 = vpack.c.bf16 %v9197_v57, %v9445_v16 }
0x1667   : > { %v7211_v39 = vpack.c.bf16 %v5837_v48, %v5836_v35  ;;  %v7190_v42 = vpack.c.bf16 %v5586_v33, %v5586_v33  ;;  %v7193_v52 = vpack.c.bf16 %v9215_v38, %v9445_v16  ;;  %v5582_v56 = vmul.f32 %v9197_v57, %v7739_v34 }
0x1668   : > { %5693 = vrot.lane.b32.xlu0 %v7195_v49, %s7453_s29  ;;  %v7207_v30 = vpack.c.bf16 %v5789_v5, %v5788_v46  ;;  %v5585_v26 = vmul.f32 %v9215_v38, %v7739_v34  ;;  %v5924_v32 = vmul.f32 %v9199_v61, %v7760_v44  ;;  %v5923_v62 = vmul.f32 %v9197_v57, %v7750_v40  ;;  %v7370_v34 = vld [vmem:[%s9411_s11 + $0x14] ss:$8 sps:$4 sm:$0xff]  }
0x1669   : > { %v7187_v21 = vpack.c.bf16 %v5582_v56, %v7742_v36  ;;  %v5927_v54 = vmul.f32 %v9217_v27, %v7760_v44  ;;  %6941 = vmatprep.mubr.msk.bf16.mxu0 %vm9550_vm11, %v7370_v34  ;;  %v5858_v3 = vpop.permute.xlu1 %5857  ;;  %v5908_v59 = vrot.slane %v5904_v58, 4  ;;  %vm9565_vm11 = vcmask 7168  }
0x166a   : > { %5647 = vrot.lane.b32.xlu1 %v7192_v12, %s7461_s23  ;;  %v7217_v17 = vpack.c.bf16 %v5924_v32, %v5923_v62  ;;  %v5864_v48 = vrot.slane %v5858_v3, 4 }
0x166c   : > { %5855 = vrot.lane.b32.xlu0 %v7209_v47, %s7456_s17  ;;  %v5906_v47 = vrot.slane %v5900_v50, 4 }
0x166d   : > { %v5862_v53 = vpop.permute.xlu1 %5861 }
0x166e   : > { %5651 = vrot.lane.b32.xlu1 %v7194_v1, %s7461_s23  ;;  %v5866_v5 = vrot.slane %v5862_v53, 4 }
0x1670   : > { %5807 = vrot.lane.b32.xlu0 %v7205_v45, %s7455_s0 }
0x1671   : > { %v5810_v19 = vpop.permute.xlu1 %5809 }
0x1672   : > { %5605 = vrot.lane.b32.xlu1 %v7188_v41, %s7458_s19 }
0x1674   : > { %5901 = vrot.lane.b32.xlu0 %v7204_v60, %s7460_s20 }
0x1675   : > { %v5814_v44 = vpop.permute.xlu1 %5813 }
0x1676   : > { %5747 = vrot.lane.b32.xlu1 %v7202_v0, %s7454_s30 }
0x1678   : > { %5745 = vrot.lane.b32.xlu0 %v7201_v6, %s7454_s30  ;;  %s540_s30 = scalar_lea.vmem %s9415_s15, %s6431_s25 }
0x167a   : > { %5699 = vrot.lane.b32.xlu1 %v7198_v24, %s7453_s29 }
0x167c   : > { %5697 = vrot.lane.b32.xlu0 %v7197_v31, %s7453_s29 }
0x167e   : > { %5947 = vrot.lane.b32.xlu1 %v7713_v11, %s9447_s18 }
0x1680   : > { %5859 = vrot.lane.b32.xlu0 %v7211_v39, %s7456_s17 }
0x1682   : > { %5609 = vrot.lane.b32.xlu1 %v7190_v42, %s7458_s19 }
0x1684   : > { %5811 = vrot.lane.b32.xlu0 %v7207_v30, %s7455_s0  ;;  %v5816_v30 = vrot.slane %v5810_v19, 4 }
0x1686   : > { %5951 = vrot.lane.b32.xlu1 %v7713_v11, %s9447_s18  ;;  %v7189_v11 = vpack.c.bf16 %v5585_v26, %v7742_v36  ;;  %v5926_v36 = vmul.f32 %v9215_v38, %v7750_v40 }
0x1688   : > { %5645 = vrot.lane.b32.xlu0 %v7191_v20, %s7461_s23  ;;  %v7219_v8 = vpack.c.bf16 %v5927_v54, %v5926_v36 }
0x168c   : > { %5649 = vrot.lane.b32.xlu0 %v7193_v52, %s7461_s23  ;;  %v5818_v52 = vrot.slane %v5814_v44, 4 }
0x1690   : > { %5603 = vrot.lane.b32.xlu0 %v7187_v21, %s7458_s19 }
0x1694   : > { %5607 = vrot.lane.b32.xlu0 %v7189_v11, %s7458_s19 }
0x1698   : > { %5945 = vrot.lane.b32.xlu0 %v7217_v17, %s9447_s18 }
0x169c   : > { %5949 = vrot.lane.b32.xlu0 %v7219_v8, %s9447_s18 }
0x16d2   : > { %v5898_v55 = vpop.permute.xlu0 %5897 }
0x16d3   : > { %v5905_v14 = vrot.slane %v5898_v55, 4 }
0x16d4   : > { %v5744_v2 = vpop.permute.xlu1 %5743 }
0x16d5   : > { %v5909_v45 = vsel %vm9551_vm7, %v5905_v14, %v5906_v47  ;;  %v5750_v58 = vrot.slane %v5744_v2, 4  ;;  %vm9566_vm7 = vmmov %vm9552_vm0 }
0x16d6   : > { %v9307_v22 = vpop.permute.xlu0 %5741  ;;  %v5910_v60 = vsel %vm9553_vm14, %v5898_v55, %v5909_v45  ;;  %vm9568_vm14 = vmmov %vm9560_vm5 }
0x16d7   : > { %v5749_v36 = vrot.slane %v9307_v22, 4 }
0x16d8   : > { %v9309_v49 = vpop.permute.xlu1 %5695 }
0x16d9   : > { %v5753_v14 = vsel %vm9564_vm10, %v5749_v36, %v5750_v58 }
0x16da   : > { %v9311_v63 = vpop.permute.xlu0 %5693 }
0x16dc   : > { %v9313_v12 = vpop.permute.xlu1 %5647 }
0x16de   : > { %v5856_v40 = vpop.permute.xlu0 %5855 }
0x16df   : > { %v5863_v31 = vrot.slane %v5856_v40, 4 }
0x16e0   : > { %v9315_v1 = vpop.permute.xlu1 %5651 }
0x16e1   : > { %v5867_v42 = vsel %vm9555_vm13, %v5863_v31, %v5864_v48  ;;  %vm9570_vm13 = vmmov %vm9560_vm5 }
0x16e2   : > { %v5808_v37 = vpop.permute.xlu0 %5807  ;;  %v5868_v56 = vsel %vm9557_vm2, %v5856_v40, %v5867_v42  ;;  %vm9572_vm2 = vmmov %vm9560_vm5 }
0x16e3   : > { %v5815_v35 = vrot.slane %v5808_v37, 4  ;;  %vm9579_vm10 = vmmov %vm9572_vm2 }
0x16e4   : > { %v9321_v29 = vpop.permute.xlu1 %5605 }
0x16e5   : > { %v5819_v21 = vsel %vm9558_vm8, %v5815_v35, %v5816_v30  ;;  %vm9573_vm8 = vcmask 130048   ;;  %v5612_v57 = vrot.slane %v9321_v29, 4 }
0x16e6   : > { %v5902_v10 = vpop.permute.xlu0 %5901  ;;  %v5820_v3 = vsel %vm9561_vm3, %v5808_v37, %v5819_v21  ;;  %v5702_v37 = vrot.slane %v9309_v49, 4  ;;  %v5654_v49 = vrot.slane %v9313_v12, 4  ;;  %vm9576_vm3 = vmmov %vm9572_vm2 }
0x16e7   : > { %v5907_v41 = vrot.slane %v5902_v10, 4 }
0x16e8   : > { %v5748_v33 = vpop.permute.xlu1 %5747 }
0x16e9   : > { %v5911_v4 = vsel %vm9552_vm0, %v5907_v41, %v5908_v59  ;;  %v5752_v8 = vrot.slane %v5748_v33, 4  ;;  %vm9567_vm0 = vmmov %vm9565_vm11 }
0x16ea   : > { %v5912_v23 = vsel %vm9554_vm12, %v5902_v10, %v5911_v4  ;;  %v5746_v0 = vpop.permute.xlu0 %5745  ;;  %v5701_v10 = vrot.slane %v9311_v63, 4  ;;  %vm9569_vm12 = vcmask 121856  }
0x16eb   : > { %v6937_v9 = vcombine.low %v5910_v60, %v5912_v23  ;;  %v6938_v6 = vcombine.high %v5910_v60, %v5912_v23  ;;  %v5751_v32 = vrot.slane %v5746_v0, 4  ;;  %v5754_v23 = vsel %vm9567_vm0, %v9307_v22, %v5753_v14 }
0x16ec   : > { %v5700_v34 = vpop.permute.xlu1 %5699 }
0x16ed   : > { %6085 = vmatprep.subr.bf16.mxu0 %v6938_v6  ;;  %v5755_v44 = vsel %vm9563_vm9, %v5751_v32, %v5752_v8  ;;  %v5704_v59 = vrot.slane %v5700_v34, 4  ;;  %v5656_v6 = vrot.slane %v9315_v1, 4 }
0x16ee   : > { %v5698_v24 = vpop.permute.xlu0 %5697  ;;  %6086 = vmatpush1.bf16.msra.mxu0 %v6937_v9  ;;  %v5756_v45 = vsel %vm9565_vm11, %v5746_v0, %v5755_v44  ;;  %v5705_v9 = vsel %vm9568_vm14, %v5701_v10, %v5702_v37  ;;  %vm9580_vm11 = vmmov %vm9572_vm2 }
0x16ef   : > { %v5703_v55 = vrot.slane %v5698_v24, 4  ;;  %v6930_v0 = vcombine.high %v5754_v23, %v5756_v45 }
0x16f0   : > { %v5948_v2 = vpop.permute.xlu1 %5947 }
0x16f1   : > { %v5707_v4 = vsel %vm9566_vm7, %v5703_v55, %v5704_v59  ;;  %vm9581_vm7 = vcmask 908288  }
0x16f2   : > { %v5860_v39 = vpop.permute.xlu0 %5859  ;;  %v5708_v48 = vsel %vm9569_vm12, %v5698_v24, %v5707_v4  ;;  %vm9582_vm0 = vmmov %vm9581_vm7  ;;  %v4998_v4 = vld [vmem:[#allocation4 + $0x2] sm:$0x3] }
0x16f3   : > { %v5865_v46 = vrot.slane %v5860_v39, 4 }
0x16f4   : > { %v5610_v22 = vpop.permute.xlu1 %5609 }
0x16f5   : > { %v5869_v20 = vsel %vm9556_vm15, %v5865_v46, %v5866_v5  ;;  %vm9571_vm15 = vmmov %vm9569_vm12  ;;  %v5614_v38 = vrot.slane %v5610_v22, 4  ;;  %vm9585_vm12 = vcmask 31744  }
0x16f6   : > { %v5870_v26 = vsel %vm9559_vm1, %v5860_v39, %v5869_v20  ;;  %v5812_v11 = vpop.permute.xlu0 %5811  ;;  %v5706_v27 = vsel %vm9571_vm15, %v9311_v63, %v5705_v9  ;;  %vm9574_vm1 = vmmov %vm9573_vm8 }
0x16f7   : > { %v6935_v62 = vcombine.low %v5868_v56, %v5870_v26  ;;  %v6936_v17 = vcombine.high %v5868_v56, %v5870_v26  ;;  %v5817_v54 = vrot.slane %v5812_v11, 4  ;;  %v6928_v1 = vcombine.high %v5706_v27, %v5708_v48  ;;  %vm9583_vm14 = vmmov %vm9574_vm1 }
0x16f8   : > { %v6927_v12 = vcombine.low %v5706_v27, %v5708_v48  ;;  %v5952_v21 = vpop.permute.xlu1 %5951 }
0x16f9   : > { %v5821_v50 = vsel %vm9560_vm5, %v5817_v54, %v5818_v52  ;;  %6087 = vmatprep.subr.bf16.mxu0 %v6936_v17  ;;  %vm9575_vm5 = vmmov %vm9572_vm2  ;;  %v5956_v17 = vrot.slane %v5952_v21, 4 }
0x16fa   : > { %v5822_v53 = vsel %vm9562_vm4, %v5812_v11, %v5821_v50  ;;  %v5646_v19 = vpop.permute.xlu0 %5645  ;;  %6088 = vmatpush1.bf16.msra.mxu0 %v6935_v62  ;;  %vm9577_vm4 = vcmask 138240   ;;  %v5954_v11 = vrot.slane %v5948_v2, 4 }
0x16fb   : > { %v6933_v40 = vcombine.low %v5820_v3, %v5822_v53  ;;  %v6934_v47 = vcombine.high %v5820_v3, %v5822_v53  ;;  %v5653_v31 = vrot.slane %v5646_v19, 4  ;;  %vm9578_vm9 = vmmov %vm9577_vm4 }
0x16fd   : > { %6089 = vmatprep.subr.bf16.mxu0 %v6934_v47  ;;  %v5657_v33 = vsel %vm9572_vm2, %v5653_v31, %v5654_v49  ;;  %v7373_v31 = vld [vmem:[%s9413_s13 + $0x8] sm:$0xff]  }
0x16fe   : > { %v5650_v41 = vpop.permute.xlu0 %5649  ;;  %6090 = vmatpush1.bf16.msra.mxu0 %v6933_v40  ;;  %v5658_v42 = vsel %vm9574_vm1, %v5646_v19, %v5657_v33  ;;  %v7372_v19 = vld [vmem:[%s9411_s11 + $0x10] ss:$8 sps:$4 sm:$0xff]  }
0x16ff   : > { %v5655_v60 = vrot.slane %v5650_v41, 4  ;;  %6091 = vmatprep.subr.bf16.mxu0 %v7236_v13  ;;  %v6929_v13 = vcombine.low %v5754_v23, %v5756_v45 }
0x1701   : > { %v5659_v61 = vsel %vm9570_vm13, %v5655_v60, %v5656_v6  ;;  %vm9586_vm13 = vmmov %vm9574_vm1 }
0x1702   : > { %v5604_v35 = vpop.permute.xlu0 %5603  ;;  %6092 = vmatpush1.bf16.msra.mxu0 %v7235_v51  ;;  %v5660_v24 = vsel %vm9573_vm8, %v5650_v41, %v5659_v61 }
0x1703   : > { %6093 = vmatprep.subr.bf16.mxu0 %v6930_v0  ;;  %v5611_v39 = vrot.slane %v5604_v35, 4  ;;  %v6926_v46 = vcombine.high %v5658_v42, %v5660_v24  ;;  %v6925_v26 = vcombine.low %v5658_v42, %v5660_v24 }
0x1705   : > { %v5615_v63 = vsel %vm9575_vm5, %v5611_v39, %v5612_v57 }
0x1706   : > { %v5608_v5 = vpop.permute.xlu0 %5607  ;;  %6094 = vmatpush1.bf16.msra.mxu0 %v6929_v13  ;;  %v5616_v29 = vsel %vm9578_vm9, %v5604_v35, %v5615_v63 }
0x1707   : > { %v5613_v51 = vrot.slane %v5608_v5, 4  ;;  %6095 = vmatprep.subr.bf16.mxu0 %v6928_v1 }
0x1709   : > { %v5617_v30 = vsel %vm9576_vm3, %v5613_v51, %v5614_v38 }
0x170a   : > { %v5618_v20 = vsel %vm9577_vm4, %v5608_v5, %v5617_v30  ;;  %v5946_v52 = vpop.permute.xlu0 %5945  ;;  %6096 = vmatpush1.bf16.msra.mxu0 %v6927_v12 }
0x170b   : > { %v5953_v56 = vrot.slane %v5946_v52, 4  ;;  %6097 = vmatprep.subr.bf16.mxu0 %v6926_v46  ;;  %v6924_v32 = vcombine.high %v5616_v29, %v5618_v20  ;;  %v6923_v36 = vcombine.low %v5616_v29, %v5618_v20 }
0x170d   : > { %v5957_v54 = vsel %vm9579_vm10, %v5953_v56, %v5954_v11 }
0x170e   : > { %v5950_v62 = vpop.permute.xlu0 %5949  ;;  %6098 = vmatpush1.bf16.msra.mxu0 %v6925_v26  ;;  %v5958_v50 = vsel %vm9581_vm7, %v5946_v52, %v5957_v54 }
0x170f   : > { %v5955_v34 = vrot.slane %v5950_v62, 4  ;;  %6099 = vmatprep.subr.bf16.mxu0 %v6924_v32  ;;  %v9587_v32 = vld [vmem:[#allocation7_spill] sm:$0xff] }
0x1711   : > { %v5959_v8 = vsel %vm9580_vm11, %v5955_v34, %v5956_v17 }
0x1712   : > { %v5960_v58 = vsel %vm9582_vm0, %v5950_v62, %v5959_v8  ;;  %6100 = vmatpush1.bf16.msra.mxu0 %v6923_v36  ;;  %v9588_v8 = vlaneseq }
0x1713   : > { %v6939_v3 = vcombine.low %v5958_v50, %v5960_v58  ;;  %v6940_v53 = vcombine.high %v5958_v50, %v5960_v58 }
0x1714   : > { %vm6329_vm15 = vcmp.lt.s32.totalorder %v9588_v8, 256 }
0x1715   : > { %6115 = vmatprep.subr.bf16.mxu0 %v6940_v53 }
0x1716   : > { %6116 = vmatpush2.bf16.msra.mxu0 %v6939_v3 }
0x1717   : > { %7295 = vmatprep.subr.bf16.mxu0 %v9445_v16 }
0x1719   : > { %6118 = vmatmul.mubr.bf16.vlgmr.msra.gmra.mxu0 %v7372_v19 }
0x171a   : > { %7297 = vmatprep.mubr.msk.bf16.mxu0 %vm9480_vm6, %v9445_v16  ;;  %vm9584_vm6 = vcmask 1041408  }
0x17d9   : > { %v6119_v44 = vpop.f32.mrf.mxu0 }
0x17db   : > { %v6121_v55 = vpop.f32.mrf.mxu0 }
0x17dc   : > { %v6128_v40 = vadd.f32 %v6121_v55, %v6119_v44 }
0x17dd   : > { %v6123_v47 = vpop.f32.mrf.mxu0 }
0x17de   : > { %6129 = vadd.xlane.f32.xlu0 %v6128_v40 }
0x17df   : > { %v6125_v14 = vpop.f32.mrf.mxu0 }
0x17e0   : > { %v6131_v10 = vadd.f32 %v6125_v14, %v6123_v47 }
0x17e2   : > { %6132 = vadd.xlane.f32.xlu1 %v6131_v10 }
0x1867   : > { %v6130_v59 = vpop.xlane.xlu0 %6129 }
0x1868   : > { %v6134_v2 = vmul.f32 0.00390625, %v6130_v59 }
0x186b   : > { %v6133_v45 = vpop.xlane.xlu1 %6132 }
0x186c   : > { %v6135_v41 = vmul.f32 0.00390625, %v6133_v45 }
0x186e   : > { %v6136_v37 = vpack.c.bf16 %v6135_v41, %v6134_v2 }
0x1870   : > { %7290 = vmatpush3.bf16.msra.mxu1 %v6136_v37 }
0x1873   : > { %7292 = vmatmul.mubr.msk.bf16.vlgmr.msra.gmra.mxu1 %vm9583_vm14, %v4998_v4 }
0x1874   : > { %6300 = vmatprep.mubr.bf16.mxu1 %v9446_v25 }
0x1933   : > { %v6174_v16 = vpop.f32.mrf.mxu1 }
0x1934   : > { %v6180_v60 = vmax.f32 %v6174_v16, 0.0 }
0x1935   : > { %v7293_v23 = vpop.f32.mrf.mxu1 }
0x1936   : > { %v6181_v9 = vpack.c.bf16 %v6180_v60, %v6180_v60 }
0x1937   : > { %v6177_v6 = vpop.f32.mrf.mxu1 }
0x1938   : > { %v6191_v0 = vsel %vm9584_vm6, %v6181_v9, 0 }
0x1939   : > { %v7294_v48 = vpop.f32.mrf.mxu1  ;;  %7296 = vmatpush3.bf16.msra.mxu0 %v6191_v0 }
0x193c   : > { %7298 = vmatmul.mubr.msk.bf16.vlgmr.msra.gmra.mxu0 %vm9585_vm12, %v7373_v31 }
0x19fc   : > { %v6227_v35 = vpop.f32.mrf.mxu0 }
0x19fd   : > { %v6234_v49 = vsub.f32 0.0, %v6227_v35 }
0x19fe   : > { %v7299_v61 = vpop.f32.mrf.mxu0 }
0x19ff   : > { %v6236_v27 = vmul.f32 1.442695, %v6234_v49 }
0x1a00   : > { %v6230_v25 = vpop.f32.mrf.mxu0 }
0x1a01   : > { %7402 = vpow2.f32 %v6236_v27  ;;  %v6235_v13 = vsub.f32 0.0, %v6230_v25 }
0x1a02   : > { %v7300_v22 = vpop.f32.mrf.mxu0 }
0x1a03   : > { %v6238_v1 = vmul.f32 1.442695, %v6235_v13 }
0x1a05   : > { %7404 = vpow2.f32 %v6238_v1 }
0x1a0e   : > { %v7403_v33 = vpop.eup %7402 }
0x1a0f   : > { %v6240_v39 = vadd.f32 1.0, %v7403_v33 }
0x1a11   : > { %7406 = vrcp.f32 %v6240_v39 }
0x1a12   : > { %v7405_v24 = vpop.eup %7404 }
0x1a13   : > { %v6241_v5 = vadd.f32 1.0, %v7405_v24 }
0x1a15   : > { %7408 = vrcp.f32 %v6241_v5 }
0x1a1e   : > { %v7407_v57 = vpop.eup %7406 }
0x1a1f   : > { %6246 = vperm.xlu0 %7337, %v7407_v57  }
0x1a22   : > { %v7409_v38 = vpop.eup %7408 }
0x1a23   : > { %6251 = vperm.xlu1 %7338, %v7409_v38  }
0x1a3e   : > { %3667 = vadd.xlane.f32.xlu0 %v8609_v28  ;;  %v6262_v28 = vld [vmem:[%s9414_s14] sm:$0x1] }
0x1a9a   : > { %v6247_v51 = vpop.permute.xlu0 %6246 }
0x1a9b   : > { %v6254_v12 = vmul.f32 %v6247_v51, %v6119_v44  ;;  %v6255_v42 = vmul.f32 %v6247_v51, %v6121_v55 }
0x1a9d   : > { %v6258_v20 = vadd.f32 %v6254_v12, %v9005_v15  ;;  %v6259_v52 = vadd.f32 %v6255_v42, %v9008_v7  ;;  %v7465_v7 = vmov 1966171168  }
0x1a9e   : > { %v6252_v46 = vpop.permute.xlu1 %6251 }
0x1a9f   : > { %v6256_v63 = vmul.f32 %v6252_v46, %v6123_v47  ;;  %v6257_v30 = vmul.f32 %v6252_v46, %v6125_v14 }
0x1aa1   : > { %v6260_v56 = vadd.f32 %v6256_v63, %v9054_v18  ;;  %v6261_v21 = vadd.f32 %v6257_v30, %v9029_v43  ;;  %v6313_v18 = vunpack.c.l.s4 %v7465_v7 }
0x1aa3   : > { %v6263_v26 = vpack.c.bf16 %v6260_v56, %v6258_v20  ;;  %v6264_v29 = vpack.c.bf16 %v6261_v21, %v6259_v52  ;;  %v6314_v43 = vunpack.c.0.s8 %v6313_v18 }
0x1aa5   : > { %6282 = vmatprep.subr.bf16.mxu1 %v6264_v29  ;;  %v6317_v62 = vsub.s32 %v6314_v43, %v9587_v32 }
0x1aa6   : > { %6283 = vmatpush1.bf16.msra.mxu1 %v6263_v26 }
0x1aa9   : > { %6945 = vmatmul.mubr.msk.bf16.vlgmr.msra.gmra.mxu1 %vm9586_vm13, %v6262_v28 }
0x1ac7   : > { %v3668_v15 = vpop.xlane.xlu0 %3667 }
0x1ac8   : > { %3669 = vst [vmem:[%s543_s24] sm:$0x1] %v3668_v15 }
0x1b69   : > { %v6302_v11 = vpop.f32.mrf.mxu1 }
0x1b6b   : > { %v6304_v17 = vpop.f32.mrf.mxu1 }
0x1b6c   : > { %v6311_v54 = vcombine.low %v6302_v11, %v6304_v17 }
0x1b6d   : > { %v6306_v34 = vpop.f32.mrf.mxu1 }
0x1b6e   : > { %v6318_v36 = vrot.slane %v6311_v54, %v6317_v62 }
0x1b6f   : > { %v6307_v50 = vpop.f32.mrf.mxu1 }
0x1b70   : > { %v6325_v58 = vrot.slane %v6318_v36, %v6317_v62 }
0x1b72   : > { %6331 = vst.msk [vmem:[%s540_s30] sm:$0x3] %vm6329_vm15, %v6325_v58 }
0x1b73 PF: > { %s28_s21 = sadd.s32 1, %s7446_s21  }
0x1b74   : > { %p25_p1 = scmp.ge.s32.totalorder %s28_s21, 4  }
0x1b76   :  { %27 = sbr.rel (!%p25_p1) target bundleno = 3 (0x3), region = 136 }
0x1b7b   :  { %6363 = vsyncpa [#allocation5], 1 }
0x1b7c   :  { %6365 = vsyncpa [#allocation5 + $0x1], 1 }

</bundles_post_ra>
